<compile_context>
chip_gen: v7x
topology: tpu7x:2x2x1
jax: 0.10.0
libtpu: 0.0.40
codegen_flags: <defaults>
</compile_context>

<pallas_src>
import functools

import jax
import jax.numpy as jnp
from jax.experimental import pallas as pl
from jax.experimental.pallas import tpu as pltpu

_CompilerParams = getattr(pltpu, "CompilerParams", None) or getattr(
    pltpu, "TPUCompilerParams")

IN_CHANNELS = 3
FEATURE_CHANNELS = [16, 24, 32, 96, 320]   # timm mobilenetv2_100 feature_info


def _round_up(x, m):
    return ((x + m - 1) // m) * m


@functools.lru_cache(maxsize=None)
def _vmem_config():
    """Chip-dependent (tile VMEM budget, scoped vmem limit) in bytes."""
    try:
        phys = int(pltpu.get_tpu_info().vmem_capacity_bytes)
    except Exception:  # be conservative if the query is unavailable
        phys = 64 * 1024 * 1024
    if phys >= 96 * 1024 * 1024:            # v5e / v6e: 128 MiB VMEM
        return 40 * 1024 * 1024, 64 * 1024 * 1024
    return 10 * 1024 * 1024, 32 * 1024 * 1024   # v7x: 64 MiB per TC


# ----------------------------------------------------------------------------
# Kernel: fused 3x3/stride-2 conv (as a 2x2 stride-1 conv over space-to-depth
# input) + bias + ReLU6.  bf16 operands on the MXU, f32 accumulation.
# ----------------------------------------------------------------------------
def _make_conv_kernel(kp, ow, fuse_taps):
    def kernel(y_ref, w_ref, b_ref, o_ref):
        # y_ref: (1, 1, TOH+1, WS_PAD, KP) bf16   s2d rows incl. bottom halo
        # w_ref: (4*KP, COUT)              bf16   packed 2x2-tap weights
        # b_ref: (1, COUT)                 f32
        # o_ref: (1, TOH, OW, COUT)        bf16
        toh = o_ref.shape[1]
        cout = o_ref.shape[3]
        ws_pad = y_ref.shape[3]
        ow_pad = ws_pad - 1
        m = toh * ow_pad

        y = y_ref[0, 0]                              # (TOH+1, WS_PAD, KP)

        def tap(dh, dw):
            # Shifted 2x2-tap view, flattened over (row, col).  ow_pad is a
            # multiple of 16, so the reshape is layout preserving.
            v = y[dh:dh + toh, dw:dw + ow_pad, :]
            return v.reshape(m, kp)

        taps = (tap(0, 0), tap(0, 1), tap(1, 0), tap(1, 1))
        if fuse_taps:
            # KP is 128-aligned: one MXU matmul with contraction K = 4*KP
            # (lane concatenation at vreg-aligned offsets).
            slab = jnp.concatenate(taps, axis=-1)    # (M, 4*KP)
            acc = jnp.dot(slab, w_ref[...],
                          preferred_element_type=jnp.float32)
        else:
            # KP < 128: avoid unaligned lane concat; 4 tap matmuls with
            # f32 accumulation instead.
            acc = jnp.dot(taps[0], w_ref[0:kp, :],
                          preferred_element_type=jnp.float32)
            for t in range(1, 4):
                acc = acc + jnp.dot(taps[t], w_ref[t * kp:(t + 1) * kp, :],
                                    preferred_element_type=jnp.float32)

        acc = jnp.clip(acc + b_ref[...], 0.0, 6.0)   # bias + ReLU6 in f32
        out = acc.reshape(toh, ow_pad, cout)[:, :ow, :]
        o_ref[0] = out.astype(o_ref.dtype)

    return kernel


# ----------------------------------------------------------------------------
# Row-block selection from the chip-dependent VMEM budget.
# ----------------------------------------------------------------------------
def _pick_toh(oh, ws_pad, ow, kp, cout, budget):
    ow_pad = ws_pad - 1

    def est(toh):
        m = toh * ow_pad
        inp = 2 * (toh + 1) * ws_pad * kp * 2        # double-buffered input
        wts = 2 * 4 * kp * cout * 2
        outb = 2 * toh * ow * cout * 2
        tmp = ((toh + 1) * ws_pad * kp * 2           # loaded y
               + 2 * m * 4 * kp * 2                  # tap views / K slab
               + 3 * m * cout * 4)                   # f32 acc + epilogue
        return inp + wts + outb + tmp + 2 * cout * 4

    if est(oh) <= budget:
        return oh                                    # whole image per step
    best = 1
    for cand in range(1, oh + 1):
        if est(cand) <= budget:
            best = cand
    if best > 8:
        best -= best % 8
    return best


# ----------------------------------------------------------------------------
# Weight packing (done once at init, NOT inside the jitted forward).
# K-block t = 2*dh+dw holds W[2*dh+ph, 2*dw+pw, ci, :] at row
# t*KP + (2*ph+pw)*Cin + ci; rows for kh/kw == 3 and channel padding are zero.
# ----------------------------------------------------------------------------
def pack_conv_params(w, b):
    cin, cout = int(w.shape[2]), int(w.shape[3])
    kp = _round_up(4 * cin, 16)
    wp = jnp.zeros((4 * kp, cout), jnp.float32)
    for dh in range(2):
        for dw in range(2):
            for ph in range(2):
                for pw in range(2):
                    kh, kw = 2 * dh + ph, 2 * dw + pw
                    if kh < 3 and kw < 3:
                        off = (2 * dh + dw) * kp + (2 * ph + pw) * cin
                        wp = wp.at[off:off + cin, :].set(w[kh, kw])
    return wp.astype(jnp.bfloat16), b.reshape(1, cout).astype(jnp.float32)


# ----------------------------------------------------------------------------
# Conv3x3(stride=2, pad=1) + bias + ReLU6 (one pallas_call per stage).
# ----------------------------------------------------------------------------
def conv3x3_s2_relu6(x_nhwc, w_packed, bias_p):
    """x_nhwc: (N,H,W,Cin) bf16; w_packed: (4*KP,Cout) bf16; bias_p: (1,Cout)."""
    n, h, w, cin = x_nhwc.shape
    kp = w_packed.shape[0] // 4
    cout = w_packed.shape[1]
    assert kp >= 4 * cin
    oh, ow = (h + 1) // 2, (w + 1) // 2
    hs, ws = oh + 1, ow + 1
    ow_pad = _round_up(ow, 16)          # keeps in-kernel reshapes aligned
    ws_pad = ow_pad + 1
    budget, vmem_limit = _vmem_config()
    toh = _pick_toh(oh, ws_pad, ow, kp, cout, budget)
    nblk = pl.cdiv(oh, toh)

    # Space-to-depth layout pass (one fused XLA copy):
    #   y[n, a, b, (ph, pw, c)] = x_padded[n, 2a+ph, 2b+pw, c]
    # TODO(synk): fold this repack into the previous stage's epilogue
    # (needs strided VMEM stores) to remove one HBM round trip per stage.
    xp = jnp.pad(x_nhwc, ((0, 0), (1, 2 * oh + 1 - h),
                          (1, 2 * ow + 1 - w), (0, 0)))
    y = xp.reshape(n, hs, 2, ws, 2, cin).transpose(0, 1, 3, 2, 4, 5)
    y = y.reshape(n, hs, ws, 4 * cin)
    y = jnp.pad(y, ((0, 0), (0, nblk * toh + 1 - hs), (0, ws_pad - ws),
                    (0, kp - 4 * cin)))
    if nblk == 1:
        y_blk = y[:, None]                       # (n, 1, OH+1, WS_PAD, KP)
    else:
        # haloed row blocks: block r holds s2d rows [r*toh, r*toh + toh]
        rows = (jnp.arange(nblk)[:, None] * toh
                + jnp.arange(toh + 1)[None, :])
        y_blk = y[:, rows]                       # (n, nblk, TOH+1, ...)

    fuse_taps = (kp % 128 == 0)
    kernel = _make_conv_kernel(kp, ow, fuse_taps)

    if nblk >= 4:
        in_spec_y = pl.BlockSpec((1, 1, toh + 1, ws_pad, kp),
                                 lambda i, r: (i, r, 0, 0, 0),
                                 pipeline_mode=pl.Buffered(3))
    else:
        in_spec_y = pl.BlockSpec((1, 1, toh + 1, ws_pad, kp),
                                 lambda i, r: (i, r, 0, 0, 0))

    flops = 2 * n * nblk * toh * ow_pad * 4 * kp * cout
    bytes_accessed = (y_blk.size * 2 + w_packed.size * 2 + bias_p.size * 4
                      + n * nblk * toh * ow * cout * 2)

    out = pl.pallas_call(
        kernel,
        out_shape=jax.ShapeDtypeStruct((n, nblk * toh, ow, cout),
                                       jnp.bfloat16),
        grid=(n, nblk),
        in_specs=[
            in_spec_y,
            pl.BlockSpec((4 * kp, cout), lambda i, r: (0, 0)),
            pl.BlockSpec((1, cout), lambda i, r: (0, 0)),
        ],
        out_specs=pl.BlockSpec((1, toh, ow, cout), lambda i, r: (i, r, 0, 0)),
        compiler_params=_CompilerParams(
            dimension_semantics=("parallel", "parallel"),
            vmem_limit_bytes=vmem_limit),
        cost_estimate=pl.CostEstimate(flops=flops, transcendentals=0,
                                      bytes_accessed=bytes_accessed),
    )(y_blk, w_packed, bias_p)

    if nblk * toh != oh:
        out = out[:, :oh]
    return out


# ----------------------------------------------------------------------------
# Synthetic "Net" (MobileNetV2-style feature pyramid), returns fms[-4:].
# ----------------------------------------------------------------------------
def init_params(key):
    raw, packed = [], []
    cin = IN_CHANNELS
    for cout in FEATURE_CHANNELS:
        key, kw_, kb_ = jax.random.split(key, 3)
        wt = jax.random.normal(kw_, (3, 3, cin, cout), jnp.float32) * 0.1
        bs = jax.random.normal(kb_, (cout,), jnp.float32) * 0.01
        raw.append((wt, bs))
        packed.append(pack_conv_params(wt, bs))   # hoisted out of forward
        cin = cout
    return {"raw": raw, "packed": packed}


@jax.jit
def net_forward(x_nchw, params):
    # single NCHW->NHWC transpose + bf16 cast at entry; stages stay NHWC bf16
    x = jnp.transpose(x_nchw, (0, 2, 3, 1)).astype(jnp.bfloat16)
    fms = []
    for wp, bp in params["packed"]:
        x = conv3x3_s2_relu6(x, wp, bp)
        fms.append(x)
    # NHWC->NCHW only on the 4 returned feature maps (matches fms[-4:])
    return [jnp.transpose(f.astype(jnp.float32), (0, 3, 1, 2))
            for f in fms[-4:]]


@jax.jit
def net_forward_ref(x_nchw, params):
    # Pure-JAX reference with the same bf16-in / f32-accumulate numerics.
    x = jnp.transpose(x_nchw, (0, 2, 3, 1)).astype(jnp.float32)
    fms = []
    for wt, bs in params["raw"]:
        out = jax.lax.conv_general_dilated(
            x.astype(jnp.bfloat16), wt.astype(jnp.bfloat16),
            window_strides=(2, 2), padding=((1, 1), (1, 1)),
            dimension_numbers=("NHWC", "HWIO", "NHWC"),
            preferred_element_type=jnp.float32)
        out = jnp.clip(out + bs[None, None, None, :], 0.0, 6.0)
        x = out.astype(jnp.bfloat16).astype(jnp.float32)
        fms.append(x)
    return [jnp.transpose(f, (0, 3, 1, 2)) for f in fms[-4:]]


if __name__ == "__main__":
    key = jax.random.PRNGKey(0)
    key, kx = jax.random.split(key)
    # small input consistent with an image backbone: N=2, C=3, H=W=32
    x = jax.random.normal(kx, (2, 3, 32, 32), jnp.float32)
    params = init_params(key)

    outs = net_forward(x, params)
    outs = [jax.block_until_ready(o) for o in outs]

    expected = [
        (2, 24, 8, 8),     # stride 4
        (2, 32, 4, 4),     # stride 8
        (2, 96, 2, 2),     # stride 16
        (2, 320, 1, 1),    # stride 32
    ]
    assert len(outs) == 4
    for o, es in zip(outs, expected):
        assert o.shape == es, (o.shape, es)
        assert o.dtype == jnp.float32
        assert bool(jnp.all(jnp.isfinite(o)))

    # numerical check vs. a plain-JAX conv reference with matching precision
    refs = net_forward_ref(x, params)
    refs = [jax.block_until_ready(r) for r in refs]
    for o, r in zip(outs, refs):
        max_err = float(jnp.max(jnp.abs(o - r)))
        mean_err = float(jnp.mean(jnp.abs(o - r)))
        assert max_err < 7.5e-2, f"max|diff|={max_err}"
        assert mean_err < 1e-2, f"mean|diff|={mean_err}"

    print("KERNEL_OK")
</pallas_src>

<mosaic_0001>
module attributes {stable_mosaic.version = 11 : i64} {
  func.func @kernel(%arg0: i32, %arg1: i32, %arg2: memref<1x1x17x17x16xbf16, #tpu.memory_space<vmem>>, %arg3: memref<64x16xbf16, #tpu.memory_space<vmem>>, %arg4: memref<1x16xf32, #tpu.memory_space<vmem>>, %arg5: memref<1x16x16x16xbf16, #tpu.memory_space<vmem>>) attributes {dimension_semantics = [#tpu.dimension_semantics<parallel>, #tpu.dimension_semantics<parallel>], iteration_bounds = array<i64: 2, 1>, scalar_prefetch = 0 : i64, scratch_operands = 0 : i64, tpu.core_type = #tpu.core_type<tc>, window_params = [{transform_indices = @transform_0, window_bounds = array<i64: 1, 1, 17, 17, 16>}, {pipeline_mode = #tpu.pipeline_mode<synchronous>, transform_indices = @transform_1, window_bounds = array<i64: 64, 16>}, {pipeline_mode = #tpu.pipeline_mode<synchronous>, transform_indices = @transform_2, window_bounds = array<i64: 1, 16>}, {transform_indices = @transform_3, window_bounds = array<i64: 1, 16, 16, 16>}]} {
    %c0 = arith.constant 0 : index
    %c0_0 = arith.constant 0 : index
    %c0_1 = arith.constant 0 : index
    %c0_2 = arith.constant 0 : index
    %c0_3 = arith.constant 0 : index
    %0 = vector.load %arg2[%c0, %c0_0, %c0_1, %c0_2, %c0_3] : memref<1x1x17x17x16xbf16, #tpu.memory_space<vmem>>, vector<1x1x17x17x16xbf16>
    %1 = vector.shape_cast %0 : vector<1x1x17x17x16xbf16> to vector<17x17x16xbf16>
    %2 = vector.extract_strided_slice %1 {offsets = [0, 0, 0], sizes = [16, 16, 16], strides = [1, 1, 1]} : vector<17x17x16xbf16> to vector<16x16x16xbf16>
    %3 = vector.shape_cast %2 : vector<16x16x16xbf16> to vector<256x16xbf16>
    %4 = vector.extract_strided_slice %1 {offsets = [0, 1, 0], sizes = [16, 16, 16], strides = [1, 1, 1]} : vector<17x17x16xbf16> to vector<16x16x16xbf16>
    %5 = vector.shape_cast %4 : vector<16x16x16xbf16> to vector<256x16xbf16>
    %6 = vector.extract_strided_slice %1 {offsets = [1, 0, 0], sizes = [16, 16, 16], strides = [1, 1, 1]} : vector<17x17x16xbf16> to vector<16x16x16xbf16>
    %7 = vector.shape_cast %6 : vector<16x16x16xbf16> to vector<256x16xbf16>
    %8 = vector.extract_strided_slice %1 {offsets = [1, 1, 0], sizes = [16, 16, 16], strides = [1, 1, 1]} : vector<17x17x16xbf16> to vector<16x16x16xbf16>
    %9 = vector.shape_cast %8 : vector<16x16x16xbf16> to vector<256x16xbf16>
    %c0_4 = arith.constant 0 : index
    %c0_5 = arith.constant 0 : index
    %10 = vector.load %arg3[%c0_4, %c0_5] : memref<64x16xbf16, #tpu.memory_space<vmem>>, vector<16x16xbf16>
    %cst = arith.constant dense<0.000000e+00> : vector<256x16xf32>
    %11 = tpu.matmul %3, %10, %cst {dimension_numbers = #tpu.dot_dimension_numbers<[1], [0], [0], [1], [0, 0, 1, 1], [], []>} : vector<256x16xbf16>, vector<16x16xbf16>, vector<256x16xf32> -> vector<256x16xf32>
    %c16 = arith.constant 16 : index
    %c0_6 = arith.constant 0 : index
    %12 = vector.load %arg3[%c16, %c0_6] : memref<64x16xbf16, #tpu.memory_space<vmem>>, vector<16x16xbf16>
    %cst_7 = arith.constant dense<0.000000e+00> : vector<256x16xf32>
    %13 = tpu.matmul %5, %12, %cst_7 {dimension_numbers = #tpu.dot_dimension_numbers<[1], [0], [0], [1], [0, 0, 1, 1], [], []>} : vector<256x16xbf16>, vector<16x16xbf16>, vector<256x16xf32> -> vector<256x16xf32>
    %14 = arith.addf %11, %13 : vector<256x16xf32>
    %c32 = arith.constant 32 : index
    %c0_8 = arith.constant 0 : index
    %15 = vector.load %arg3[%c32, %c0_8] : memref<64x16xbf16, #tpu.memory_space<vmem>>, vector<16x16xbf16>
    %cst_9 = arith.constant dense<0.000000e+00> : vector<256x16xf32>
    %16 = tpu.matmul %7, %15, %cst_9 {dimension_numbers = #tpu.dot_dimension_numbers<[1], [0], [0], [1], [0, 0, 1, 1], [], []>} : vector<256x16xbf16>, vector<16x16xbf16>, vector<256x16xf32> -> vector<256x16xf32>
    %17 = arith.addf %14, %16 : vector<256x16xf32>
    %c48 = arith.constant 48 : index
    %c0_10 = arith.constant 0 : index
    %18 = vector.load %arg3[%c48, %c0_10] : memref<64x16xbf16, #tpu.memory_space<vmem>>, vector<16x16xbf16>
    %cst_11 = arith.constant dense<0.000000e+00> : vector<256x16xf32>
    %19 = tpu.matmul %9, %18, %cst_11 {dimension_numbers = #tpu.dot_dimension_numbers<[1], [0], [0], [1], [0, 0, 1, 1], [], []>} : vector<256x16xbf16>, vector<16x16xbf16>, vector<256x16xf32> -> vector<256x16xf32>
    %20 = arith.addf %17, %19 : vector<256x16xf32>
    %c0_12 = arith.constant 0 : index
    %c0_13 = arith.constant 0 : index
    %21 = vector.load %arg4[%c0_12, %c0_13] : memref<1x16xf32, #tpu.memory_space<vmem>>, vector<1x16xf32>
    %22 = vector.broadcast %21 : vector<1x16xf32> to vector<256x16xf32>
    %23 = arith.addf %20, %22 : vector<256x16xf32>
    %cst_14 = arith.constant 0.000000e+00 : f32
    %cst_15 = arith.constant 6.000000e+00 : f32
    %24 = vector.broadcast %cst_14 : f32 to vector<256x16xf32>
    %25 = arith.maximumf %24, %23 : vector<256x16xf32>
    %26 = vector.broadcast %cst_15 : f32 to vector<256x16xf32>
    %27 = arith.minimumf %26, %25 : vector<256x16xf32>
    %28 = vector.shape_cast %27 : vector<256x16xf32> to vector<16x16x16xf32>
    %29 = arith.truncf %28 : vector<16x16x16xf32> to vector<16x16x16xbf16>
    %c0_16 = arith.constant 0 : index
    %c0_17 = arith.constant 0 : index
    %c0_18 = arith.constant 0 : index
    %c0_19 = arith.constant 0 : index
    %30 = vector.load %arg5[%c0_16, %c0_17, %c0_18, %c0_19] : memref<1x16x16x16xbf16, #tpu.memory_space<vmem>>, vector<1x16x16x16xbf16>
    %31 = vector.shape_cast %30 : vector<1x16x16x16xbf16> to vector<16x16x16xbf16>
    %32 = vector.shape_cast %29 : vector<16x16x16xbf16> to vector<1x16x16x16xbf16>
    tpu.vector_store %arg5[%c0_16, %c0_17, %c0_18, %c0_19], %32 {strides = array<i32>} : memref<1x16x16x16xbf16, #tpu.memory_space<vmem>>, vector<1x16x16x16xbf16>,
    return
  }
  func.func @transform_0(%arg0: i32, %arg1: i32) -> (i32, i32, i32, i32, i32) {
    %c0_i32 = arith.constant 0 : i32
    %c0_i32_0 = arith.constant 0 : i32
    %c0_i32_1 = arith.constant 0 : i32
    %c0_i32_2 = arith.constant 0 : i32
    return %arg0, %arg1, %c0_i32, %c0_i32_0, %c0_i32_1 : i32, i32, i32, i32, i32
  }
  func.func @transform_1(%arg0: i32, %arg1: i32) -> (i32, i32) {
    %c0_i32 = arith.constant 0 : i32
    %c0_i32_0 = arith.constant 0 : i32
    %c0_i32_1 = arith.constant 0 : i32
    return %c0_i32, %c0_i32_0 : i32, i32
  }
  func.func @transform_2(%arg0: i32, %arg1: i32) -> (i32, i32) {
    %c0_i32 = arith.constant 0 : i32
    %c0_i32_0 = arith.constant 0 : i32
    %c0_i32_1 = arith.constant 0 : i32
    return %c0_i32, %c0_i32_0 : i32, i32
  }
  func.func @transform_3(%arg0: i32, %arg1: i32) -> (i32, i32, i32, i32) {
    %c0_i32 = arith.constant 0 : i32
    %c0_i32_0 = arith.constant 0 : i32
    %c0_i32_1 = arith.constant 0 : i32
    return %arg0, %arg1, %c0_i32, %c0_i32_0 : i32, i32, i32, i32
  }
}

module attributes {stable_mosaic.version = 11 : i64} {
  func.func @kernel(%arg0: i32, %arg1: i32, %arg2: memref<1x1x9x17x64xbf16, #tpu.memory_space<vmem>>, %arg3: memref<256x24xbf16, #tpu.memory_space<vmem>>, %arg4: memref<1x24xf32, #tpu.memory_space<vmem>>, %arg5: memref<1x8x8x24xbf16, #tpu.memory_space<vmem>>) attributes {dimension_semantics = [#tpu.dimension_semantics<parallel>, #tpu.dimension_semantics<parallel>], iteration_bounds = array<i64: 2, 1>, scalar_prefetch = 0 : i64, scratch_operands = 0 : i64, tpu.core_type = #tpu.core_type<tc>, window_params = [{transform_indices = @transform_0, window_bounds = array<i64: 1, 1, 9, 17, 64>}, {pipeline_mode = #tpu.pipeline_mode<synchronous>, transform_indices = @transform_1, window_bounds = array<i64: 256, 24>}, {pipeline_mode = #tpu.pipeline_mode<synchronous>, transform_indices = @transform_2, window_bounds = array<i64: 1, 24>}, {transform_indices = @transform_3, window_bounds = array<i64: 1, 8, 8, 24>}]} {
    %c0 = arith.constant 0 : index
    %c0_0 = arith.constant 0 : index
    %c0_1 = arith.constant 0 : index
    %c0_2 = arith.constant 0 : index
    %c0_3 = arith.constant 0 : index
    %0 = vector.load %arg2[%c0, %c0_0, %c0_1, %c0_2, %c0_3] : memref<1x1x9x17x64xbf16, #tpu.memory_space<vmem>>, vector<1x1x9x17x64xbf16>
    %1 = vector.shape_cast %0 : vector<1x1x9x17x64xbf16> to vector<9x17x64xbf16>
    %2 = vector.extract_strided_slice %1 {offsets = [0, 0, 0], sizes = [8, 16, 64], strides = [1, 1, 1]} : vector<9x17x64xbf16> to vector<8x16x64xbf16>
    %3 = vector.shape_cast %2 : vector<8x16x64xbf16> to vector<128x64xbf16>
    %4 = vector.extract_strided_slice %1 {offsets = [0, 1, 0], sizes = [8, 16, 64], strides = [1, 1, 1]} : vector<9x17x64xbf16> to vector<8x16x64xbf16>
    %5 = vector.shape_cast %4 : vector<8x16x64xbf16> to vector<128x64xbf16>
    %6 = vector.extract_strided_slice %1 {offsets = [1, 0, 0], sizes = [8, 16, 64], strides = [1, 1, 1]} : vector<9x17x64xbf16> to vector<8x16x64xbf16>
    %7 = vector.shape_cast %6 : vector<8x16x64xbf16> to vector<128x64xbf16>
    %8 = vector.extract_strided_slice %1 {offsets = [1, 1, 0], sizes = [8, 16, 64], strides = [1, 1, 1]} : vector<9x17x64xbf16> to vector<8x16x64xbf16>
    %9 = vector.shape_cast %8 : vector<8x16x64xbf16> to vector<128x64xbf16>
    %c0_4 = arith.constant 0 : index
    %c0_5 = arith.constant 0 : index
    %10 = vector.load %arg3[%c0_4, %c0_5] : memref<256x24xbf16, #tpu.memory_space<vmem>>, vector<64x24xbf16>
    %cst = arith.constant dense<0.000000e+00> : vector<128x24xf32>
    %11 = tpu.matmul %3, %10, %cst {dimension_numbers = #tpu.dot_dimension_numbers<[1], [0], [0], [1], [0, 0, 1, 1], [], []>} : vector<128x64xbf16>, vector<64x24xbf16>, vector<128x24xf32> -> vector<128x24xf32>
    %c64 = arith.constant 64 : index
    %c0_6 = arith.constant 0 : index
    %12 = vector.load %arg3[%c64, %c0_6] : memref<256x24xbf16, #tpu.memory_space<vmem>>, vector<64x24xbf16>
    %cst_7 = arith.constant dense<0.000000e+00> : vector<128x24xf32>
    %13 = tpu.matmul %5, %12, %cst_7 {dimension_numbers = #tpu.dot_dimension_numbers<[1], [0], [0], [1], [0, 0, 1, 1], [], []>} : vector<128x64xbf16>, vector<64x24xbf16>, vector<128x24xf32> -> vector<128x24xf32>
    %14 = arith.addf %11, %13 : vector<128x24xf32>
    %c128 = arith.constant 128 : index
    %c0_8 = arith.constant 0 : index
    %15 = vector.load %arg3[%c128, %c0_8] : memref<256x24xbf16, #tpu.memory_space<vmem>>, vector<64x24xbf16>
    %cst_9 = arith.constant dense<0.000000e+00> : vector<128x24xf32>
    %16 = tpu.matmul %7, %15, %cst_9 {dimension_numbers = #tpu.dot_dimension_numbers<[1], [0], [0], [1], [0, 0, 1, 1], [], []>} : vector<128x64xbf16>, vector<64x24xbf16>, vector<128x24xf32> -> vector<128x24xf32>
    %17 = arith.addf %14, %16 : vector<128x24xf32>
    %c192 = arith.constant 192 : index
    %c0_10 = arith.constant 0 : index
    %18 = vector.load %arg3[%c192, %c0_10] : memref<256x24xbf16, #tpu.memory_space<vmem>>, vector<64x24xbf16>
    %cst_11 = arith.constant dense<0.000000e+00> : vector<128x24xf32>
    %19 = tpu.matmul %9, %18, %cst_11 {dimension_numbers = #tpu.dot_dimension_numbers<[1], [0], [0], [1], [0, 0, 1, 1], [], []>} : vector<128x64xbf16>, vector<64x24xbf16>, vector<128x24xf32> -> vector<128x24xf32>
    %20 = arith.addf %17, %19 : vector<128x24xf32>
    %c0_12 = arith.constant 0 : index
    %c0_13 = arith.constant 0 : index
    %21 = vector.load %arg4[%c0_12, %c0_13] : memref<1x24xf32, #tpu.memory_space<vmem>>, vector<1x24xf32>
    %22 = vector.broadcast %21 : vector<1x24xf32> to vector<128x24xf32>
    %23 = arith.addf %20, %22 : vector<128x24xf32>
    %cst_14 = arith.constant 0.000000e+00 : f32
    %cst_15 = arith.constant 6.000000e+00 : f32
    %24 = vector.broadcast %cst_14 : f32 to vector<128x24xf32>
    %25 = arith.maximumf %24, %23 : vector<128x24xf32>
    %26 = vector.broadcast %cst_15 : f32 to vector<128x24xf32>
    %27 = arith.minimumf %26, %25 : vector<128x24xf32>
    %28 = vector.shape_cast %27 : vector<128x24xf32> to vector<8x16x24xf32>
    %29 = vector.extract_strided_slice %28 {offsets = [0, 0, 0], sizes = [8, 8, 24], strides = [1, 1, 1]} : vector<8x16x24xf32> to vector<8x8x24xf32>
    %30 = arith.truncf %29 : vector<8x8x24xf32> to vector<8x8x24xbf16>
    %c0_16 = arith.constant 0 : index
    %c0_17 = arith.constant 0 : index
    %c0_18 = arith.constant 0 : index
    %c0_19 = arith.constant 0 : index
    %31 = vector.load %arg5[%c0_16, %c0_17, %c0_18, %c0_19] : memref<1x8x8x24xbf16, #tpu.memory_space<vmem>>, vector<1x8x8x24xbf16>
    %32 = vector.shape_cast %31 : vector<1x8x8x24xbf16> to vector<8x8x24xbf16>
    %33 = vector.shape_cast %30 : vector<8x8x24xbf16> to vector<1x8x8x24xbf16>
    tpu.vector_store %arg5[%c0_16, %c0_17, %c0_18, %c0_19], %33 {strides = array<i32>} : memref<1x8x8x24xbf16, #tpu.memory_space<vmem>>, vector<1x8x8x24xbf16>,
    return
  }
  func.func @transform_0(%arg0: i32, %arg1: i32) -> (i32, i32, i32, i32, i32) {
    %c0_i32 = arith.constant 0 : i32
    %c0_i32_0 = arith.constant 0 : i32
    %c0_i32_1 = arith.constant 0 : i32
    %c0_i32_2 = arith.constant 0 : i32
    return %arg0, %arg1, %c0_i32, %c0_i32_0, %c0_i32_1 : i32, i32, i32, i32, i32
  }
  func.func @transform_1(%arg0: i32, %arg1: i32) -> (i32, i32) {
    %c0_i32 = arith.constant 0 : i32
    %c0_i32_0 = arith.constant 0 : i32
    %c0_i32_1 = arith.constant 0 : i32
    return %c0_i32, %c0_i32_0 : i32, i32
  }
  func.func @transform_2(%arg0: i32, %arg1: i32) -> (i32, i32) {
    %c0_i32 = arith.constant 0 : i32
    %c0_i32_0 = arith.constant 0 : i32
    %c0_i32_1 = arith.constant 0 : i32
    return %c0_i32, %c0_i32_0 : i32, i32
  }
  func.func @transform_3(%arg0: i32, %arg1: i32) -> (i32, i32, i32, i32) {
    %c0_i32 = arith.constant 0 : i32
    %c0_i32_0 = arith.constant 0 : i32
    %c0_i32_1 = arith.constant 0 : i32
    return %arg0, %arg1, %c0_i32, %c0_i32_0 : i32, i32, i32, i32
  }
}

module attributes {stable_mosaic.version = 11 : i64} {
  func.func @kernel(%arg0: i32, %arg1: i32, %arg2: memref<1x1x5x17x96xbf16, #tpu.memory_space<vmem>>, %arg3: memref<384x32xbf16, #tpu.memory_space<vmem>>, %arg4: memref<1x32xf32, #tpu.memory_space<vmem>>, %arg5: memref<1x4x4x32xbf16, #tpu.memory_space<vmem>>) attributes {dimension_semantics = [#tpu.dimension_semantics<parallel>, #tpu.dimension_semantics<parallel>], iteration_bounds = array<i64: 2, 1>, scalar_prefetch = 0 : i64, scratch_operands = 0 : i64, tpu.core_type = #tpu.core_type<tc>, window_params = [{transform_indices = @transform_0, window_bounds = array<i64: 1, 1, 5, 17, 96>}, {pipeline_mode = #tpu.pipeline_mode<synchronous>, transform_indices = @transform_1, window_bounds = array<i64: 384, 32>}, {pipeline_mode = #tpu.pipeline_mode<synchronous>, transform_indices = @transform_2, window_bounds = array<i64: 1, 32>}, {transform_indices = @transform_3, window_bounds = array<i64: 1, 4, 4, 32>}]} {
    %c0 = arith.constant 0 : index
    %c0_0 = arith.constant 0 : index
    %c0_1 = arith.constant 0 : index
    %c0_2 = arith.constant 0 : index
    %c0_3 = arith.constant 0 : index
    %0 = vector.load %arg2[%c0, %c0_0, %c0_1, %c0_2, %c0_3] : memref<1x1x5x17x96xbf16, #tpu.memory_space<vmem>>, vector<1x1x5x17x96xbf16>
    %1 = vector.shape_cast %0 : vector<1x1x5x17x96xbf16> to vector<5x17x96xbf16>
    %2 = vector.extract_strided_slice %1 {offsets = [0, 0, 0], sizes = [4, 16, 96], strides = [1, 1, 1]} : vector<5x17x96xbf16> to vector<4x16x96xbf16>
    %3 = vector.shape_cast %2 : vector<4x16x96xbf16> to vector<64x96xbf16>
    %4 = vector.extract_strided_slice %1 {offsets = [0, 1, 0], sizes = [4, 16, 96], strides = [1, 1, 1]} : vector<5x17x96xbf16> to vector<4x16x96xbf16>
    %5 = vector.shape_cast %4 : vector<4x16x96xbf16> to vector<64x96xbf16>
    %6 = vector.extract_strided_slice %1 {offsets = [1, 0, 0], sizes = [4, 16, 96], strides = [1, 1, 1]} : vector<5x17x96xbf16> to vector<4x16x96xbf16>
    %7 = vector.shape_cast %6 : vector<4x16x96xbf16> to vector<64x96xbf16>
    %8 = vector.extract_strided_slice %1 {offsets = [1, 1, 0], sizes = [4, 16, 96], strides = [1, 1, 1]} : vector<5x17x96xbf16> to vector<4x16x96xbf16>
    %9 = vector.shape_cast %8 : vector<4x16x96xbf16> to vector<64x96xbf16>
    %c0_4 = arith.constant 0 : index
    %c0_5 = arith.constant 0 : index
    %10 = vector.load %arg3[%c0_4, %c0_5] : memref<384x32xbf16, #tpu.memory_space<vmem>>, vector<96x32xbf16>
    %cst = arith.constant dense<0.000000e+00> : vector<64x32xf32>
    %11 = tpu.matmul %3, %10, %cst {dimension_numbers = #tpu.dot_dimension_numbers<[1], [0], [0], [1], [0, 0, 1, 1], [], []>} : vector<64x96xbf16>, vector<96x32xbf16>, vector<64x32xf32> -> vector<64x32xf32>
    %c96 = arith.constant 96 : index
    %c0_6 = arith.constant 0 : index
    %12 = vector.load %arg3[%c96, %c0_6] : memref<384x32xbf16, #tpu.memory_space<vmem>>, vector<96x32xbf16>
    %cst_7 = arith.constant dense<0.000000e+00> : vector<64x32xf32>
    %13 = tpu.matmul %5, %12, %cst_7 {dimension_numbers = #tpu.dot_dimension_numbers<[1], [0], [0], [1], [0, 0, 1, 1], [], []>} : vector<64x96xbf16>, vector<96x32xbf16>, vector<64x32xf32> -> vector<64x32xf32>
    %14 = arith.addf %11, %13 : vector<64x32xf32>
    %c192 = arith.constant 192 : index
    %c0_8 = arith.constant 0 : index
    %15 = vector.load %arg3[%c192, %c0_8] : memref<384x32xbf16, #tpu.memory_space<vmem>>, vector<96x32xbf16>
    %cst_9 = arith.constant dense<0.000000e+00> : vector<64x32xf32>
    %16 = tpu.matmul %7, %15, %cst_9 {dimension_numbers = #tpu.dot_dimension_numbers<[1], [0], [0], [1], [0, 0, 1, 1], [], []>} : vector<64x96xbf16>, vector<96x32xbf16>, vector<64x32xf32> -> vector<64x32xf32>
    %17 = arith.addf %14, %16 : vector<64x32xf32>
    %c288 = arith.constant 288 : index
    %c0_10 = arith.constant 0 : index
    %18 = vector.load %arg3[%c288, %c0_10] : memref<384x32xbf16, #tpu.memory_space<vmem>>, vector<96x32xbf16>
    %cst_11 = arith.constant dense<0.000000e+00> : vector<64x32xf32>
    %19 = tpu.matmul %9, %18, %cst_11 {dimension_numbers = #tpu.dot_dimension_numbers<[1], [0], [0], [1], [0, 0, 1, 1], [], []>} : vector<64x96xbf16>, vector<96x32xbf16>, vector<64x32xf32> -> vector<64x32xf32>
    %20 = arith.addf %17, %19 : vector<64x32xf32>
    %c0_12 = arith.constant 0 : index
    %c0_13 = arith.constant 0 : index
    %21 = vector.load %arg4[%c0_12, %c0_13] : memref<1x32xf32, #tpu.memory_space<vmem>>, vector<1x32xf32>
    %22 = vector.broadcast %21 : vector<1x32xf32> to vector<64x32xf32>
    %23 = arith.addf %20, %22 : vector<64x32xf32>
    %cst_14 = arith.constant 0.000000e+00 : f32
    %cst_15 = arith.constant 6.000000e+00 : f32
    %24 = vector.broadcast %cst_14 : f32 to vector<64x32xf32>
    %25 = arith.maximumf %24, %23 : vector<64x32xf32>
    %26 = vector.broadcast %cst_15 : f32 to vector<64x32xf32>
    %27 = arith.minimumf %26, %25 : vector<64x32xf32>
    %28 = vector.shape_cast %27 : vector<64x32xf32> to vector<4x16x32xf32>
    %29 = vector.extract_strided_slice %28 {offsets = [0, 0, 0], sizes = [4, 4, 32], strides = [1, 1, 1]} : vector<4x16x32xf32> to vector<4x4x32xf32>
    %30 = arith.truncf %29 : vector<4x4x32xf32> to vector<4x4x32xbf16>
    %c0_16 = arith.constant 0 : index
    %c0_17 = arith.constant 0 : index
    %c0_18 = arith.constant 0 : index
    %c0_19 = arith.constant 0 : index
    %31 = vector.load %arg5[%c0_16, %c0_17, %c0_18, %c0_19] : memref<1x4x4x32xbf16, #tpu.memory_space<vmem>>, vector<1x4x4x32xbf16>
    %32 = vector.shape_cast %31 : vector<1x4x4x32xbf16> to vector<4x4x32xbf16>
    %33 = vector.shape_cast %30 : vector<4x4x32xbf16> to vector<1x4x4x32xbf16>
    tpu.vector_store %arg5[%c0_16, %c0_17, %c0_18, %c0_19], %33 {strides = array<i32>} : memref<1x4x4x32xbf16, #tpu.memory_space<vmem>>, vector<1x4x4x32xbf16>,
    return
  }
  func.func @transform_0(%arg0: i32, %arg1: i32) -> (i32, i32, i32, i32, i32) {
    %c0_i32 = arith.constant 0 : i32
    %c0_i32_0 = arith.constant 0 : i32
    %c0_i32_1 = arith.constant 0 : i32
    %c0_i32_2 = arith.constant 0 : i32
    return %arg0, %arg1, %c0_i32, %c0_i32_0, %c0_i32_1 : i32, i32, i32, i32, i32
  }
  func.func @transform_1(%arg0: i32, %arg1: i32) -> (i32, i32) {
    %c0_i32 = arith.constant 0 : i32
    %c0_i32_0 = arith.constant 0 : i32
    %c0_i32_1 = arith.constant 0 : i32
    return %c0_i32, %c0_i32_0 : i32, i32
  }
  func.func @transform_2(%arg0: i32, %arg1: i32) -> (i32, i32) {
    %c0_i32 = arith.constant 0 : i32
    %c0_i32_0 = arith.constant 0 : i32
    %c0_i32_1 = arith.constant 0 : i32
    return %c0_i32, %c0_i32_0 : i32, i32
  }
  func.func @transform_3(%arg0: i32, %arg1: i32) -> (i32, i32, i32, i32) {
    %c0_i32 = arith.constant 0 : i32
    %c0_i32_0 = arith.constant 0 : i32
    %c0_i32_1 = arith.constant 0 : i32
    return %arg0, %arg1, %c0_i32, %c0_i32_0 : i32, i32, i32, i32
  }
}

module attributes {stable_mosaic.version = 11 : i64} {
  func.func @kernel(%arg0: i32, %arg1: i32, %arg2: memref<1x1x3x17x128xbf16, #tpu.memory_space<vmem>>, %arg3: memref<512x96xbf16, #tpu.memory_space<vmem>>, %arg4: memref<1x96xf32, #tpu.memory_space<vmem>>, %arg5: memref<1x2x2x96xbf16, #tpu.memory_space<vmem>>) attributes {dimension_semantics = [#tpu.dimension_semantics<parallel>, #tpu.dimension_semantics<parallel>], iteration_bounds = array<i64: 2, 1>, scalar_prefetch = 0 : i64, scratch_operands = 0 : i64, tpu.core_type = #tpu.core_type<tc>, window_params = [{transform_indices = @transform_0, window_bounds = array<i64: 1, 1, 3, 17, 128>}, {pipeline_mode = #tpu.pipeline_mode<synchronous>, transform_indices = @transform_1, window_bounds = array<i64: 512, 96>}, {pipeline_mode = #tpu.pipeline_mode<synchronous>, transform_indices = @transform_2, window_bounds = array<i64: 1, 96>}, {transform_indices = @transform_3, window_bounds = array<i64: 1, 2, 2, 96>}]} {
    %c0 = arith.constant 0 : index
    %c0_0 = arith.constant 0 : index
    %c0_1 = arith.constant 0 : index
    %c0_2 = arith.constant 0 : index
    %c0_3 = arith.constant 0 : index
    %0 = vector.load %arg2[%c0, %c0_0, %c0_1, %c0_2, %c0_3] : memref<1x1x3x17x128xbf16, #tpu.memory_space<vmem>>, vector<1x1x3x17x128xbf16>
    %1 = vector.shape_cast %0 : vector<1x1x3x17x128xbf16> to vector<3x17x128xbf16>
    %2 = vector.extract_strided_slice %1 {offsets = [0, 0, 0], sizes = [2, 16, 128], strides = [1, 1, 1]} : vector<3x17x128xbf16> to vector<2x16x128xbf16>
    %3 = vector.shape_cast %2 : vector<2x16x128xbf16> to vector<32x128xbf16>
    %4 = vector.extract_strided_slice %1 {offsets = [0, 1, 0], sizes = [2, 16, 128], strides = [1, 1, 1]} : vector<3x17x128xbf16> to vector<2x16x128xbf16>
    %5 = vector.shape_cast %4 : vector<2x16x128xbf16> to vector<32x128xbf16>
    %6 = vector.extract_strided_slice %1 {offsets = [1, 0, 0], sizes = [2, 16, 128], strides = [1, 1, 1]} : vector<3x17x128xbf16> to vector<2x16x128xbf16>
    %7 = vector.shape_cast %6 : vector<2x16x128xbf16> to vector<32x128xbf16>
    %8 = vector.extract_strided_slice %1 {offsets = [1, 1, 0], sizes = [2, 16, 128], strides = [1, 1, 1]} : vector<3x17x128xbf16> to vector<2x16x128xbf16>
    %9 = vector.shape_cast %8 : vector<2x16x128xbf16> to vector<32x128xbf16>
    %10 = tpu.concatenate %3, %5, %7, %9 in 1 : vector<32x128xbf16>, vector<32x128xbf16>, vector<32x128xbf16>, vector<32x128xbf16> -> vector<32x512xbf16>
    %c0_4 = arith.constant 0 : index
    %c0_5 = arith.constant 0 : index
    %11 = vector.load %arg3[%c0_4, %c0_5] : memref<512x96xbf16, #tpu.memory_space<vmem>>, vector<512x96xbf16>
    %cst = arith.constant dense<0.000000e+00> : vector<32x96xf32>
    %12 = tpu.matmul %10, %11, %cst {dimension_numbers = #tpu.dot_dimension_numbers<[1], [0], [0], [1], [0, 0, 1, 1], [], []>} : vector<32x512xbf16>, vector<512x96xbf16>, vector<32x96xf32> -> vector<32x96xf32>
    %c0_6 = arith.constant 0 : index
    %c0_7 = arith.constant 0 : index
    %13 = vector.load %arg4[%c0_6, %c0_7] : memref<1x96xf32, #tpu.memory_space<vmem>>, vector<1x96xf32>
    %14 = vector.broadcast %13 : vector<1x96xf32> to vector<32x96xf32>
    %15 = arith.addf %12, %14 : vector<32x96xf32>
    %cst_8 = arith.constant 0.000000e+00 : f32
    %cst_9 = arith.constant 6.000000e+00 : f32
    %16 = vector.broadcast %cst_8 : f32 to vector<32x96xf32>
    %17 = arith.maximumf %16, %15 : vector<32x96xf32>
    %18 = vector.broadcast %cst_9 : f32 to vector<32x96xf32>
    %19 = arith.minimumf %18, %17 : vector<32x96xf32>
    %20 = vector.shape_cast %19 : vector<32x96xf32> to vector<2x16x96xf32>
    %21 = vector.extract_strided_slice %20 {offsets = [0, 0, 0], sizes = [2, 2, 96], strides = [1, 1, 1]} : vector<2x16x96xf32> to vector<2x2x96xf32>
    %22 = arith.truncf %21 : vector<2x2x96xf32> to vector<2x2x96xbf16>
    %c0_10 = arith.constant 0 : index
    %c0_11 = arith.constant 0 : index
    %c0_12 = arith.constant 0 : index
    %c0_13 = arith.constant 0 : index
    %23 = vector.load %arg5[%c0_10, %c0_11, %c0_12, %c0_13] : memref<1x2x2x96xbf16, #tpu.memory_space<vmem>>, vector<1x2x2x96xbf16>
    %24 = vector.shape_cast %23 : vector<1x2x2x96xbf16> to vector<2x2x96xbf16>
    %25 = vector.shape_cast %22 : vector<2x2x96xbf16> to vector<1x2x2x96xbf16>
    tpu.vector_store %arg5[%c0_10, %c0_11, %c0_12, %c0_13], %25 {strides = array<i32>} : memref<1x2x2x96xbf16, #tpu.memory_space<vmem>>, vector<1x2x2x96xbf16>,
    return
  }
  func.func @transform_0(%arg0: i32, %arg1: i32) -> (i32, i32, i32, i32, i32) {
    %c0_i32 = arith.constant 0 : i32
    %c0_i32_0 = arith.constant 0 : i32
    %c0_i32_1 = arith.constant 0 : i32
    %c0_i32_2 = arith.constant 0 : i32
    return %arg0, %arg1, %c0_i32, %c0_i32_0, %c0_i32_1 : i32, i32, i32, i32, i32
  }
  func.func @transform_1(%arg0: i32, %arg1: i32) -> (i32, i32) {
    %c0_i32 = arith.constant 0 : i32
    %c0_i32_0 = arith.constant 0 : i32
    %c0_i32_1 = arith.constant 0 : i32
    return %c0_i32, %c0_i32_0 : i32, i32
  }
  func.func @transform_2(%arg0: i32, %arg1: i32) -> (i32, i32) {
    %c0_i32 = arith.constant 0 : i32
    %c0_i32_0 = arith.constant 0 : i32
    %c0_i32_1 = arith.constant 0 : i32
    return %c0_i32, %c0_i32_0 : i32, i32
  }
  func.func @transform_3(%arg0: i32, %arg1: i32) -> (i32, i32, i32, i32) {
    %c0_i32 = arith.constant 0 : i32
    %c0_i32_0 = arith.constant 0 : i32
    %c0_i32_1 = arith.constant 0 : i32
    return %arg0, %arg1, %c0_i32, %c0_i32_0 : i32, i32, i32, i32
  }
}

module attributes {stable_mosaic.version = 11 : i64} {
  func.func @kernel(%arg0: i32, %arg1: i32, %arg2: memref<1x1x2x17x384xbf16, #tpu.memory_space<vmem>>, %arg3: memref<1536x320xbf16, #tpu.memory_space<vmem>>, %arg4: memref<1x320xf32, #tpu.memory_space<vmem>>, %arg5: memref<1x1x1x320xbf16, #tpu.memory_space<vmem>>) attributes {dimension_semantics = [#tpu.dimension_semantics<parallel>, #tpu.dimension_semantics<parallel>], iteration_bounds = array<i64: 2, 1>, scalar_prefetch = 0 : i64, scratch_operands = 0 : i64, tpu.core_type = #tpu.core_type<tc>, window_params = [{transform_indices = @transform_0, window_bounds = array<i64: 1, 1, 2, 17, 384>}, {pipeline_mode = #tpu.pipeline_mode<synchronous>, transform_indices = @transform_1, window_bounds = array<i64: 1536, 320>}, {pipeline_mode = #tpu.pipeline_mode<synchronous>, transform_indices = @transform_2, window_bounds = array<i64: 1, 320>}, {transform_indices = @transform_3, window_bounds = array<i64: 1, 1, 1, 320>}]} {
    %c0 = arith.constant 0 : index
    %c0_0 = arith.constant 0 : index
    %c0_1 = arith.constant 0 : index
    %c0_2 = arith.constant 0 : index
    %c0_3 = arith.constant 0 : index
    %0 = vector.load %arg2[%c0, %c0_0, %c0_1, %c0_2, %c0_3] : memref<1x1x2x17x384xbf16, #tpu.memory_space<vmem>>, vector<1x1x2x17x384xbf16>
    %1 = vector.shape_cast %0 : vector<1x1x2x17x384xbf16> to vector<2x17x384xbf16>
    %2 = vector.extract_strided_slice %1 {offsets = [0, 0, 0], sizes = [1, 16, 384], strides = [1, 1, 1]} : vector<2x17x384xbf16> to vector<1x16x384xbf16>
    %3 = vector.shape_cast %2 : vector<1x16x384xbf16> to vector<16x384xbf16>
    %4 = vector.extract_strided_slice %1 {offsets = [0, 1, 0], sizes = [1, 16, 384], strides = [1, 1, 1]} : vector<2x17x384xbf16> to vector<1x16x384xbf16>
    %5 = vector.shape_cast %4 : vector<1x16x384xbf16> to vector<16x384xbf16>
    %6 = vector.extract_strided_slice %1 {offsets = [1, 0, 0], sizes = [1, 16, 384], strides = [1, 1, 1]} : vector<2x17x384xbf16> to vector<1x16x384xbf16>
    %7 = vector.shape_cast %6 : vector<1x16x384xbf16> to vector<16x384xbf16>
    %8 = vector.extract_strided_slice %1 {offsets = [1, 1, 0], sizes = [1, 16, 384], strides = [1, 1, 1]} : vector<2x17x384xbf16> to vector<1x16x384xbf16>
    %9 = vector.shape_cast %8 : vector<1x16x384xbf16> to vector<16x384xbf16>
    %10 = tpu.concatenate %3, %5, %7, %9 in 1 : vector<16x384xbf16>, vector<16x384xbf16>, vector<16x384xbf16>, vector<16x384xbf16> -> vector<16x1536xbf16>
    %c0_4 = arith.constant 0 : index
    %c0_5 = arith.constant 0 : index
    %11 = vector.load %arg3[%c0_4, %c0_5] : memref<1536x320xbf16, #tpu.memory_space<vmem>>, vector<1536x320xbf16>
    %cst = arith.constant dense<0.000000e+00> : vector<16x320xf32>
    %12 = tpu.matmul %10, %11, %cst {dimension_numbers = #tpu.dot_dimension_numbers<[1], [0], [0], [1], [0, 0, 1, 1], [], []>} : vector<16x1536xbf16>, vector<1536x320xbf16>, vector<16x320xf32> -> vector<16x320xf32>
    %c0_6 = arith.constant 0 : index
    %c0_7 = arith.constant 0 : index
    %13 = vector.load %arg4[%c0_6, %c0_7] : memref<1x320xf32, #tpu.memory_space<vmem>>, vector<1x320xf32>
    %14 = vector.broadcast %13 : vector<1x320xf32> to vector<16x320xf32>
    %15 = arith.addf %12, %14 : vector<16x320xf32>
    %cst_8 = arith.constant 0.000000e+00 : f32
    %cst_9 = arith.constant 6.000000e+00 : f32
    %16 = vector.broadcast %cst_8 : f32 to vector<16x320xf32>
    %17 = arith.maximumf %16, %15 : vector<16x320xf32>
    %18 = vector.broadcast %cst_9 : f32 to vector<16x320xf32>
    %19 = arith.minimumf %18, %17 : vector<16x320xf32>
    %20 = vector.shape_cast %19 : vector<16x320xf32> to vector<1x16x320xf32>
    %21 = vector.extract_strided_slice %20 {offsets = [0, 0, 0], sizes = [1, 1, 320], strides = [1, 1, 1]} : vector<1x16x320xf32> to vector<1x1x320xf32>
    %22 = arith.truncf %21 : vector<1x1x320xf32> to vector<1x1x320xbf16>
    %c0_10 = arith.constant 0 : index
    %c0_11 = arith.constant 0 : index
    %c0_12 = arith.constant 0 : index
    %c0_13 = arith.constant 0 : index
    %23 = vector.load %arg5[%c0_10, %c0_11, %c0_12, %c0_13] : memref<1x1x1x320xbf16, #tpu.memory_space<vmem>>, vector<1x1x1x320xbf16>
    %24 = vector.shape_cast %23 : vector<1x1x1x320xbf16> to vector<1x1x320xbf16>
    %25 = vector.shape_cast %22 : vector<1x1x320xbf16> to vector<1x1x1x320xbf16>
    tpu.vector_store %arg5[%c0_10, %c0_11, %c0_12, %c0_13], %25 {strides = array<i32>} : memref<1x1x1x320xbf16, #tpu.memory_space<vmem>>, vector<1x1x1x320xbf16>,
    return
  }
  func.func @transform_0(%arg0: i32, %arg1: i32) -> (i32, i32, i32, i32, i32) {
    %c0_i32 = arith.constant 0 : i32
    %c0_i32_0 = arith.constant 0 : i32
    %c0_i32_1 = arith.constant 0 : i32
    %c0_i32_2 = arith.constant 0 : i32
    return %arg0, %arg1, %c0_i32, %c0_i32_0, %c0_i32_1 : i32, i32, i32, i32, i32
  }
  func.func @transform_1(%arg0: i32, %arg1: i32) -> (i32, i32) {
    %c0_i32 = arith.constant 0 : i32
    %c0_i32_0 = arith.constant 0 : i32
    %c0_i32_1 = arith.constant 0 : i32
    return %c0_i32, %c0_i32_0 : i32, i32
  }
  func.func @transform_2(%arg0: i32, %arg1: i32) -> (i32, i32) {
    %c0_i32 = arith.constant 0 : i32
    %c0_i32_0 = arith.constant 0 : i32
    %c0_i32_1 = arith.constant 0 : i32
    return %c0_i32, %c0_i32_0 : i32, i32
  }
  func.func @transform_3(%arg0: i32, %arg1: i32) -> (i32, i32, i32, i32) {
    %c0_i32 = arith.constant 0 : i32
    %c0_i32_0 = arith.constant 0 : i32
    %c0_i32_1 = arith.constant 0 : i32
    return %arg0, %arg1, %c0_i32, %c0_i32_0 : i32, i32, i32, i32
  }
}

</mosaic_0001>

<bundles_post_ra>
// kernel: net_forward.5
= control target key start
LH: loop header
LB: loop body
LE: loop exit
PB: predicated region body
PF: predicated region fallthrough
CT: control target
= control target key end

     0   :  { %s2580_s12 = smov 0   ;;  %s2582_s13 = smov 0   ;;  %s3157_s0 = inlined_call_operand.vmem [shape: bf16[2,1,17,17,16], index: 0, kind: input, shape index: {}]   ;;  %s3158_s1 = inlined_call_operand.vmem [shape: bf16[64,16], index: 1, kind: input, shape index: {}]   ;;  %s3159_s2 = inlined_call_operand.vmem [shape: f32[1,16], index: 2, kind: input, shape index: {}]   ;;  %s3160_s3 = inlined_call_operand.vmem [shape: bf16[2,16,16,16], index: 3, kind: output, shape index: {}]  }
   0x1   :  { %s2584_s14 = smov 0  }
   0x2 LB: > { %s25_s15 = sadd.s32 1, %s2554_s13  ;;  %p2016_p0 = scmp.ge.s32.totalorder %s2558_s14, 1  ;;  %s2558_s14 = sphi %s2584_s14, %s13_s14   ;;  %s2554_s13 = sphi %s2582_s13, %s3164_s13   ;;  %s2550_s12 = sphi %s2580_s12, %s3163_s12  }
   0x3   : > { %p27_p1 = scmp.ge.s32.totalorder %s25_s15, 2  ;;  %p157_p2 = scmp.lt.s32.totalorder %s2558_s14, 3 }
   0x5   : > { %s3166_s15 = smov (%p27_p1, %s25_s15), 0  ;;  %p158_p3 = pnand %p2016_p0, %p157_p2 }
   0x6   : > { %v2515_v0 = vld [vmem:[%s3158_s1 + $0x10] sm:$0xff] (!%p158_p3)   ;;  %p190_p4 = scmp.lt.s32.totalorder (!%p158_p3), %s2550_s12, 1  ;;  %v2518_v1 = vld [vmem:[%s3158_s1 + $0x8] sm:$0xff] (!%p158_p3)   ;;  %v2609_v2 = vld [vmem:[%s3158_s1] sm:$0xff] (!%p158_p3)   ;;  %vm731_vm0 = vcmask (!%p158_p3), 130048   ;;  %vm1883_vm4 = vcmask (!%p158_p3), 125952  }
   0x7   : > { %161 = sbr.rel (%p158_p3) target bundleno = 389 (0x185), region = 32  ;;  %2326 = vmatprep.subr.bf16.mxu0 (!%p158_p3), %v2515_v0  ;;  %2258 = vmatprep.subr.bf16.mxu1 (!%p158_p3), %v2518_v1  ;;  %v2522_v3 = vld [vmem:[%s3158_s1 + $0x18] sm:$0xff] (!%p158_p3)   ;;  %vm262_vm1 = vsmask.f32 (!%p158_p3), 3328  ;;  %vm263_vm2 = vsmask.f32 (!%p158_p3), 7440 }
   0x8   : > { %2327 = vmatpush3.bf16.msra.mxu0 (!%p158_p3), %v2515_v0  ;;  %2259 = vmatpush3.bf16.msra.mxu1 (!%p158_p3), %v2518_v1  ;;  %vm2674_vm3 = vmor (!%p158_p3), %vm262_vm1, %vm263_vm2 }
   0x9   : > { %2292 = vmatprep.subr.bf16.mxu1 (!%p158_p3), %v2609_v2  ;;  %2360 = vmatprep.subr.bf16.mxu0 (!%p158_p3), %v2522_v3 }
   0xe   : > { %s3168_s12 = smov (!%p190_p4, %s2550_s12), 1 }
   0xf   : > { %s2490_s22 = smul.u32 204, %s3168_s12  ;;  %s2157_s30 = sshll.u32 %s3168_s12, 7 }
  0x10   : > { %s3044_s6 = scalar_lea.vmem %s3160_s3, %s2157_s30 }
  0x11   : > { %s2619_s27 = scalar_lea.vmem %s3157_s0, %s2490_s22 }
  0x12   : > { %v214_v4 = vld [vmem:[%s2619_s27 + $0xc] sm:$0xf]  ;;  %v215_v5 = vld [vmem:[%s2619_s27 + $0x10] sm:$0xf]  ;;  %v217_v6 = vld [vmem:[%s2619_s27 + $0x18] sm:$0xf] }
  0x13   : > { %v290_v7 = vshrl.u32 %v214_v4, 16  ;;  %v293_v8 = vshll.u32 %v214_v4, 16  ;;  %v299_v9 = vshll.u32 %v215_v5, 16  ;;  %v303_v10 = vshrl.u32 %v215_v5, 16  ;;  %v218_v11 = vld [vmem:[%s2619_s27 + $0x1c] sm:$0xf] }
  0x14   : > { %v2625_v12 = vcombine.low %v214_v4, %v215_v5  ;;  %v314_v13 = vshrl.u32 %v217_v6, 16  ;;  %v317_v14 = vshll.u32 %v217_v6, 16  ;;  %v323_v15 = vshll.u32 %v218_v11, 16  ;;  %v220_v21 = vld [vmem:[%s2619_s27 + $0x24] sm:$0xf] }
  0x15   : > { %v292_v16 = vrot.slane %v290_v7, 4  ;;  %v295_v17 = vrot.slane %v293_v8, 5  ;;  %v2627_v18 = vrot.slane %v299_v9, 5  ;;  %v305_v19 = vrot.slane %v303_v10, 4  ;;  %v221_v22 = vld [vmem:[%s2619_s27 + $0x28] sm:$0xf] }
  0x16   : > { %2328 = vmatprep.mubr.msk.bf16.mxu0 %vm731_vm0, %v2625_v12  ;;  %v327_v20 = vshrl.u32 %v218_v11, 16  ;;  %v2633_v23 = vrot.slane %v314_v13, 4  ;;  %v2635_v24 = vcombine.low %v217_v6, %v218_v11  ;;  %v2638_v25 = vld [vmem:[%s2619_s27] sm:$0xf]  ;;  %v2640_v27 = vrot.slane %v317_v14, 5 }
  0x17   : > { %v296_v26 = vor.u32 %v295_v17, %v292_v16  ;;  %v2642_v28 = vrot.slane %v323_v15, 5  ;;  %v2645_v29 = vld [vmem:[%s2619_s27 + $0x4] sm:$0xf]  ;;  %v213_v30 = vld [vmem:[%s2619_s27 + $0x8] sm:$0x1]  ;;  %v306_v31 = vor.u32 %v305_v19, %v2627_v18  ;;  %v338_v33 = vshrl.u32 %v220_v21, 16 }
  0x18   : > { %v2649_v32 = vrot.slane %v327_v20, 4  ;;  %2329 = vmatmul.mubr.msk.bf16.vlgmr.msra.gmra.mrb[0].mxu0 %vm731_vm0, %v2635_v24  ;;  %v2653_v34 = vcombine.low %v220_v21, %v221_v22  ;;  %v341_v35 = vshll.u32 %v220_v21, 16  ;;  %v347_v36 = vshll.u32 %v221_v22, 16  ;;  %v223_v45 = vld [vmem:[%s2619_s27 + $0x30] sm:$0xf] }
  0x19   : > { %v351_v37 = vshrl.u32 %v221_v22, 16  ;;  %v266_v38 = vshrl.u32 %v2638_v25, 16  ;;  %2361 = vmatpush3.bf16.msra.mxu0 %v2522_v3  ;;  %v269_v39 = vshll.u32 %v2638_v25, 16  ;;  %v275_v40 = vshll.u32 %v2645_v29, 16  ;;  %v224_v46 = vld [vmem:[%s2619_s27 + $0x34] sm:$0xf] }
  0x1a   : > { %2332 = vmatprep.mubr.msk.bf16.mxu0 %vm731_vm0, %v2653_v34  ;;  %v279_v41 = vshrl.u32 %v2645_v29, 16  ;;  %v285_v42 = vshll.u32 %v213_v30, 16  ;;  %v297_v43 = vrot.slane %v296_v26, 4  ;;  %v307_v47 = vrot.slane %v306_v31, 4  ;;  %v216_v51 = vld [vmem:[%s2619_s27 + $0x14] sm:$0x1] }
  0x1b   : > { %v268_v44 = vrot.slane %v266_v38, 4  ;;  %v271_v48 = vrot.slane %v269_v39, 5  ;;  %v277_v49 = vrot.slane %v275_v40, 5  ;;  %v2664_v52 = vrot.slane %v338_v33, 4  ;;  %v226_v61 = vld [vmem:[%s2619_s27 + $0x3c] sm:$0xf] }
  0x1c   : > { %v281_v50 = vrot.slane %v279_v41, 4  ;;  %v2666_v53 = vrot.slane %v341_v35, 5  ;;  %v2668_v54 = vrot.slane %v347_v36, 5  ;;  %v2670_v55 = vrot.slane %v351_v37, 4  ;;  %v227_v62 = vld [vmem:[%s2619_s27 + $0x40] sm:$0xf] }
  0x1d   : > { %v272_v57 = vor.u32 %v271_v48, %v268_v44  ;;  %v287_v59 = vrot.slane %v285_v42, 5  ;;  %v2678_v60 = vcombine.low %v223_v45, %v224_v46  ;;  %v362_v63 = vshrl.u32 %v223_v45, 16  ;;  %v219_v13 = vld [vmem:[%s2619_s27 + $0x20] sm:$0x1]  ;;  %v229_v22 = vld [vmem:[%s2619_s27 + $0x48] sm:$0xf] }
  0x1e   : > { %v282_v58 = vor.u32 %v281_v50, %v277_v49  ;;  %v365_v0 = vshll.u32 %v223_v45, 16  ;;  %v371_v1 = vshll.u32 %v224_v46, 16  ;;  %v309_v3 = vshll.u32 %v216_v51, 16  ;;  %v230_v26 = vld [vmem:[%s2619_s27 + $0x4c] sm:$0xf] }
  0x1f   : > { %v273_v4 = vrot.slane %v272_v57, 4  ;;  %v375_v6 = vshrl.u32 %v224_v46, 16  ;;  %v302_v7 = vsel %vm2674_vm3, %v297_v43, %v2627_v18  ;;  %v386_v9 = vshrl.u32 %v226_v61, 16  ;;  %v222_v40 = vld [vmem:[%s2619_s27 + $0x2c] sm:$0x1] }
  0x20   : > { %v283_v5 = vrot.slane %v282_v58, 4  ;;  %2333 = vmatmul.mubr.msk.bf16.gmra.mrb[4].mxu0 %vm731_vm0, %v2678_v60  ;;  %v311_v8 = vrot.slane %v309_v3, 5  ;;  %v389_v10 = vshll.u32 %v226_v61, 16  ;;  %v2687_v11 = vcombine.low %v226_v61, %v227_v62  ;;  %v232_v46 = vld [vmem:[%s2619_s27 + $0x54] sm:$0xf] }
  0x21   : > { %v278_v14 = vsel %vm2674_vm3, %v273_v4, %v277_v49  ;;  %v395_v16 = vshll.u32 %v227_v62, 16  ;;  %v399_v17 = vshrl.u32 %v227_v62, 16  ;;  %v320_v20 = vor.u32 %v2640_v27, %v2633_v23  ;;  %v233_v50 = vld [vmem:[%s2619_s27 + $0x58] sm:$0xf] }
  0x22   : > { %v288_v15 = vsel %vm2674_vm3, %v283_v5, %v287_v59  ;;  %v312_v18 = vsel %vm2674_vm3, %v307_v47, %v311_v8  ;;  %2336 = vmatprep.mubr.msk.bf16.mxu0 %vm731_vm0, %v2687_v11  ;;  %v330_v21 = vor.u32 %v2649_v32, %v2642_v28  ;;  %v364_v30 = vrot.slane %v362_v63, 4  ;;  %v225_v62 = vld [vmem:[%s2619_s27 + $0x38] sm:$0x1]  ;;  %v236_v8 = vld [vmem:[%s2619_s27 + $0x64] sm:$0xf] }
  0x23   : > { %v2020_v19 = vcombine.low %v278_v14, %v288_v15  ;;  %v367_v31 = vrot.slane %v365_v0, 5  ;;  %v2704_v33 = vcombine.low %v302_v7, %v312_v18  ;;  %v333_v35 = vshll.u32 %v219_v13, 16  ;;  %v235_v7 = vld [vmem:[%s2619_s27 + $0x60] sm:$0xf] }
  0x24   : > { %v2707_v36 = vrot.slane %v371_v1, 5  ;;  %v377_v37 = vrot.slane %v375_v6, 4  ;;  %v321_v38 = vrot.slane %v320_v20, 4  ;;  %v331_v39 = vrot.slane %v330_v21, 4 }
  0x25   : > { %2260 = vmatprep.mubr.msk.bf16.mxu1 %vm731_vm0, %v2020_v19  ;;  %v2712_v23 = vrot.slane %v386_v9, 4  ;;  %v2714_v27 = vrot.slane %v389_v10, 5  ;;  %v335_v32 = vrot.slane %v333_v35, 5  ;;  %v2716_v41 = vcombine.low %v229_v22, %v230_v26  ;;  %v228_v19 = vld [vmem:[%s2619_s27 + $0x44] sm:$0x1] }
  0x26   : > { %2261 = vmatmul.mubr.msk.bf16.vlgmr.msra.gmra.mrb[0].mxu1 %vm731_vm0, %v2704_v33  ;;  %v2719_v42 = vrot.slane %v395_v16, 5  ;;  %v401_v43 = vrot.slane %v399_v17, 4  ;;  %v326_v44 = vsel %vm2674_vm3, %v321_v38, %v2642_v28  ;;  %v344_v45 = vor.u32 %v2666_v53, %v2664_v52 }
  0x27   : > { %2293 = vmatpush3.bf16.msra.mxu1 %v2609_v2  ;;  %v336_v47 = vsel %vm2674_vm3, %v331_v39, %v335_v32  ;;  %v410_v48 = vshrl.u32 %v229_v22, 16  ;;  %v354_v2 = vor.u32 %v2670_v55, %v2668_v54  ;;  %v357_v49 = vshll.u32 %v222_v40, 16 }
  0x28   : > { %2337 = vmatmul.mubr.msk.bf16.gmra.mrb[8].mxu0 %vm731_vm0, %v2716_v41  ;;  %v2734_v51 = vcombine.low %v326_v44, %v336_v47  ;;  %v413_v28 = vshll.u32 %v229_v22, 16  ;;  %v419_v57 = vshll.u32 %v230_v26, 16  ;;  %v345_v52 = vrot.slane %v344_v45, 4  ;;  %v239_v44 = vld [vmem:[%s2619_s27 + $0x70] sm:$0xf] }
  0x29   : > { %v423_v53 = vshrl.u32 %v230_v26, 16  ;;  %v355_v58 = vrot.slane %v354_v2, 4  ;;  %v359_v59 = vrot.slane %v357_v49, 5  ;;  %v434_v61 = vshrl.u32 %v232_v46, 16  ;;  %v231_v49 = vld [vmem:[%s2619_s27 + $0x50] sm:$0x1] }
  0x2a   : > { %2264 = vmatprep.mubr.msk.bf16.mxu1 %vm731_vm0, %v2734_v51  ;;  %v350_v55 = vsel %vm2674_vm3, %v345_v52, %v2668_v54  ;;  %v437_v63 = vshll.u32 %v232_v46, 16  ;;  %v443_v0 = vshll.u32 %v233_v50, 16  ;;  %v2742_v1 = vcombine.low %v232_v46, %v233_v50 }
  0x2b   : > { %v360_v3 = vsel %vm2674_vm3, %v355_v58, %v359_v59  ;;  %v447_v4 = vshrl.u32 %v233_v50, 16  ;;  %v368_v5 = vor.u32 %v367_v31, %v364_v30  ;;  %v378_v6 = vor.u32 %v377_v37, %v2707_v36  ;;  %v238_v37 = vld [vmem:[%s2619_s27 + $0x6c] sm:$0xf] }
  0x2c   : > { %v412_v9 = vrot.slane %v410_v48, 4  ;;  %v415_v10 = vrot.slane %v413_v28, 5  ;;  %v2749_v13 = vcombine.low %v350_v55, %v360_v3  ;;  %2340 = vmatprep.mubr.msk.bf16.mxu0 %vm731_vm0, %v2742_v1  ;;  %v381_v54 = vshll.u32 %v225_v62, 16  ;;  %v242_v62 = vld [vmem:[%s2619_s27 + $0x7c] sm:$0xf] }
  0x2d   : > { %v2753_v14 = vrot.slane %v419_v57, 5  ;;  %v425_v15 = vrot.slane %v423_v53, 4  ;;  %v369_v16 = vrot.slane %v368_v5, 4  ;;  %v379_v17 = vrot.slane %v378_v6, 4 }
  0x2e   : > { %2265 = vmatmul.mubr.msk.bf16.gmra.mrb[4].mxu1 %vm731_vm0, %v2749_v13  ;;  %v2758_v18 = vrot.slane %v434_v61, 4  ;;  %v2760_v20 = vrot.slane %v437_v63, 5  ;;  %v383_v21 = vrot.slane %v381_v54, 5  ;;  %v2762_v22 = vcombine.low %v235_v7, %v236_v8  ;;  %v241_v61 = vld [vmem:[%s2619_s27 + $0x78] sm:$0xf] }
  0x2f   : > { %v2764_v26 = vrot.slane %v443_v0, 5  ;;  %v449_v30 = vrot.slane %v447_v4, 4  ;;  %v374_v31 = vsel %vm2674_vm3, %v369_v16, %v2707_v36  ;;  %v392_v35 = vor.u32 %v2714_v27, %v2712_v23 }
  0x30   : > { %v384_v38 = vsel %vm2674_vm3, %v379_v17, %v383_v21  ;;  %v458_v39 = vshrl.u32 %v235_v7, 16  ;;  %2341 = vmatmul.mubr.msk.bf16.gmra.mrb[12].mxu0 %vm731_vm0, %v2762_v22  ;;  %v402_v40 = vor.u32 %v401_v43, %v2719_v42  ;;  %v405_v32 = vshll.u32 %v228_v19, 16  ;;  %v244_v21 = vld [vmem:[%s2619_s27 + $0x84] sm:$0xf] }
  0x31   : > { %v2778_v45 = vcombine.low %v374_v31, %v384_v38  ;;  %v461_v46 = vshll.u32 %v235_v7, 16  ;;  %v467_v36 = vshll.u32 %v236_v8, 16  ;;  %v393_v47 = vrot.slane %v392_v35, 4  ;;  %v234_v7 = vld [vmem:[%s2619_s27 + $0x5c] sm:$0x1] }
  0x32   : > { %v471_v23 = vshrl.u32 %v236_v8, 16  ;;  %v403_v27 = vrot.slane %v402_v40, 4  ;;  %v407_v48 = vrot.slane %v405_v32, 5  ;;  %v482_v2 = vshrl.u32 %v238_v37, 16 }
  0x33   : > { %2268 = vmatprep.mubr.msk.bf16.mxu1 %vm731_vm0, %v2778_v45  ;;  %v398_v43 = vsel %vm2674_vm3, %v393_v47, %v2719_v42  ;;  %v485_v50 = vshll.u32 %v238_v37, 16  ;;  %v491_v28 = vshll.u32 %v239_v44, 16  ;;  %v2786_v57 = vcombine.low %v238_v37, %v239_v44  ;;  %v237_v47 = vld [vmem:[%s2619_s27 + $0x68] sm:$0x1] }
  0x34   : > { %v408_v52 = vsel %vm2674_vm3, %v403_v27, %v407_v48  ;;  %v495_v53 = vshrl.u32 %v239_v44, 16  ;;  %v416_v58 = vor.u32 %v415_v10, %v412_v9  ;;  %v426_v59 = vor.u32 %v425_v15, %v2753_v14 }
  0x35   : > { %v460_v55 = vrot.slane %v458_v39, 4  ;;  %v463_v63 = vrot.slane %v461_v46, 5  ;;  %v2793_v0 = vcombine.low %v398_v43, %v408_v52  ;;  %2344 = vmatprep.mubr.msk.bf16.mxu0 %vm731_vm0, %v2786_v57  ;;  %v429_v42 = vshll.u32 %v231_v49, 16  ;;  %v245_v39 = vld [vmem:[%s2619_s27 + $0x88] sm:$0xf] }
  0x36   : > { %v2797_v3 = vrot.slane %v467_v36, 5  ;;  %v473_v4 = vrot.slane %v471_v23, 4  ;;  %v417_v5 = vrot.slane %v416_v58, 4  ;;  %v427_v6 = vrot.slane %v426_v59, 4  ;;  %v248_v52 = vld [vmem:[%s2619_s27 + $0x94] sm:$0xf] }
  0x37   : > { %2269 = vmatmul.mubr.msk.bf16.gmra.mrb[8].mxu1 %vm731_vm0, %v2793_v0  ;;  %v2802_v8 = vrot.slane %v482_v2, 4  ;;  %v2804_v9 = vrot.slane %v485_v50, 5  ;;  %v431_v10 = vrot.slane %v429_v42, 5  ;;  %v2806_v54 = vcombine.low %v241_v61, %v242_v62 }
  0x38   : > { %v2808_v15 = vrot.slane %v491_v28, 5  ;;  %v497_v16 = vrot.slane %v495_v53, 4  ;;  %v422_v17 = vsel %vm2674_vm3, %v417_v5, %v2753_v14  ;;  %v440_v19 = vor.u32 %v2760_v20, %v2758_v18  ;;  %v247_v28 = vld [vmem:[%s2619_s27 + $0x90] sm:$0xf] }
  0x39   : > { %v432_v31 = vsel %vm2674_vm3, %v427_v6, %v431_v10  ;;  %v506_v35 = vshrl.u32 %v241_v61, 16  ;;  %2345 = vmatmul.mubr.msk.bf16.gmra.mrb[16].mxu0 %vm731_vm0, %v2806_v54  ;;  %v450_v37 = vor.u32 %v449_v30, %v2764_v26  ;;  %v453_v38 = vshll.u32 %v234_v7, 16  ;;  %v240_v6 = vld [vmem:[%s2619_s27 + $0x74] sm:$0x1] }
  0x3a   : > { %v2822_v40 = vcombine.low %v422_v17, %v432_v31  ;;  %v509_v32 = vshll.u32 %v241_v61, 16  ;;  %v515_v14 = vshll.u32 %v242_v62, 16  ;;  %v441_v44 = vrot.slane %v440_v19, 4  ;;  %v250_v31 = vld [vmem:[%s2619_s27 + $0x9c] sm:$0xf] }
  0x3b   : > { %v519_v18 = vshrl.u32 %v242_v62, 16  ;;  %v451_v20 = vrot.slane %v450_v37, 4  ;;  %v455_v46 = vrot.slane %v453_v38, 5  ;;  %v530_v36 = vshrl.u32 %v244_v21, 16 }
  0x3c   : > { %2272 = vmatprep.mubr.msk.bf16.mxu1 %vm731_vm0, %v2822_v40  ;;  %v446_v30 = vsel %vm2674_vm3, %v441_v44, %v2764_v26  ;;  %v533_v23 = vshll.u32 %v244_v21, 16  ;;  %v539_v27 = vshll.u32 %v245_v39, 16  ;;  %v2830_v48 = vcombine.low %v244_v21, %v245_v39 }
  0x3d   : > { %v456_v2 = vsel %vm2674_vm3, %v451_v20, %v455_v46  ;;  %v543_v49 = vshrl.u32 %v245_v39, 16  ;;  %v464_v43 = vor.u32 %v463_v63, %v460_v55  ;;  %v474_v50 = vor.u32 %v473_v4, %v2797_v3 }
  0x3e   : > { %v508_v53 = vrot.slane %v506_v35, 4  ;;  %v511_v58 = vrot.slane %v509_v32, 5  ;;  %v2837_v59 = vcombine.low %v446_v30, %v456_v2  ;;  %2348 = vmatprep.mubr.msk.bf16.mxu0 %vm731_vm0, %v2830_v48  ;;  %v477_v26 = vshll.u32 %v237_v47, 16  ;;  %v251_v32 = vld [vmem:[%s2619_s27 + $0xa0] sm:$0xf] }
  0x3f   : > { %v2841_v61 = vrot.slane %v515_v14, 5  ;;  %v521_v62 = vrot.slane %v519_v18, 4  ;;  %v465_v42 = vrot.slane %v464_v43, 4  ;;  %v475_v5 = vrot.slane %v474_v50, 4  ;;  %v253_v50 = vld [vmem:[%s2619_s27 + $0xa8] sm:$0xf] }
  0x40   : > { %2273 = vmatmul.mubr.msk.bf16.gmra.mrb[12].mxu1 %vm731_vm0, %v2837_v59  ;;  %v2846_v55 = vrot.slane %v530_v36, 4  ;;  %v2848_v63 = vrot.slane %v533_v23, 5  ;;  %v479_v4 = vrot.slane %v477_v26, 5  ;;  %v2850_v7 = vcombine.low %v247_v28, %v248_v52  ;;  %v243_v36 = vld [vmem:[%s2619_s27 + $0x80] sm:$0x1] }
  0x41   : > { %v2852_v10 = vrot.slane %v539_v27, 5  ;;  %v545_v17 = vrot.slane %v543_v49, 4  ;;  %v470_v19 = vsel %vm2674_vm3, %v465_v42, %v2797_v3  ;;  %v488_v21 = vor.u32 %v2804_v9, %v2802_v8 }
  0x42   : > { %v480_v35 = vsel %vm2674_vm3, %v475_v5, %v479_v4  ;;  %v554_v37 = vshrl.u32 %v247_v28, 16  ;;  %2349 = vmatmul.mubr.msk.bf16.gmra.mrb[20].mxu0 %vm731_vm0, %v2850_v7  ;;  %v498_v38 = vor.u32 %v497_v16, %v2808_v15  ;;  %v501_v39 = vshll.u32 %v240_v6, 16 }
  0x43   : > { %v2866_v14 = vcombine.low %v470_v19, %v480_v35  ;;  %v557_v44 = vshll.u32 %v247_v28, 16  ;;  %v563_v3 = vshll.u32 %v248_v52, 16  ;;  %v489_v18 = vrot.slane %v488_v21, 4  ;;  %v254_v28 = vld [vmem:[%s2619_s27 + $0xac] sm:$0xf] }
  0x44   : > { %v567_v8 = vshrl.u32 %v248_v52, 16  ;;  %v499_v9 = vrot.slane %v498_v38, 4  ;;  %v503_v20 = vrot.slane %v501_v39, 5  ;;  %v578_v46 = vshrl.u32 %v250_v31, 16  ;;  %v246_v21 = vld [vmem:[%s2619_s27 + $0x8c] sm:$0x1] }
  0x45   : > { %2276 = vmatprep.mubr.msk.bf16.mxu1 %vm731_vm0, %v2866_v14  ;;  %v494_v16 = vsel %vm2674_vm3, %v489_v18, %v2808_v15  ;;  %v581_v47 = vshll.u32 %v250_v31, 16  ;;  %v587_v30 = vshll.u32 %v251_v32, 16  ;;  %v2874_v23 = vcombine.low %v250_v31, %v251_v32 }
  0x46   : > { %v504_v27 = vsel %vm2674_vm3, %v499_v9, %v503_v20  ;;  %v591_v2 = vshrl.u32 %v251_v32, 16  ;;  %v512_v49 = vor.u32 %v511_v58, %v508_v53  ;;  %v522_v43 = vor.u32 %v521_v62, %v2841_v61  ;;  %v256_v32 = vld [vmem:[%s2619_s27 + $0xb4] sm:$0xf]  ;;  %v257_v9 = vld [vmem:[%s2619_s27 + $0xb8] sm:$0xf] }
  0x47   : > { %v556_v52 = vrot.slane %v554_v37, 4  ;;  %v559_v26 = vrot.slane %v557_v44, 5  ;;  %v2881_v42 = vcombine.low %v494_v16, %v504_v27  ;;  %2352 = vmatprep.mubr.msk.bf16.mxu0 %vm731_vm0, %v2874_v23  ;;  %v525_v15 = vshll.u32 %v243_v36, 16 }
  0x48   : > { %v2885_v5 = vrot.slane %v563_v3, 5  ;;  %v569_v6 = vrot.slane %v567_v8, 4  ;;  %v513_v4 = vrot.slane %v512_v49, 4  ;;  %v523_v19 = vrot.slane %v522_v43, 4 }
  0x49   : > { %2277 = vmatmul.mubr.msk.bf16.gmra.mrb[16].mxu1 %vm731_vm0, %v2881_v42  ;;  %v580_v53 = vrot.slane %v578_v46, 4  ;;  %v583_v58 = vrot.slane %v581_v47, 5  ;;  %v527_v62 = vrot.slane %v525_v15, 5  ;;  %v2890_v31 = vcombine.low %v253_v50, %v254_v28 }
  0x4a   : > { %v2892_v35 = vrot.slane %v587_v30, 5  ;;  %v593_v37 = vrot.slane %v591_v2, 4  ;;  %v518_v38 = vsel %vm2674_vm3, %v513_v4, %v2841_v61  ;;  %v536_v39 = vor.u32 %v2848_v63, %v2846_v55  ;;  %v249_v30 = vld [vmem:[%s2619_s27 + $0x98] sm:$0x1]  ;;  %v2920_v4 = vld [vmem:[%s2619_s27 + $0xc0] sm:$0xf] }
  0x4b   : > { %v528_v44 = vsel %vm2674_vm3, %v523_v19, %v527_v62  ;;  %v602_v3 = vshrl.u32 %v253_v50, 16  ;;  %2353 = vmatmul.mubr.msk.bf16.gmra.mrb[24].mxu0 %vm731_vm0, %v2890_v31  ;;  %v546_v18 = vor.u32 %v545_v17, %v2852_v10  ;;  %v549_v8 = vshll.u32 %v246_v21, 16  ;;  %v2923_v19 = vld [vmem:[%s2619_s27 + $0xc4] sm:$0xf] }
  0x4c   : > { %v2906_v20 = vcombine.low %v518_v38, %v528_v44  ;;  %v605_v46 = vshll.u32 %v253_v50, 16  ;;  %v611_v61 = vshll.u32 %v254_v28, 16  ;;  %v537_v36 = vrot.slane %v536_v39, 4 }
  0x4d   : > { %v615_v55 = vshrl.u32 %v254_v28, 16  ;;  %v547_v63 = vrot.slane %v546_v18, 4  ;;  %v551_v16 = vrot.slane %v549_v8, 5  ;;  %v626_v47 = vshrl.u32 %v256_v32, 16 }
  0x4e   : > { %2280 = vmatprep.mubr.msk.bf16.mxu1 %vm731_vm0, %v2906_v20  ;;  %v542_v17 = vsel %vm2674_vm3, %v537_v36, %v2852_v10  ;;  %v629_v27 = vshll.u32 %v256_v32, 16  ;;  %v635_v2 = vshll.u32 %v257_v9, 16  ;;  %v2914_v49 = vcombine.low %v256_v32, %v257_v9 }
  0x4f   : > { %v552_v43 = vsel %vm2674_vm3, %v547_v63, %v551_v16  ;;  %v639_v50 = vshrl.u32 %v257_v9, 16  ;;  %v560_v28 = vor.u32 %v559_v26, %v556_v52  ;;  %v570_v15 = vor.u32 %v569_v6, %v2885_v5  ;;  %v252_v52 = vld [vmem:[%s2619_s27 + $0xa4] sm:$0x1]  ;;  %v255_v9 = vld [vmem:[%s2619_s27 + $0xb0] sm:$0x1] }
  0x50   : > { %v604_v21 = vrot.slane %v602_v3, 4  ;;  %v607_v62 = vrot.slane %v605_v46, 5  ;;  %v2925_v10 = vcombine.low %v542_v17, %v552_v43  ;;  %2356 = vmatprep.mubr.msk.bf16.mxu0 %vm731_vm0, %v2914_v49  ;;  %v573_v38 = vshll.u32 %v249_v30, 16 }
  0x51   : > { %v613_v39 = vrot.slane %v611_v61, 5  ;;  %v617_v32 = vrot.slane %v615_v55, 4  ;;  %v561_v44 = vrot.slane %v560_v28, 4  ;;  %v571_v18 = vrot.slane %v570_v15, 4 }
  0x52   : > { %2281 = vmatmul.mubr.msk.bf16.gmra.mrb[20].mxu1 %vm731_vm0, %v2925_v10  ;;  %v628_v26 = vrot.slane %v626_v47, 4  ;;  %v631_v6 = vrot.slane %v629_v27, 5  ;;  %v575_v8 = vrot.slane %v573_v38, 5  ;;  %v2086_v3 = vcombine.low %v2920_v4, %v2923_v19 }
  0x53   : > { %v637_v46 = vrot.slane %v635_v2, 5  ;;  %v641_v36 = vrot.slane %v639_v50, 4  ;;  %v566_v61 = vsel %vm2674_vm3, %v561_v44, %v2885_v5  ;;  %v584_v55 = vor.u32 %v583_v58, %v580_v53  ;;  %v258_v50 = vld [vmem:[%s2619_s27 + $0xbc] sm:$0x1] }
  0x54   : > { %v576_v63 = vsel %vm2674_vm3, %v571_v18, %v575_v8  ;;  %2357 = vmatmul.mubr.msk.bf16.gmra.mrb[28].mxu0 %vm731_vm0, %v2086_v3  ;;  %v594_v16 = vor.u32 %v593_v37, %v2892_v35  ;;  %v597_v47 = vshll.u32 %v252_v52, 16  ;;  %v608_v30 = vor.u32 %v607_v62, %v604_v21 }
  0x55   : > { %v2032_v17 = vcombine.low %v566_v61, %v576_v63  ;;  %v585_v27 = vrot.slane %v584_v55, 4  ;;  %2362 = vmatprep.mubr.msk.bf16.mxu0 %vm731_vm0, %v2704_v33  ;;  %v618_v2 = vor.u32 %v617_v32, %v613_v39  ;;  %v621_v43 = vshll.u32 %v255_v9, 16 }
  0x56   : > { %v595_v28 = vrot.slane %v594_v16, 4  ;;  %v599_v5 = vrot.slane %v597_v47, 5  ;;  %v609_v53 = vrot.slane %v608_v30, 4  ;;  %v632_v58 = vor.u32 %v631_v6, %v628_v26 }
  0x57   : > { %2284 = vmatprep.mubr.msk.bf16.mxu1 %vm731_vm0, %v2032_v17  ;;  %v590_v37 = vsel %vm2674_vm3, %v585_v27, %v2892_v35  ;;  %v619_v15 = vrot.slane %v618_v2, 4  ;;  %v623_v21 = vrot.slane %v621_v43, 5  ;;  %v642_v62 = vor.u32 %v641_v36, %v637_v46 }
  0x58   : > { %v600_v38 = vsel %vm2674_vm3, %v595_v28, %v599_v5  ;;  %v614_v33 = vsel %vm2674_vm3, %v609_v53, %v613_v39  ;;  %v633_v32 = vrot.slane %v632_v58, 4  ;;  %v645_v44 = vshll.u32 %v258_v50, 16 }
  0x59   : > { %v2033_v18 = vcombine.low %v590_v37, %v600_v38  ;;  %v624_v52 = vsel %vm2674_vm3, %v619_v15, %v623_v21  ;;  %v643_v26 = vrot.slane %v642_v62, 4  ;;  %v2053_v9 = vcombine.low %v2638_v25, %v2645_v29 }
  0x5a   : > { %v2034_v6 = vcombine.low %v614_v33, %v624_v52  ;;  %v647_v8 = vrot.slane %v645_v44, 5  ;;  %v638_v35 = vsel %vm2674_vm3, %v633_v32, %v637_v46  ;;  %v659_v25 = vshll.u32 %v2923_v19, 16 }
  0x5b   : > { %2285 = vmatmul.mubr.msk.bf16.gmra.mrb[24].mxu1 %vm731_vm0, %v2033_v18  ;;  %v663_v29 = vshrl.u32 %v2923_v19, 16 }
  0x5c   : > { %2288 = vmatprep.mubr.msk.bf16.mxu1 %vm731_vm0, %v2034_v6  ;;  %2363 = vmatmul.mubr.msk.bf16.vlgmr.msra.gmra.mrb[0].mxu0 %vm731_vm0, %v2734_v51  ;;  %v648_v39 = vsel %vm2674_vm3, %v643_v26, %v647_v8 }
  0x5d   : > { %2366 = vmatprep.mubr.msk.bf16.mxu0 %vm731_vm0, %v2749_v13  ;;  %v2035_v3 = vcombine.low %v638_v35, %v648_v39  ;;  %v665_v51 = vrot.slane %v663_v29, 4  ;;  %v261_v13 = vld [vmem:[%s2619_s27 + $0xc8] sm:$0x1] }
  0x63   : > { %2289 = vmatmul.mubr.msk.bf16.gmra.mrb[28].mxu1 %vm731_vm0, %v2035_v3 }
  0x64   : > { %2294 = vmatprep.mubr.msk.bf16.mxu1 %vm731_vm0, %v2053_v9  ;;  %2367 = vmatmul.mubr.msk.bf16.gmra.mrb[4].mxu0 %vm731_vm0, %v2778_v45 }
  0x65   : > { %2370 = vmatprep.mubr.msk.bf16.mxu0 %vm731_vm0, %v2793_v0  ;;  %v669_v0 = vshll.u32 %v261_v13, 16 }
  0x6b   : > { %2295 = vmatmul.mubr.msk.bf16.vlgmr.msra.gmra.mrb[0].mxu1 %vm731_vm0, %v2625_v12  ;;  %v650_v12 = vshrl.u32 %v2920_v4, 16 }
  0x6c   : > { %2298 = vmatprep.mubr.msk.bf16.mxu1 %vm731_vm0, %v2635_v24  ;;  %2371 = vmatmul.mubr.msk.bf16.gmra.mrb[8].mxu0 %vm731_vm0, %v2822_v40  ;;  %v653_v24 = vshll.u32 %v2920_v4, 16 }
  0x6d   : > { %2374 = vmatprep.mubr.msk.bf16.mxu0 %vm731_vm0, %v2837_v59 }
  0x73   : > { %2299 = vmatmul.mubr.msk.bf16.gmra.mrb[4].mxu1 %vm731_vm0, %v2653_v34  ;;  %v652_v34 = vrot.slane %v650_v12, 4 }
  0x74   : > { %2302 = vmatprep.mubr.msk.bf16.mxu1 %vm731_vm0, %v2678_v60  ;;  %2375 = vmatmul.mubr.msk.bf16.gmra.mrb[12].mxu0 %vm731_vm0, %v2866_v14  ;;  %v655_v60 = vrot.slane %v653_v24, 5  ;;  %v671_v14 = vrot.slane %v669_v0, 5 }
  0x75   : > { %2378 = vmatprep.mubr.msk.bf16.mxu0 %vm731_vm0, %v2881_v42 }
  0x7b   : > { %2303 = vmatmul.mubr.msk.bf16.gmra.mrb[8].mxu1 %vm731_vm0, %v2687_v11  ;;  %v661_v11 = vrot.slane %v659_v25, 5 }
  0x7c   : > { %2306 = vmatprep.mubr.msk.bf16.mxu1 %vm731_vm0, %v2716_v41  ;;  %2379 = vmatmul.mubr.msk.bf16.gmra.mrb[16].mxu0 %vm731_vm0, %v2906_v20  ;;  %v656_v41 = vor.u32 %v655_v60, %v652_v34 }
  0x7d   : > { %2382 = vmatprep.mubr.msk.bf16.mxu0 %vm731_vm0, %v2925_v10  ;;  %v666_v45 = vor.u32 %v665_v51, %v661_v11 }
  0x7e   : > { %v657_v40 = vrot.slane %v656_v41, 4 }
  0x7f   : > { %v667_v59 = vrot.slane %v666_v45, 4 }
  0x83   : > { %2307 = vmatmul.mubr.msk.bf16.gmra.mrb[12].mxu1 %vm731_vm0, %v2742_v1  ;;  %v662_v1 = vsel %vm2674_vm3, %v657_v40, %v661_v11 }
  0x84   : > { %2310 = vmatprep.mubr.msk.bf16.mxu1 %vm731_vm0, %v2762_v22  ;;  %2383 = vmatmul.mubr.msk.bf16.gmra.mrb[20].mxu0 %vm731_vm0, %v2032_v17  ;;  %v672_v22 = vsel %vm2674_vm3, %v667_v59, %v671_v14 }
  0x85   : > { %2386 = vmatprep.mubr.msk.bf16.mxu0 %vm731_vm0, %v2033_v18  ;;  %v2104_v42 = vcombine.low %v662_v1, %v672_v22 }
  0x8b   : > { %2311 = vmatmul.mubr.msk.bf16.gmra.mrb[16].mxu1 %vm731_vm0, %v2786_v57 }
  0x8c   : > { %2314 = vmatprep.mubr.msk.bf16.mxu1 %vm731_vm0, %v2806_v54  ;;  %2387 = vmatmul.mubr.msk.bf16.gmra.mrb[24].mxu0 %vm731_vm0, %v2034_v6 }
  0x8d   : > { %2390 = vmatprep.mubr.msk.bf16.mxu0 %vm731_vm0, %v2035_v3 }
  0x93   : > { %2315 = vmatmul.mubr.msk.bf16.gmra.mrb[20].mxu1 %vm731_vm0, %v2830_v48 }
  0x94   : > { %2318 = vmatprep.mubr.msk.bf16.mxu1 %vm731_vm0, %v2850_v7  ;;  %2391 = vmatmul.mubr.msk.bf16.gmra.mrb[28].mxu0 %vm731_vm0, %v2104_v42 }
  0x9b   : > { %2319 = vmatmul.mubr.msk.bf16.gmra.mrb[24].mxu1 %vm731_vm0, %v2874_v23  ;;  %v3032_v23 = vld [vmem:[%s3159_s2] ss:$0 sm:$0xff] }
  0x9c   : > { %2322 = vmatprep.mubr.msk.bf16.mxu1 %vm731_vm0, %v2890_v31 }
  0xa3   : > { %2323 = vmatmul.mubr.msk.bf16.gmra.mrb[28].mxu1 %vm731_vm0, %v2914_v49 }
 0x12f   : > { %v2364_v56 = vpop.f32.mrb[0].mxu0 }
 0x130   : > { %v1493_v57 = vpop.f32.mrb[1].mxu0 }
 0x131   : > { %v2365_v54 = vpop.f32.mrb[2].mxu0 }
 0x132   : > { %v1496_v20 = vpop.f32.mrb[3].mxu0 }
 0x137   : > { %v2368_v4 = vpop.f32.mrb[4].mxu0 }
 0x138   : > { %v1509_v48 = vpop.f32.mrb[5].mxu0 }
 0x139   : > { %v2369_v19 = vpop.f32.mrb[6].mxu0 }
 0x13a   : > { %v1512_v10 = vpop.f32.mrb[7].mxu0 }
 0x13e   : > { %v2296_v7 = vpop.f32.mrb[0].mxu1 }
 0x13f   : > { %v2394_v46 = vadd.f32 %v2364_v56, %v2296_v7  ;;  %v1109_v31 = vpop.f32.mrb[1].mxu1  ;;  %v2372_v36 = vpop.f32.mrb[8].mxu0 }
 0x140   : > { %v2395_v61 = vadd.f32 %v1493_v57, %v1109_v31  ;;  %v2297_v49 = vpop.f32.mrb[2].mxu1  ;;  %v1525_v55 = vpop.f32.mrb[9].mxu0 }
 0x141   : > { %v1661_v63 = vadd.f32 %v2394_v46, %v3032_v23  ;;  %v2396_v16 = vadd.f32 %v2365_v54, %v2297_v49  ;;  %v1112_v47 = vpop.f32.mrb[3].mxu1  ;;  %v2373_v30 = vpop.f32.mrb[10].mxu0 }
 0x142   : > { %v1659_v17 = vadd.f32 %v2395_v61, %v3032_v23  ;;  %v2397_v27 = vadd.f32 %v1496_v20, %v1112_v47  ;;  %v3036_v2 = vpop.f32.mrb[11].mxu0 }
 0x143   : > { %v1693_v43 = vmax.f32 %v1661_v63, 0.0  ;;  %v1662_v50 = vadd.f32 %v2396_v16, %v3032_v23 }
 0x144   : > { %v1691_v28 = vmax.f32 %v1659_v17, 0.0  ;;  %v1660_v5 = vadd.f32 %v2397_v27, %v3032_v23 }
 0x145   : > { %v1725_v53 = vmin.f32 %v1693_v43, 6.0  ;;  %v1694_v58 = vmax.f32 %v1662_v50, 0.0 }
 0x146   : > { %v1723_v37 = vmin.f32 %v1691_v28, 6.0  ;;  %v1692_v15 = vmax.f32 %v1660_v5, 0.0  ;;  %v2300_v21 = vpop.f32.mrb[4].mxu1 }
 0x147   : > { %v2160_v62 = vpack.c.bf16 %v1725_v53, %v1725_v53  ;;  %v1726_v38 = vmin.f32 %v1694_v58, 6.0  ;;  %v2398_v33 = vadd.f32 %v2368_v4, %v2300_v21  ;;  %v1125_v32 = vpop.f32.mrb[5].mxu1  ;;  %v2376_v44 = vpop.f32.mrb[12].mxu0 }
 0x148   : > { %v2158_v18 = vpack.c.bf16 %v1723_v37, %v1723_v37  ;;  %v1724_v52 = vmin.f32 %v1692_v15, 6.0  ;;  %v2399_v26 = vadd.f32 %v1509_v48, %v1125_v32  ;;  %v2301_v6 = vpop.f32.mrb[6].mxu1  ;;  %v1541_v8 = vpop.f32.mrb[13].mxu0 }
 0x149   : > { %1886 = vst.msk [vmem:[%s3044_s6 + $0x8] sm:$0xf] %vm1883_vm4, %v2160_v62  ;;  %v2161_v35 = vpack.c.bf16 %v1726_v38, %v1726_v38  ;;  %v1665_v39 = vadd.f32 %v2398_v33, %v3032_v23  ;;  %v2400_v3 = vadd.f32 %v2369_v19, %v2301_v6  ;;  %v1128_v9 = vpop.f32.mrb[7].mxu1  ;;  %v2377_v12 = vpop.f32.mrb[14].mxu0 }
 0x14a   : > { %1884 = vst.msk [vmem:[%s3044_s6] sm:$0xf] %vm1883_vm4, %v2158_v18  ;;  %v2159_v24 = vpack.c.bf16 %v1724_v52, %v1724_v52  ;;  %v1663_v25 = vadd.f32 %v2399_v26, %v3032_v23  ;;  %v2401_v29 = vadd.f32 %v1512_v10, %v1128_v9  ;;  %v3052_v34 = vpop.f32.mrb[15].mxu0 }
 0x14b   : > { %1887 = vst.msk [vmem:[%s3044_s6 + $0xc] sm:$0xf] %vm1883_vm4, %v2161_v35  ;;  %v1697_v60 = vmax.f32 %v1665_v39, 0.0  ;;  %v1666_v11 = vadd.f32 %v2400_v3, %v3032_v23 }
 0x14c   : > { %1885 = vst.msk [vmem:[%s3044_s6 + $0x4] sm:$0xf] %vm1883_vm4, %v2159_v24  ;;  %v1695_v51 = vmax.f32 %v1663_v25, 0.0  ;;  %v1664_v13 = vadd.f32 %v2401_v29, %v3032_v23 }
 0x14d   : > { %v1729_v41 = vmin.f32 %v1697_v60, 6.0  ;;  %v1698_v45 = vmax.f32 %v1666_v11, 0.0 }
 0x14e   : > { %v1727_v0 = vmin.f32 %v1695_v51, 6.0  ;;  %v1696_v40 = vmax.f32 %v1664_v13, 0.0  ;;  %v2304_v59 = vpop.f32.mrb[8].mxu1 }
 0x14f   : > { %v2164_v14 = vpack.c.bf16 %v1729_v41, %v1729_v41  ;;  %v1730_v1 = vmin.f32 %v1698_v45, 6.0  ;;  %v2402_v22 = vadd.f32 %v2372_v36, %v2304_v59  ;;  %v1141_v42 = vpop.f32.mrb[9].mxu1  ;;  %v2380_v56 = vpop.f32.mrb[16].mxu0 }
 0x150   : > { %v2162_v57 = vpack.c.bf16 %v1727_v0, %v1727_v0  ;;  %v1728_v54 = vmin.f32 %v1696_v40, 6.0  ;;  %v2403_v20 = vadd.f32 %v1525_v55, %v1141_v42  ;;  %v2305_v4 = vpop.f32.mrb[10].mxu1  ;;  %v1557_v48 = vpop.f32.mrb[17].mxu0 }
 0x151   : > { %1890 = vst.msk [vmem:[%s3044_s6 + $0x18] sm:$0xf] %vm1883_vm4, %v2164_v14  ;;  %v2165_v19 = vpack.c.bf16 %v1730_v1, %v1730_v1  ;;  %v1669_v10 = vadd.f32 %v2402_v22, %v3032_v23  ;;  %v2404_v7 = vadd.f32 %v2373_v30, %v2305_v4  ;;  %v1144_v46 = vpop.f32.mrb[11].mxu1  ;;  %v2381_v31 = vpop.f32.mrb[18].mxu0 }
 0x152   : > { %1888 = vst.msk [vmem:[%s3044_s6 + $0x10] sm:$0xf] %vm1883_vm4, %v2162_v57  ;;  %v2163_v36 = vpack.c.bf16 %v1728_v54, %v1728_v54  ;;  %v1667_v61 = vadd.f32 %v2403_v20, %v3032_v23  ;;  %v2405_v49 = vadd.f32 %v3036_v2, %v1144_v46  ;;  %v3067_v63 = vpop.f32.mrb[19].mxu0 }
 0x153   : > { %1891 = vst.msk [vmem:[%s3044_s6 + $0x1c] sm:$0xf] %vm1883_vm4, %v2165_v19  ;;  %v1701_v55 = vmax.f32 %v1669_v10, 0.0  ;;  %v1670_v16 = vadd.f32 %v2404_v7, %v3032_v23 }
 0x154   : > { %1889 = vst.msk [vmem:[%s3044_s6 + $0x14] sm:$0xf] %vm1883_vm4, %v2163_v36  ;;  %v1699_v47 = vmax.f32 %v1667_v61, 0.0  ;;  %v1668_v30 = vadd.f32 %v2405_v49, %v3032_v23 }
 0x155   : > { %v1733_v17 = vmin.f32 %v1701_v55, 6.0  ;;  %v1702_v27 = vmax.f32 %v1670_v16, 0.0 }
 0x156   : > { %v1731_v43 = vmin.f32 %v1699_v47, 6.0  ;;  %v1700_v50 = vmax.f32 %v1668_v30, 0.0  ;;  %v2308_v28 = vpop.f32.mrb[12].mxu1 }
 0x157   : > { %v2168_v5 = vpack.c.bf16 %v1733_v17, %v1733_v17  ;;  %v1734_v2 = vmin.f32 %v1702_v27, 6.0  ;;  %v2406_v53 = vadd.f32 %v2376_v44, %v2308_v28  ;;  %v1157_v58 = vpop.f32.mrb[13].mxu1  ;;  %v2384_v37 = vpop.f32.mrb[20].mxu0 }
 0x158   : > { %v2166_v15 = vpack.c.bf16 %v1731_v43, %v1731_v43  ;;  %v1732_v21 = vmin.f32 %v1700_v50, 6.0  ;;  %v2407_v62 = vadd.f32 %v1541_v8, %v1157_v58  ;;  %v2309_v38 = vpop.f32.mrb[14].mxu1  ;;  %v1573_v33 = vpop.f32.mrb[21].mxu0 }
 0x159   : > { %1894 = vst.msk [vmem:[%s3044_s6 + $0x28] sm:$0xf] %vm1883_vm4, %v2168_v5  ;;  %v2169_v32 = vpack.c.bf16 %v1734_v2, %v1734_v2  ;;  %v1673_v18 = vadd.f32 %v2406_v53, %v3032_v23  ;;  %v2408_v52 = vadd.f32 %v2377_v12, %v2309_v38  ;;  %v1160_v26 = vpop.f32.mrb[15].mxu1  ;;  %v2385_v6 = vpop.f32.mrb[22].mxu0 }
 0x15a   : > { %1892 = vst.msk [vmem:[%s3044_s6 + $0x20] sm:$0xf] %vm1883_vm4, %v2166_v15  ;;  %v2167_v44 = vpack.c.bf16 %v1732_v21, %v1732_v21  ;;  %v1671_v35 = vadd.f32 %v2407_v62, %v3032_v23  ;;  %v2409_v39 = vadd.f32 %v3052_v34, %v1160_v26  ;;  %v3082_v3 = vpop.f32.mrb[23].mxu0 }
 0x15b   : > { %1895 = vst.msk [vmem:[%s3044_s6 + $0x2c] sm:$0xf] %vm1883_vm4, %v2169_v32  ;;  %v1705_v8 = vmax.f32 %v1673_v18, 0.0  ;;  %v1674_v9 = vadd.f32 %v2408_v52, %v3032_v23 }
 0x15c   : > { %1893 = vst.msk [vmem:[%s3044_s6 + $0x24] sm:$0xf] %vm1883_vm4, %v2167_v44  ;;  %v1703_v24 = vmax.f32 %v1671_v35, 0.0  ;;  %v1672_v12 = vadd.f32 %v2409_v39, %v3032_v23 }
 0x15d   : > { %v1737_v25 = vmin.f32 %v1705_v8, 6.0  ;;  %v1706_v29 = vmax.f32 %v1674_v9, 0.0 }
 0x15e   : > { %v1735_v60 = vmin.f32 %v1703_v24, 6.0  ;;  %v1704_v11 = vmax.f32 %v1672_v12, 0.0  ;;  %v2312_v51 = vpop.f32.mrb[16].mxu1 }
 0x15f   : > { %v2172_v13 = vpack.c.bf16 %v1737_v25, %v1737_v25  ;;  %v1738_v34 = vmin.f32 %v1706_v29, 6.0  ;;  %v2410_v41 = vadd.f32 %v2380_v56, %v2312_v51  ;;  %v1173_v45 = vpop.f32.mrb[17].mxu1  ;;  %v2388_v0 = vpop.f32.mrb[24].mxu0 }
 0x160   : > { %v2170_v40 = vpack.c.bf16 %v1735_v60, %v1735_v60  ;;  %v1736_v59 = vmin.f32 %v1704_v11, 6.0  ;;  %v2411_v14 = vadd.f32 %v1557_v48, %v1173_v45  ;;  %v2313_v1 = vpop.f32.mrb[18].mxu1  ;;  %v1589_v22 = vpop.f32.mrb[25].mxu0 }
 0x161   : > { %1898 = vst.msk [vmem:[%s3044_s6 + $0x38] sm:$0xf] %vm1883_vm4, %v2172_v13  ;;  %v2173_v42 = vpack.c.bf16 %v1738_v34, %v1738_v34  ;;  %v1677_v57 = vadd.f32 %v2410_v41, %v3032_v23  ;;  %v2412_v54 = vadd.f32 %v2381_v31, %v2313_v1  ;;  %v1176_v20 = vpop.f32.mrb[19].mxu1  ;;  %v2389_v4 = vpop.f32.mrb[26].mxu0 }
 0x162   : > { %1896 = vst.msk [vmem:[%s3044_s6 + $0x30] sm:$0xf] %vm1883_vm4, %v2170_v40  ;;  %v2171_v56 = vpack.c.bf16 %v1736_v59, %v1736_v59  ;;  %v1675_v19 = vadd.f32 %v2411_v14, %v3032_v23  ;;  %v2413_v10 = vadd.f32 %v3067_v63, %v1176_v20  ;;  %v1592_v7 = vpop.f32.mrb[27].mxu0 }
 0x163   : > { %1899 = vst.msk [vmem:[%s3044_s6 + $0x3c] sm:$0xf] %vm1883_vm4, %v2173_v42  ;;  %v1709_v48 = vmax.f32 %v1677_v57, 0.0  ;;  %v1678_v46 = vadd.f32 %v2412_v54, %v3032_v23 }
 0x164   : > { %1897 = vst.msk [vmem:[%s3044_s6 + $0x34] sm:$0xf] %vm1883_vm4, %v2171_v56  ;;  %v1707_v36 = vmax.f32 %v1675_v19, 0.0  ;;  %v1676_v31 = vadd.f32 %v2413_v10, %v3032_v23 }
 0x165   : > { %v1741_v61 = vmin.f32 %v1709_v48, 6.0  ;;  %v1710_v49 = vmax.f32 %v1678_v46, 0.0 }
 0x166   : > { %v1739_v55 = vmin.f32 %v1707_v36, 6.0  ;;  %v1708_v16 = vmax.f32 %v1676_v31, 0.0  ;;  %v2316_v47 = vpop.f32.mrb[20].mxu1 }
 0x167   : > { %v2176_v30 = vpack.c.bf16 %v1741_v61, %v1741_v61  ;;  %v1742_v63 = vmin.f32 %v1710_v49, 6.0  ;;  %v2414_v17 = vadd.f32 %v2384_v37, %v2316_v47  ;;  %v1189_v27 = vpop.f32.mrb[21].mxu1  ;;  %v2392_v43 = vpop.f32.mrb[28].mxu0 }
 0x168   : > { %v2174_v50 = vpack.c.bf16 %v1739_v55, %v1739_v55  ;;  %v1740_v28 = vmin.f32 %v1708_v16, 6.0  ;;  %v2415_v5 = vadd.f32 %v1573_v33, %v1189_v27  ;;  %v2317_v2 = vpop.f32.mrb[22].mxu1  ;;  %v1605_v53 = vpop.f32.mrb[29].mxu0 }
 0x169   : > { %1902 = vst.msk [vmem:[%s3044_s6 + $0x48] sm:$0xf] %vm1883_vm4, %v2176_v30  ;;  %v2177_v58 = vpack.c.bf16 %v1742_v63, %v1742_v63  ;;  %v1681_v15 = vadd.f32 %v2414_v17, %v3032_v23  ;;  %v2416_v21 = vadd.f32 %v2385_v6, %v2317_v2  ;;  %v1192_v62 = vpop.f32.mrb[23].mxu1  ;;  %v2393_v38 = vpop.f32.mrb[30].mxu0 }
 0x16a   : > { %1900 = vst.msk [vmem:[%s3044_s6 + $0x40] sm:$0xf] %vm1883_vm4, %v2174_v50  ;;  %v2175_v37 = vpack.c.bf16 %v1740_v28, %v1740_v28  ;;  %v1679_v32 = vadd.f32 %v2415_v5, %v3032_v23  ;;  %v2417_v18 = vadd.f32 %v3082_v3, %v1192_v62  ;;  %v1608_v52 = vpop.f32.mrb[31].mxu0 }
 0x16b   : > { %1903 = vst.msk [vmem:[%s3044_s6 + $0x4c] sm:$0xf] %vm1883_vm4, %v2177_v58  ;;  %v1713_v33 = vmax.f32 %v1681_v15, 0.0  ;;  %v1682_v26 = vadd.f32 %v2416_v21, %v3032_v23 }
 0x16c   : > { %1901 = vst.msk [vmem:[%s3044_s6 + $0x44] sm:$0xf] %vm1883_vm4, %v2175_v37  ;;  %v1711_v44 = vmax.f32 %v1679_v32, 0.0  ;;  %v1680_v6 = vadd.f32 %v2417_v18, %v3032_v23 }
 0x16d   : > { %v1745_v35 = vmin.f32 %v1713_v33, 6.0  ;;  %v1714_v39 = vmax.f32 %v1682_v26, 0.0 }
 0x16e   : > { %v1743_v8 = vmin.f32 %v1711_v44, 6.0  ;;  %v1712_v9 = vmax.f32 %v1680_v6, 0.0  ;;  %v2320_v24 = vpop.f32.mrb[24].mxu1 }
 0x16f   : > { %v2180_v12 = vpack.c.bf16 %v1745_v35, %v1745_v35  ;;  %v1746_v3 = vmin.f32 %v1714_v39, 6.0  ;;  %v2418_v25 = vadd.f32 %v2388_v0, %v2320_v24  ;;  %v1205_v29 = vpop.f32.mrb[25].mxu1 }
 0x170   : > { %v2178_v60 = vpack.c.bf16 %v1743_v8, %v1743_v8  ;;  %v1744_v11 = vmin.f32 %v1712_v9, 6.0  ;;  %v2419_v51 = vadd.f32 %v1589_v22, %v1205_v29  ;;  %v2321_v13 = vpop.f32.mrb[26].mxu1 }
 0x171   : > { %1906 = vst.msk [vmem:[%s3044_s6 + $0x58] sm:$0xf] %vm1883_vm4, %v2180_v12  ;;  %v2181_v34 = vpack.c.bf16 %v1746_v3, %v1746_v3  ;;  %v1685_v41 = vadd.f32 %v2418_v25, %v3032_v23  ;;  %v2420_v45 = vadd.f32 %v2389_v4, %v2321_v13  ;;  %v1208_v40 = vpop.f32.mrb[27].mxu1 }
 0x172   : > { %1904 = vst.msk [vmem:[%s3044_s6 + $0x50] sm:$0xf] %vm1883_vm4, %v2178_v60  ;;  %v2179_v59 = vpack.c.bf16 %v1744_v11, %v1744_v11  ;;  %v1683_v14 = vadd.f32 %v2419_v51, %v3032_v23  ;;  %v2421_v1 = vadd.f32 %v1592_v7, %v1208_v40 }
 0x173   : > { %1907 = vst.msk [vmem:[%s3044_s6 + $0x5c] sm:$0xf] %vm1883_vm4, %v2181_v34  ;;  %v1717_v0 = vmax.f32 %v1685_v41, 0.0  ;;  %v1686_v42 = vadd.f32 %v2420_v45, %v3032_v23 }
 0x174   : > { %1905 = vst.msk [vmem:[%s3044_s6 + $0x54] sm:$0xf] %vm1883_vm4, %v2179_v59  ;;  %v1715_v22 = vmax.f32 %v1683_v14, 0.0  ;;  %v1684_v57 = vadd.f32 %v2421_v1, %v3032_v23 }
 0x175   : > { %v1749_v54 = vmin.f32 %v1717_v0, 6.0  ;;  %v1718_v20 = vmax.f32 %v1686_v42, 0.0 }
 0x176   : > { %v1747_v4 = vmin.f32 %v1715_v22, 6.0  ;;  %v1716_v56 = vmax.f32 %v1684_v57, 0.0  ;;  %v2324_v19 = vpop.f32.mrb[28].mxu1 }
 0x177   : > { %v2184_v10 = vpack.c.bf16 %v1749_v54, %v1749_v54  ;;  %v1750_v48 = vmin.f32 %v1718_v20, 6.0  ;;  %v2422_v7 = vadd.f32 %v2392_v43, %v2324_v19  ;;  %v1221_v46 = vpop.f32.mrb[29].mxu1 }
 0x178   : > { %v2182_v36 = vpack.c.bf16 %v1747_v4, %v1747_v4  ;;  %v1748_v31 = vmin.f32 %v1716_v56, 6.0  ;;  %v2423_v61 = vadd.f32 %v1605_v53, %v1221_v46  ;;  %v2325_v49 = vpop.f32.mrb[30].mxu1 }
 0x179   : > { %1910 = vst.msk [vmem:[%s3044_s6 + $0x68] sm:$0xf] %vm1883_vm4, %v2184_v10  ;;  %v2185_v55 = vpack.c.bf16 %v1750_v48, %v1750_v48  ;;  %v1689_v16 = vadd.f32 %v2422_v7, %v3032_v23  ;;  %v2424_v47 = vadd.f32 %v2393_v38, %v2325_v49  ;;  %v1224_v30 = vpop.f32.mrb[31].mxu1 }
 0x17a   : > { %1908 = vst.msk [vmem:[%s3044_s6 + $0x60] sm:$0xf] %vm1883_vm4, %v2182_v36  ;;  %v2183_v63 = vpack.c.bf16 %v1748_v31, %v1748_v31  ;;  %v1687_v17 = vadd.f32 %v2423_v61, %v3032_v23  ;;  %v2425_v27 = vadd.f32 %v1608_v52, %v1224_v30 }
 0x17b   : > { %1911 = vst.msk [vmem:[%s3044_s6 + $0x6c] sm:$0xf] %vm1883_vm4, %v2185_v55  ;;  %v1721_v43 = vmax.f32 %v1689_v16, 0.0  ;;  %v1690_v50 = vadd.f32 %v2424_v47, %v3032_v23 }
 0x17c   : > { %1909 = vst.msk [vmem:[%s3044_s6 + $0x64] sm:$0xf] %vm1883_vm4, %v2183_v63  ;;  %v1719_v28 = vmax.f32 %v1687_v17, 0.0  ;;  %v1688_v5 = vadd.f32 %v2425_v27, %v3032_v23 }
 0x17d   : > { %v1753_v2 = vmin.f32 %v1721_v43, 6.0  ;;  %v1722_v53 = vmax.f32 %v1690_v50, 0.0 }
 0x17e   : > { %v1751_v58 = vmin.f32 %v1719_v28, 6.0  ;;  %v1720_v15 = vmax.f32 %v1688_v5, 0.0 }
 0x17f   : > { %v2188_v21 = vpack.c.bf16 %v1753_v2, %v1753_v2  ;;  %v1754_v62 = vmin.f32 %v1722_v53, 6.0 }
 0x180   : > { %v2186_v38 = vpack.c.bf16 %v1751_v58, %v1751_v58  ;;  %v1752_v37 = vmin.f32 %v1720_v15, 6.0 }
 0x181   : > { %1914 = vst.msk [vmem:[%s3044_s6 + $0x78] sm:$0xf] %vm1883_vm4, %v2188_v21  ;;  %v2189_v32 = vpack.c.bf16 %v1754_v62, %v1754_v62 }
 0x182   : > { %1912 = vst.msk [vmem:[%s3044_s6 + $0x70] sm:$0xf] %vm1883_vm4, %v2186_v38  ;;  %v2187_v18 = vpack.c.bf16 %v1752_v37, %v1752_v37 }
 0x183   : > { %1915 = vst.msk [vmem:[%s3044_s6 + $0x7c] sm:$0xf] %vm1883_vm4, %v2189_v32 }
 0x184   : > { %1913 = vst.msk [vmem:[%s3044_s6 + $0x74] sm:$0xf] %vm1883_vm4, %v2187_v18 }
 0x185 PF: > { %s13_s14 = sadd.s32 1, %s2558_s14   ;;  %s3163_s12 = smov %s2554_s13 }
 0x186   : > { %p10_p5 = scmp.ge.s32.totalorder %s13_s14, 4   ;;  %s3164_s13 = smov %s3166_s15 }
 0x188   :  { %12 = sbr.rel (!%p10_p5) target bundleno = 2 (0x2), region = 62 }

// kernel: net_forward.6
= control target key start
LH: loop header
LB: loop body
LE: loop exit
PB: predicated region body
PF: predicated region fallthrough
CT: control target
= control target key end

     0   :  { %s1536_s12 = smov 0   ;;  %s1538_s13 = smov 0   ;;  %s1807_s0 = inlined_call_operand.vmem [shape: bf16[2,1,9,17,64], index: 0, kind: input, shape index: {}]   ;;  %s1808_s1 = inlined_call_operand.vmem [shape: bf16[256,24], index: 1, kind: input, shape index: {}]   ;;  %s1809_s2 = inlined_call_operand.vmem [shape: f32[1,24], index: 2, kind: input, shape index: {}]   ;;  %s1810_s3 = inlined_call_operand.vmem [shape: bf16[2,8,8,24], index: 3, kind: output, shape index: {}]  }
   0x1   :  { %s1540_s14 = smov 0  }
   0x2 LB: > { %s25_s15 = sadd.s32 1, %s1510_s13  ;;  %p1224_p0 = scmp.ge.s32.totalorder %s1514_s14, 1  ;;  %s1514_s14 = sphi %s1540_s14, %s13_s14   ;;  %s1510_s13 = sphi %s1538_s13, %s1814_s13   ;;  %s1506_s12 = sphi %s1536_s12, %s1813_s12  }
   0x3   : > { %p27_p1 = scmp.ge.s32.totalorder %s25_s15, 2  ;;  %p157_p2 = scmp.lt.s32.totalorder %s1514_s14, 3 }
   0x5   : > { %s1816_s15 = smov (%p27_p1, %s25_s15), 0  ;;  %p158_p3 = pnand %p1224_p0, %p157_p2 }
   0x6   : > { %v1467_v0 = vld [vmem:[%s1808_s1 + $0x20] sm:$0xff] (!%p158_p3)   ;;  %p189_p4 = scmp.lt.s32.totalorder (!%p158_p3), %s1506_s12, 1  ;;  %v1469_v2 = vld [vmem:[%s1808_s1 + $0x28] sm:$0xff] (!%p158_p3)   ;;  %v1471_v4 = vld [vmem:[%s1808_s1 + $0x30] sm:$0xff] (!%p158_p3)   ;;  %vm519_vm0 = vcmask (!%p158_p3), 523264   ;;  %vm1121_vm4 = vcmask (!%p158_p3), 191488  }
   0x7   : > { %161 = sbr.rel (%p158_p3) target bundleno = 319 (0x13f), region = 32  ;;  %v1468_v1 = vld [vmem:[%s1808_s1] sm:$0xff] (!%p158_p3)   ;;  %1346 = vmatprep.subr.bf16.mxu0 (!%p158_p3), %v1467_v0  ;;  %v1470_v3 = vld [vmem:[%s1808_s1 + $0x8] sm:$0xff] (!%p158_p3)   ;;  %v1472_v5 = vld [vmem:[%s1808_s1 + $0x10] sm:$0xff] (!%p158_p3)   ;;  %vm236_vm1 = vsmask.f32 (!%p158_p3), 3328 }
   0x8   : > { %1370 = vmatprep.subr.bf16.mxu1 (!%p158_p3), %v1468_v1  ;;  %1347 = vmatpush3.bf16.msra.mxu0 (!%p158_p3), %v1467_v0  ;;  %v1473_v6 = vld [vmem:[%s1808_s1 + $0x38] sm:$0xff] (!%p158_p3)   ;;  %vm237_vm2 = vsmask.f32 (!%p158_p3), 7440  ;;  %v1593_v18 = vld [vmem:[%s1808_s1 + $0x40] sm:$0xff] (!%p158_p3)   ;;  %v1482_v52 = vld [vmem:[%s1808_s1 + $0x68] sm:$0xff] (!%p158_p3)  }
   0x9   : > { %1371 = vmatpush3.bf16.msra.mxu1 (!%p158_p3), %v1468_v1  ;;  %1348 = vmatprep.subr.bf16.mxu0 (!%p158_p3), %v1469_v2  ;;  %v1474_v7 = vld [vmem:[%s1808_s1 + $0x18] sm:$0xff] (!%p158_p3)   ;;  %v1478_v32 = vld [vmem:[%s1808_s1 + $0x60] sm:$0xff] (!%p158_p3)   ;;  %vm1603_vm3 = vmor (!%p158_p3), %vm236_vm1, %vm237_vm2 }
   0xa   : > { %1372 = vmatprep.subr.bf16.mxu1 (!%p158_p3), %v1470_v3 }
   0xc   : > { %1349 = vmatpush3.bf16.msra.mxu0 (!%p158_p3), %v1469_v2  ;;  %v1481_v2 = vld [vmem:[%s1808_s1 + $0x48] sm:$0xff] (!%p158_p3)  }
   0xd   : > { %1373 = vmatpush3.bf16.msra.mxu1 (!%p158_p3), %v1470_v3  ;;  %1350 = vmatprep.subr.bf16.mxu0 (!%p158_p3), %v1471_v4 }
   0xe   : > { %s1818_s12 = smov (!%p189_p4, %s1506_s12), 1  ;;  %1374 = vmatprep.subr.bf16.mxu1 %v1472_v5 }
   0xf   : > { %s1442_s26 = smul.u32 108, %s1818_s12  ;;  %s1297_s4 = sshll.u32 %s1818_s12, 5 }
  0x10   : > { %1351 = vmatpush3.bf16.msra.mxu0 %v1471_v4  ;;  %s1770_s7 = scalar_lea.vmem %s1810_s3, %s1297_s4 }
  0x11   : > { %s1581_s6 = scalar_lea.vmem %s1807_s0, %s1442_s26  ;;  %1375 = vmatpush3.bf16.msra.mxu1 %v1472_v5  ;;  %1352 = vmatprep.subr.bf16.mxu0 %v1473_v6 }
  0x12   : > { %v209_v8 = vld [vmem:[%s1581_s6] sm:$0xf]  ;;  %v210_v9 = vld [vmem:[%s1581_s6 + $0x4] sm:$0xf]  ;;  %v211_v10 = vld [vmem:[%s1581_s6 + $0x8] sm:$0x1]  ;;  %1376 = vmatprep.subr.bf16.mxu1 %v1474_v7 }
  0x13   : > { %v240_v11 = vshrl.u32 %v209_v8, 16  ;;  %v243_v12 = vshll.u32 %v209_v8, 16  ;;  %v249_v13 = vshll.u32 %v210_v9, 16  ;;  %v253_v14 = vshrl.u32 %v210_v9, 16  ;;  %v212_v15 = vld [vmem:[%s1581_s6 + $0xc] sm:$0xf] }
  0x14   : > { %v1248_v16 = vcombine.low %v209_v8, %v210_v9  ;;  %v259_v17 = vshll.u32 %v211_v10, 16  ;;  %v213_v23 = vld [vmem:[%s1581_s6 + $0x10] sm:$0xf]  ;;  %v264_v25 = vshrl.u32 %v212_v15, 16  ;;  %v267_v26 = vshll.u32 %v212_v15, 16  ;;  %1353 = vmatpush3.bf16.msra.mxu0 %v1473_v6 }
  0x15   : > { %v242_v19 = vrot.slane %v240_v11, 4  ;;  %v245_v20 = vrot.slane %v243_v12, 5  ;;  %v251_v21 = vrot.slane %v249_v13, 5  ;;  %v255_v22 = vrot.slane %v253_v14, 4  ;;  %v214_v31 = vld [vmem:[%s1581_s6 + $0x14] sm:$0x1]  ;;  %1377 = vmatpush3.bf16.msra.mxu1 %v1474_v7  ;;  %1394 = vmatprep.subr.bf16.mxu0 %v1593_v18 }
  0x16   : > { %v261_v24 = vrot.slane %v259_v17, 5  ;;  %v273_v27 = vshll.u32 %v213_v23, 16  ;;  %1378 = vmatprep.mubr.msk.bf16.mxu1 %vm519_vm0, %v1248_v16  ;;  %v277_v30 = vshrl.u32 %v213_v23, 16  ;;  %v266_v34 = vrot.slane %v264_v25, 4  ;;  %v215_v44 = vld [vmem:[%s1581_s6 + $0x18] sm:$0xf]  ;;  %1418 = vmatprep.subr.bf16.mxu1 %v1478_v32 }
  0x17   : > { %v246_v28 = vor.u32 %v245_v20, %v242_v19  ;;  %v256_v29 = vor.u32 %v255_v22, %v251_v21  ;;  %v269_v35 = vrot.slane %v267_v26, 5  ;;  %v283_v37 = vshll.u32 %v214_v31, 16  ;;  %v216_v45 = vld [vmem:[%s1581_s6 + $0x1c] sm:$0xf]  ;;  %v217_v50 = vld [vmem:[%s1581_s6 + $0x20] sm:$0x1] }
  0x18   : > { %v275_v36 = vrot.slane %v273_v27, 5  ;;  %v279_v40 = vrot.slane %v277_v30, 4  ;;  %v1607_v41 = vcombine.low %v212_v15, %v213_v23  ;;  %v288_v49 = vshrl.u32 %v215_v44, 16  ;;  %v218_v51 = vld [vmem:[%s1581_s6 + $0x24] sm:$0xf]  ;;  %v1486_v8 = vld [vmem:[%s1808_s1 + $0x70] sm:$0xff]  }
  0x19   : > { %v247_v38 = vrot.slane %v246_v28, 4  ;;  %v257_v39 = vrot.slane %v256_v29, 4  ;;  %v270_v42 = vor.u32 %v269_v35, %v266_v34  ;;  %v285_v43 = vrot.slane %v283_v37, 5  ;;  %v219_v57 = vld [vmem:[%s1581_s6 + $0x28] sm:$0xf]  ;;  %v1490_v29 = vld [vmem:[%s1808_s1 + $0x78] sm:$0xff]  }
  0x1a   : > { %v280_v48 = vor.u32 %v279_v40, %v275_v36  ;;  %v291_v55 = vshll.u32 %v215_v44, 16  ;;  %v297_v56 = vshll.u32 %v216_v45, 16  ;;  %1379 = vmatmul.mubr.msk.bf16.vlgmr.msra.gmra.mrb[0].mxu1 %vm519_vm0, %v1607_v41  ;;  %v290_v59 = vrot.slane %v288_v49, 4  ;;  %v220_v7 = vld [vmem:[%s1581_s6 + $0x2c] sm:$0x1] }
  0x1b   : > { %v252_v46 = vsel %vm1603_vm3, %v247_v38, %v251_v21  ;;  %v262_v47 = vsel %vm1603_vm3, %v257_v39, %v261_v24  ;;  %v271_v54 = vrot.slane %v270_v42, 4  ;;  %v301_v60 = vshrl.u32 %v216_v45, 16  ;;  %1419 = vmatpush3.bf16.msra.mxu1 %v1478_v32  ;;  %v221_v17 = vld [vmem:[%s1581_s6 + $0x30] sm:$0xf]  ;;  %v222_v23 = vld [vmem:[%s1581_s6 + $0x34] sm:$0xf] }
  0x1c   : > { %v1228_v53 = vcombine.low %v252_v46, %v262_v47  ;;  %v281_v58 = vrot.slane %v280_v48, 4  ;;  %v1624_v61 = vcombine.low %v215_v44, %v216_v45  ;;  %v293_v63 = vrot.slane %v291_v55, 5  ;;  %1420 = vmatprep.subr.bf16.mxu1 %v1482_v52  ;;  %v223_v28 = vld [vmem:[%s1581_s6 + $0x38] sm:$0x1]  ;;  %v224_v35 = vld [vmem:[%s1581_s6 + $0x3c] sm:$0xf] }
  0x1d   : > { %v276_v62 = vsel %vm1603_vm3, %v271_v54, %v275_v36  ;;  %v299_v0 = vrot.slane %v297_v56, 5  ;;  %v307_v1 = vshll.u32 %v217_v50, 16  ;;  %v303_v4 = vrot.slane %v301_v60, 4  ;;  %v225_v40 = vld [vmem:[%s1581_s6 + $0x40] sm:$0xf]  ;;  %v1489_v55 = vld [vmem:[%s1808_s1 + $0x58] sm:$0xff]  }
  0x1e   : > { %1354 = vmatprep.mubr.msk.bf16.mxu0 %vm519_vm0, %v1228_v53  ;;  %v286_v3 = vsel %vm1603_vm3, %v281_v58, %v285_v43  ;;  %1382 = vmatprep.mubr.msk.bf16.mxu1 %vm519_vm0, %v1624_v61  ;;  %v312_v5 = vshrl.u32 %v218_v51, 16  ;;  %v315_v6 = vshll.u32 %v218_v51, 16  ;;  %v294_v10 = vor.u32 %v293_v63, %v290_v59  ;;  %v226_v50 = vld [vmem:[%s1581_s6 + $0x44] sm:$0x1]  ;;  %v227_v60 = vld [vmem:[%s1581_s6 + $0x48] sm:$0xf] }
  0x1f   : > { %v1640_v9 = vcombine.low %v276_v62, %v286_v3  ;;  %v309_v11 = vrot.slane %v307_v1, 5  ;;  %v321_v12 = vshll.u32 %v219_v57, 16  ;;  %v304_v13 = vor.u32 %v303_v4, %v299_v0  ;;  %1421 = vmatpush3.bf16.msra.mxu1 %v1482_v52 }
  0x20   : > { %v314_v14 = vrot.slane %v312_v5, 4  ;;  %v317_v15 = vrot.slane %v315_v6, 5  ;;  %v325_v16 = vshrl.u32 %v219_v57, 16  ;;  %v295_v19 = vrot.slane %v294_v10, 4  ;;  %1422 = vmatprep.subr.bf16.mxu1 %v1486_v8 }
  0x21   : > { %1355 = vmatmul.mubr.msk.bf16.vlgmr.msra.gmra.mrb[0].mxu0 %vm519_vm0, %v1640_v9  ;;  %v323_v20 = vrot.slane %v321_v12, 5  ;;  %v1645_v21 = vcombine.low %v218_v51, %v219_v57  ;;  %v331_v22 = vshll.u32 %v220_v7, 16  ;;  %v305_v24 = vrot.slane %v304_v13, 4  ;;  %v229_v7 = vld [vmem:[%s1581_s6 + $0x50] sm:$0x1] }
  0x22   : > { %1395 = vmatpush3.bf16.msra.mxu0 %v1593_v18  ;;  %v327_v25 = vrot.slane %v325_v16, 4  ;;  %v318_v26 = vor.u32 %v317_v15, %v314_v14  ;;  %v336_v27 = vshrl.u32 %v221_v17, 16  ;;  %v300_v30 = vsel %vm1603_vm3, %v295_v19, %v299_v0  ;;  %v1485_v18 = vld [vmem:[%s1808_s1 + $0x50] sm:$0xff]  }
  0x23   : > { %1396 = vmatprep.subr.bf16.mxu0 %v1481_v2  ;;  %v333_v31 = vrot.slane %v331_v22, 5  ;;  %v339_v32 = vshll.u32 %v221_v17, 16  ;;  %v345_v34 = vshll.u32 %v222_v23, 16  ;;  %v310_v36 = vsel %vm1603_vm3, %v305_v24, %v309_v11  ;;  %1383 = vmatmul.mubr.msk.bf16.gmra.mrb[4].mxu1 %vm519_vm0, %v1645_v21  ;;  %v230_v13 = vld [vmem:[%s1581_s6 + $0x54] sm:$0xf] }
  0x24   : > { %v319_v37 = vrot.slane %v318_v26, 4  ;;  %v328_v38 = vor.u32 %v327_v25, %v323_v20  ;;  %v338_v39 = vrot.slane %v336_v27, 4  ;;  %v1664_v42 = vcombine.low %v300_v30, %v310_v36  ;;  %1423 = vmatpush3.bf16.msra.mxu1 %v1486_v8  ;;  %v231_v24 = vld [vmem:[%s1581_s6 + $0x58] sm:$0xf] }
  0x25   : > { %v341_v43 = vrot.slane %v339_v32, 5  ;;  %v347_v44 = vrot.slane %v345_v34, 5  ;;  %v349_v45 = vshrl.u32 %v222_v23, 16  ;;  %v1668_v48 = vcombine.low %v221_v17, %v222_v23  ;;  %1424 = vmatprep.subr.bf16.mxu1 %v1490_v29 }
  0x26   : > { %v324_v46 = vsel %vm1603_vm3, %v319_v37, %v323_v20  ;;  %v329_v47 = vrot.slane %v328_v38, 4  ;;  %1397 = vmatpush3.bf16.msra.mxu0 %v1481_v2  ;;  %v355_v49 = vshll.u32 %v223_v28, 16  ;;  %1358 = vmatprep.mubr.msk.bf16.mxu0 %vm519_vm0, %v1664_v42  ;;  %v360_v53 = vshrl.u32 %v224_v35, 16  ;;  %v228_v2 = vld [vmem:[%s1581_s6 + $0x4c] sm:$0xf] }
  0x27   : > { %v351_v51 = vrot.slane %v349_v45, 4  ;;  %v342_v52 = vor.u32 %v341_v43, %v338_v39  ;;  %v363_v54 = vshll.u32 %v224_v35, 16  ;;  %1398 = vmatprep.subr.bf16.mxu0 %v1485_v18  ;;  %1386 = vmatprep.mubr.msk.bf16.mxu1 %vm519_vm0, %v1668_v48  ;;  %v369_v58 = vshll.u32 %v225_v40, 16  ;;  %v232_v37 = vld [vmem:[%s1581_s6 + $0x5c] sm:$0x1] }
  0x28   : > { %v334_v56 = vsel %vm1603_vm3, %v329_v47, %v333_v31  ;;  %v357_v57 = vrot.slane %v355_v49, 5  ;;  %v373_v59 = vshrl.u32 %v225_v40, 16  ;;  %v362_v1 = vrot.slane %v360_v53, 4  ;;  %1425 = vmatpush3.bf16.msra.mxu1 %v1490_v29 }
  0x29   : > { %v1681_v62 = vcombine.low %v324_v46, %v334_v56  ;;  %v343_v63 = vrot.slane %v342_v52, 4  ;;  %v352_v0 = vor.u32 %v351_v51, %v347_v44  ;;  %v365_v3 = vrot.slane %v363_v54, 5 }
  0x2a   : > { %v371_v4 = vrot.slane %v369_v58, 5  ;;  %v375_v5 = vrot.slane %v373_v59, 4  ;;  %v1684_v6 = vcombine.low %v224_v35, %v225_v40  ;;  %1399 = vmatpush3.bf16.msra.mxu0 %v1485_v18  ;;  %v379_v11 = vshll.u32 %v226_v50, 16 }
  0x2b   : > { %1359 = vmatmul.mubr.msk.bf16.gmra.mrb[4].mxu0 %vm519_vm0, %v1681_v62  ;;  %v348_v8 = vsel %vm1603_vm3, %v343_v63, %v347_v44  ;;  %v353_v10 = vrot.slane %v352_v0, 4  ;;  %v384_v12 = vshrl.u32 %v227_v60, 16  ;;  %1400 = vmatprep.subr.bf16.mxu0 %v1489_v55  ;;  %v366_v14 = vor.u32 %v365_v3, %v362_v1 }
  0x2c   : > { %1387 = vmatmul.mubr.msk.bf16.gmra.mrb[8].mxu1 %vm519_vm0, %v1684_v6  ;;  %v376_v15 = vor.u32 %v375_v5, %v371_v4  ;;  %v387_v16 = vshll.u32 %v227_v60, 16  ;;  %v393_v17 = vshll.u32 %v228_v2, 16  ;;  %v381_v20 = vrot.slane %v379_v11, 5  ;;  %v234_v5 = vld [vmem:[%s1581_s6 + $0x64] sm:$0xf] }
  0x2d   : > { %v358_v19 = vsel %vm1603_vm3, %v353_v10, %v357_v57  ;;  %v386_v22 = vrot.slane %v384_v12, 4  ;;  %v397_v23 = vshrl.u32 %v228_v2, 16  ;;  %v367_v26 = vrot.slane %v366_v14, 4 }
  0x2e   : > { %v1232_v25 = vcombine.low %v348_v8, %v358_v19  ;;  %v377_v27 = vrot.slane %v376_v15, 4  ;;  %v389_v28 = vrot.slane %v387_v16, 5  ;;  %1401 = vmatpush3.bf16.msra.mxu0 %v1489_v55  ;;  %v395_v29 = vrot.slane %v393_v17, 5  ;;  %v235_v15 = vld [vmem:[%s1581_s6 + $0x68] sm:$0x1] }
  0x2f   : > { %v399_v30 = vrot.slane %v397_v23, 4  ;;  %v1697_v31 = vcombine.low %v227_v60, %v228_v2  ;;  %v403_v32 = vshll.u32 %v229_v7, 16  ;;  %v372_v34 = vsel %vm1603_vm3, %v367_v26, %v371_v4  ;;  %v233_v4 = vld [vmem:[%s1581_s6 + $0x60] sm:$0xf] }
  0x30   : > { %1362 = vmatprep.mubr.msk.bf16.mxu0 %vm519_vm0, %v1232_v25  ;;  %v382_v35 = vsel %vm1603_vm3, %v377_v27, %v381_v20  ;;  %v390_v18 = vor.u32 %v389_v28, %v386_v22  ;;  %v408_v36 = vshrl.u32 %v230_v13, 16  ;;  %v411_v43 = vshll.u32 %v230_v13, 16 }
  0x31   : > { %v1233_v38 = vcombine.low %v372_v34, %v382_v35  ;;  %1390 = vmatprep.mubr.msk.bf16.mxu1 %vm519_vm0, %v1697_v31  ;;  %v400_v39 = vor.u32 %v399_v30, %v395_v29  ;;  %v405_v40 = vrot.slane %v403_v32, 5  ;;  %v417_v46 = vshll.u32 %v231_v24, 16 }
  0x32   : > { %v391_v44 = vrot.slane %v390_v18, 4  ;;  %v410_v45 = vrot.slane %v408_v36, 4  ;;  %v421_v47 = vshrl.u32 %v231_v24, 16  ;;  %v413_v50 = vrot.slane %v411_v43, 5 }
  0x33   : > { %1363 = vmatmul.mubr.msk.bf16.gmra.mrb[8].mxu0 %vm519_vm0, %v1233_v38  ;;  %v401_v49 = vrot.slane %v400_v39, 4  ;;  %v1255_v51 = vcombine.low %v230_v13, %v231_v24  ;;  %v427_v52 = vshll.u32 %v232_v37, 16  ;;  %v419_v54 = vrot.slane %v417_v46, 5 }
  0x34   : > { %v396_v53 = vsel %vm1603_vm3, %v391_v44, %v395_v29  ;;  %v423_v55 = vrot.slane %v421_v47, 4  ;;  %v414_v57 = vor.u32 %v413_v50, %v410_v45  ;;  %v435_v7 = vshll.u32 %v233_v4, 16 }
  0x35   : > { %v406_v56 = vsel %vm1603_vm3, %v401_v49, %v405_v40  ;;  %1391 = vmatmul.mubr.msk.bf16.gmra.mrb[12].mxu1 %vm519_vm0, %v1255_v51  ;;  %v429_v60 = vrot.slane %v427_v52, 5  ;;  %v441_v8 = vshll.u32 %v234_v5, 16  ;;  %v445_v10 = vshrl.u32 %v234_v5, 16 }
  0x36   : > { %v1234_v58 = vcombine.low %v396_v53, %v406_v56  ;;  %v424_v59 = vor.u32 %v423_v55, %v419_v54  ;;  %1426 = vmatprep.mubr.msk.bf16.mxu1 %vm519_vm0, %v1640_v9  ;;  %v415_v63 = vrot.slane %v414_v57, 4  ;;  %v432_v9 = vshrl.u32 %v233_v4, 16 }
  0x37   : > { %v437_v12 = vrot.slane %v435_v7, 5  ;;  %v443_v13 = vrot.slane %v441_v8, 5  ;;  %v447_v14 = vrot.slane %v445_v10, 4 }
  0x38   : > { %1366 = vmatprep.mubr.msk.bf16.mxu0 %vm519_vm0, %v1234_v58  ;;  %v425_v0 = vrot.slane %v424_v59, 4  ;;  %v420_v1 = vsel %vm1603_vm3, %v415_v63, %v419_v54  ;;  %v434_v11 = vrot.slane %v432_v9, 4 }
  0x3a   : > { %v430_v2 = vsel %vm1603_vm3, %v425_v0, %v429_v60 }
  0x3b   : > { %v1235_v3 = vcombine.low %v420_v1, %v430_v2 }
  0x3d   : > { %1367 = vmatmul.mubr.msk.bf16.gmra.mrb[12].mxu0 %vm519_vm0, %v1235_v3  ;;  %1427 = vmatmul.mubr.msk.bf16.vlgmr.msra.gmra.mrb[16].mxu1 %vm519_vm0, %v1664_v42  ;;  %v448_v42 = vor.u32 %v447_v14, %v443_v13 }
  0x3e   : > { %1402 = vmatprep.mubr.msk.bf16.mxu0 %vm519_vm0, %v1607_v41  ;;  %1430 = vmatprep.mubr.msk.bf16.mxu1 %vm519_vm0, %v1681_v62  ;;  %v438_v41 = vor.u32 %v437_v12, %v434_v11  ;;  %v451_v62 = vshll.u32 %v235_v15, 16  ;;  %v1762_v11 = vld [vmem:[%s1809_s2] ss:$0 sm:$0xff] }
  0x3f   : > { %v449_v17 = vrot.slane %v448_v42, 4 }
  0x40   : > { %v439_v16 = vrot.slane %v438_v41, 4  ;;  %v453_v19 = vrot.slane %v451_v62, 5 }
  0x45   : > { %1403 = vmatmul.mubr.msk.bf16.vlgmr.msra.gmra.mrb[16].mxu0 %vm519_vm0, %v1624_v61  ;;  %1431 = vmatmul.mubr.msk.bf16.gmra.mrb[20].mxu1 %vm519_vm0, %v1232_v25  ;;  %v444_v61 = vsel %vm1603_vm3, %v439_v16, %v443_v13 }
  0x46   : > { %1406 = vmatprep.mubr.msk.bf16.mxu0 %vm519_vm0, %v1645_v21  ;;  %1434 = vmatprep.mubr.msk.bf16.mxu1 %vm519_vm0, %v1233_v38  ;;  %v454_v21 = vsel %vm1603_vm3, %v449_v17, %v453_v19 }
  0x47   : > { %v1281_v20 = vcombine.low %v444_v61, %v454_v21 }
  0x4d   : > { %1407 = vmatmul.mubr.msk.bf16.gmra.mrb[20].mxu0 %vm519_vm0, %v1668_v48  ;;  %1435 = vmatmul.mubr.msk.bf16.gmra.mrb[24].mxu1 %vm519_vm0, %v1234_v58  ;;  %v1268_v48 = vcombine.low %v233_v4, %v234_v5 }
  0x4e   : > { %1410 = vmatprep.mubr.msk.bf16.mxu0 %vm519_vm0, %v1684_v6  ;;  %1438 = vmatprep.mubr.msk.bf16.mxu1 %vm519_vm0, %v1235_v3 }
  0x55   : > { %1411 = vmatmul.mubr.msk.bf16.gmra.mrb[24].mxu0 %vm519_vm0, %v1697_v31  ;;  %1439 = vmatmul.mubr.msk.bf16.gmra.mrb[28].mxu1 %vm519_vm0, %v1281_v20 }
  0x56   : > { %1414 = vmatprep.mubr.msk.bf16.mxu0 %vm519_vm0, %v1255_v51 }
  0x5d   : > { %1415 = vmatmul.mubr.msk.bf16.gmra.mrb[28].mxu0 %vm519_vm0, %v1268_v48 }
  0xed   : > { %v1380_v6 = vpop.f32.mrb[0].mxu1 }
  0xee   : > { %v755_v22 = vpop.f32.mrb[1].mxu1 }
  0xef   : > { %v1381_v23 = vpop.f32.mrb[2].mxu1 }
  0xf0   : > { %v758_v24 = vpop.f32.mrb[3].mxu1 }
  0xf4   : > { %v1356_v25 = vpop.f32.mrb[0].mxu0 }
  0xf5   : > { %v763_v26 = vadd.f32 %v1380_v6, %v1356_v25  ;;  %v578_v27 = vpop.f32.mrb[1].mxu0 }
  0xf6   : > { %v756_v33 = vadd.f32 %v755_v22, %v578_v27  ;;  %v1357_v28 = vpop.f32.mrb[2].mxu0  ;;  %v1384_v30 = vpop.f32.mrb[4].mxu1 }
  0xf7   : > { %v581_v29 = vpop.f32.mrb[3].mxu0  ;;  %v769_v32 = vpop.f32.mrb[5].mxu1 }
  0xf8   : > { %v1385_v31 = vpop.f32.mrb[6].mxu1 }
  0xf9   : > { %v772_v34 = vpop.f32.mrb[7].mxu1 }
  0xfe   : > { %v1360_v35 = vpop.f32.mrb[4].mxu0 }
  0xff   : > { %v777_v18 = vadd.f32 %v1384_v30, %v1360_v35  ;;  %v592_v36 = vpop.f32.mrb[5].mxu0  ;;  %v1388_v37 = vpop.f32.mrb[8].mxu1 }
 0x100   : > { %v770_v38 = vadd.f32 %v769_v32, %v592_v36  ;;  %v1361_v39 = vpop.f32.mrb[6].mxu0  ;;  %v783_v40 = vpop.f32.mrb[9].mxu1 }
 0x101   : > { %v595_v43 = vpop.f32.mrb[7].mxu0  ;;  %v1389_v44 = vpop.f32.mrb[10].mxu1 }
 0x102   : > { %v786_v45 = vpop.f32.mrb[11].mxu1 }
 0x106   : > { %v1364_v46 = vpop.f32.mrb[8].mxu0 }
 0x107   : > { %v1751_v47 = vadd.f32 %v1388_v37, %v1364_v46  ;;  %v606_v49 = vpop.f32.mrb[9].mxu0 }
 0x108   : > { %v1753_v50 = vadd.f32 %v783_v40, %v606_v49  ;;  %v1365_v51 = vpop.f32.mrb[10].mxu0  ;;  %v1392_v52 = vpop.f32.mrb[12].mxu1 }
 0x109   : > { %v609_v53 = vpop.f32.mrb[11].mxu0  ;;  %v797_v54 = vpop.f32.mrb[13].mxu1 }
 0x10a   : > { %v1393_v55 = vpop.f32.mrb[14].mxu1 }
 0x10b   : > { %v800_v56 = vpop.f32.mrb[15].mxu1 }
 0x110   : > { %v1368_v57 = vpop.f32.mrb[12].mxu0  ;;  %v1428_v58 = vpop.f32.mrb[16].mxu1 }
 0x111   : > { %v1755_v59 = vadd.f32 %v1392_v52, %v1368_v57  ;;  %v620_v60 = vpop.f32.mrb[13].mxu0  ;;  %v1019_v63 = vpop.f32.mrb[17].mxu1 }
 0x112   : > { %v1757_v0 = vadd.f32 %v797_v54, %v620_v60  ;;  %v1369_v1 = vpop.f32.mrb[14].mxu0  ;;  %v1429_v2 = vpop.f32.mrb[18].mxu1 }
 0x113   : > { %v623_v3 = vpop.f32.mrb[15].mxu0  ;;  %v1022_v4 = vpop.f32.mrb[19].mxu1 }
 0x118   : > { %v1404_v5 = vpop.f32.mrb[16].mxu0  ;;  %v1432_v9 = vpop.f32.mrb[20].mxu1 }
 0x119   : > { %v940_v7 = vadd.f32 %v1404_v5, %v763_v26  ;;  %v884_v8 = vpop.f32.mrb[17].mxu0  ;;  %v1033_v10 = vpop.f32.mrb[21].mxu1 }
 0x11a   : > { %v939_v12 = vadd.f32 %v884_v8, %v756_v33  ;;  %v1405_v13 = vpop.f32.mrb[18].mxu0  ;;  %v1433_v14 = vpop.f32.mrb[22].mxu1 }
 0x11b   : > { %v1075_v15 = vadd.f32 %v1428_v58, %v940_v7  ;;  %v887_v41 = vpop.f32.mrb[19].mxu0  ;;  %v1036_v42 = vpop.f32.mrb[23].mxu1 }
 0x11c   : > { %v1074_v62 = vadd.f32 %v1019_v63, %v939_v12 }
 0x11d   : > { %v1090_v16 = vadd.f32 %v1762_v11, %v1075_v15 }
 0x11e   : > { %v1089_v17 = vadd.f32 %v1762_v11, %v1074_v62 }
 0x11f   : > { %v1098_v19 = vmax.f32 %v1090_v16, 0.0 }
 0x120   : > { %v1097_v61 = vmax.f32 %v1089_v17, 0.0  ;;  %v1408_v21 = vpop.f32.mrb[20].mxu0  ;;  %v1436_v20 = vpop.f32.mrb[24].mxu1 }
 0x121   : > { %v1106_v48 = vmin.f32 %v1098_v19, 6.0  ;;  %v942_v6 = vadd.f32 %v1408_v21, %v777_v18  ;;  %v898_v22 = vpop.f32.mrb[21].mxu0  ;;  %v1047_v23 = vpop.f32.mrb[25].mxu1 }
 0x122   : > { %v1105_v24 = vmin.f32 %v1097_v61, 6.0  ;;  %v941_v25 = vadd.f32 %v898_v22, %v770_v38  ;;  %v1409_v26 = vpop.f32.mrb[22].mxu0  ;;  %v1437_v27 = vpop.f32.mrb[26].mxu1 }
 0x123   : > { %v1114_v33 = vpack.c.bf16 %v1106_v48, %v1106_v48  ;;  %v1077_v28 = vadd.f32 %v1432_v9, %v942_v6  ;;  %v901_v29 = vpop.f32.mrb[23].mxu0  ;;  %v1050_v30 = vpop.f32.mrb[27].mxu1 }
 0x124   : > { %v1113_v32 = vpack.c.bf16 %v1105_v24, %v1105_v24  ;;  %v1076_v31 = vadd.f32 %v1033_v10, %v941_v25 }
 0x125   : > { %1123 = vst.msk [vmem:[%s1770_s7 + $0x4] sm:$0xf] %vm1121_vm4, %v1114_v33  ;;  %v1092_v34 = vadd.f32 %v1762_v11, %v1077_v28 }
 0x126   : > { %1122 = vst.msk [vmem:[%s1770_s7] sm:$0xf] %vm1121_vm4, %v1113_v32  ;;  %v1091_v35 = vadd.f32 %v1762_v11, %v1076_v31 }
 0x127   : > { %v1100_v18 = vmax.f32 %v1092_v34, 0.0 }
 0x128   : > { %v1099_v36 = vmax.f32 %v1091_v35, 0.0  ;;  %v1412_v37 = vpop.f32.mrb[24].mxu0  ;;  %v1440_v38 = vpop.f32.mrb[28].mxu1 }
 0x129   : > { %v1108_v39 = vmin.f32 %v1100_v18, 6.0  ;;  %v944_v40 = vadd.f32 %v1412_v37, %v1751_v47  ;;  %v912_v43 = vpop.f32.mrb[25].mxu0  ;;  %v1061_v44 = vpop.f32.mrb[29].mxu1 }
 0x12a   : > { %v1107_v45 = vmin.f32 %v1099_v36, 6.0  ;;  %v943_v46 = vadd.f32 %v912_v43, %v1753_v50  ;;  %v1413_v49 = vpop.f32.mrb[26].mxu0  ;;  %v1441_v51 = vpop.f32.mrb[30].mxu1 }
 0x12b   : > { %v1116_v52 = vpack.c.bf16 %v1108_v39, %v1108_v39  ;;  %v1079_v53 = vadd.f32 %v1436_v20, %v944_v40  ;;  %v915_v54 = vpop.f32.mrb[27].mxu0  ;;  %v1064_v55 = vpop.f32.mrb[31].mxu1 }
 0x12c   : > { %v1115_v56 = vpack.c.bf16 %v1107_v45, %v1107_v45  ;;  %v1078_v57 = vadd.f32 %v1047_v23, %v943_v46 }
 0x12d   : > { %1125 = vst.msk [vmem:[%s1770_s7 + $0xc] sm:$0xf] %vm1121_vm4, %v1116_v52  ;;  %v1094_v58 = vadd.f32 %v1762_v11, %v1079_v53 }
 0x12e   : > { %1124 = vst.msk [vmem:[%s1770_s7 + $0x8] sm:$0xf] %vm1121_vm4, %v1115_v56  ;;  %v1093_v47 = vadd.f32 %v1762_v11, %v1078_v57 }
 0x12f   : > { %v1102_v60 = vmax.f32 %v1094_v58, 0.0 }
 0x130   : > { %v1101_v50 = vmax.f32 %v1093_v47, 0.0  ;;  %v1416_v63 = vpop.f32.mrb[28].mxu0 }
 0x131   : > { %v1110_v1 = vmin.f32 %v1102_v60, 6.0  ;;  %v946_v2 = vadd.f32 %v1416_v63, %v1755_v59  ;;  %v926_v3 = vpop.f32.mrb[29].mxu0 }
 0x132   : > { %v1109_v4 = vmin.f32 %v1101_v50, 6.0  ;;  %v945_v5 = vadd.f32 %v926_v3, %v1757_v0  ;;  %v1417_v9 = vpop.f32.mrb[30].mxu0 }
 0x133   : > { %v1118_v7 = vpack.c.bf16 %v1110_v1, %v1110_v1  ;;  %v1081_v8 = vadd.f32 %v1440_v38, %v946_v2  ;;  %v929_v10 = vpop.f32.mrb[31].mxu0 }
 0x134   : > { %v1117_v12 = vpack.c.bf16 %v1109_v4, %v1109_v4  ;;  %v1080_v13 = vadd.f32 %v1061_v44, %v945_v5 }
 0x135   : > { %1127 = vst.msk [vmem:[%s1770_s7 + $0x14] sm:$0xf] %vm1121_vm4, %v1118_v7  ;;  %v1096_v14 = vadd.f32 %v1762_v11, %v1081_v8 }
 0x136   : > { %1126 = vst.msk [vmem:[%s1770_s7 + $0x10] sm:$0xf] %vm1121_vm4, %v1117_v12  ;;  %v1095_v59 = vadd.f32 %v1762_v11, %v1080_v13 }
 0x137   : > { %v1104_v15 = vmax.f32 %v1096_v14, 0.0 }
 0x138   : > { %v1103_v41 = vmax.f32 %v1095_v59, 0.0 }
 0x139   : > { %v1112_v42 = vmin.f32 %v1104_v15, 6.0 }
 0x13a   : > { %v1111_v0 = vmin.f32 %v1103_v41, 6.0 }
 0x13b   : > { %v1120_v62 = vpack.c.bf16 %v1112_v42, %v1112_v42 }
 0x13c   : > { %v1119_v16 = vpack.c.bf16 %v1111_v0, %v1111_v0 }
 0x13d   : > { %1129 = vst.msk [vmem:[%s1770_s7 + $0x1c] sm:$0xf] %vm1121_vm4, %v1120_v62 }
 0x13e   : > { %1128 = vst.msk [vmem:[%s1770_s7 + $0x18] sm:$0xf] %vm1121_vm4, %v1119_v16 }
 0x13f PF: > { %s13_s14 = sadd.s32 1, %s1514_s14   ;;  %s1813_s12 = smov %s1510_s13 }
 0x140   : > { %p10_p5 = scmp.ge.s32.totalorder %s13_s14, 4   ;;  %s1814_s13 = smov %s1816_s15 }
 0x142   :  { %12 = sbr.rel (!%p10_p5) target bundleno = 2 (0x2), region = 62 }

// kernel: net_forward.7
= control target key start
LH: loop header
LB: loop body
LE: loop exit
PB: predicated region body
PF: predicated region fallthrough
CT: control target
= control target key end

     0   :  { %s1260_s12 = smov 0   ;;  %s1262_s13 = smov 0   ;;  %s1447_s0 = inlined_call_operand.vmem [shape: bf16[2,1,5,17,96], index: 0, kind: input, shape index: {}]   ;;  %s1448_s1 = inlined_call_operand.vmem [shape: bf16[384,32], index: 1, kind: input, shape index: {}]   ;;  %s1449_s2 = inlined_call_operand.vmem [shape: f32[1,32], index: 2, kind: input, shape index: {}]   ;;  %s1450_s3 = inlined_call_operand.vmem [shape: bf16[2,4,4,32], index: 3, kind: output, shape index: {}]  }
   0x1   :  { %s1264_s14 = smov 0  }
   0x2 LB: > { %s25_s15 = sadd.s32 1, %s1234_s13  ;;  %p984_p0 = scmp.ge.s32.totalorder %s1238_s14, 1  ;;  %s1238_s14 = sphi %s1264_s14, %s13_s14   ;;  %s1234_s13 = sphi %s1262_s13, %s1454_s13   ;;  %s1230_s12 = sphi %s1260_s12, %s1453_s12  }
   0x3   : > { %p27_p1 = scmp.ge.s32.totalorder %s25_s15, 2  ;;  %p157_p2 = scmp.lt.s32.totalorder %s1238_s14, 3 }
   0x5   : > { %s1456_s15 = smov (%p27_p1, %s25_s15), 0  ;;  %p158_p3 = pnand %p984_p0, %p157_p2 }
   0x6   : > { %v1187_v0 = vld [vmem:[%s1448_s1 + $0x30] sm:$0xff] (!%p158_p3)   ;;  %p189_p4 = scmp.lt.s32.totalorder (!%p158_p3), %s1230_s12, 1  ;;  %v1188_v1 = vld [vmem:[%s1448_s1] sm:$0xff] (!%p158_p3)   ;;  %v1189_v2 = vld [vmem:[%s1448_s1 + $0x38] sm:$0xff] (!%p158_p3)   ;;  %vm419_vm0 = vcmask (!%p158_p3), 785408   ;;  %vm885_vm4 = vcmask (!%p158_p3), 254976  }
   0x7   : > { %161 = sbr.rel (%p158_p3) target bundleno = 291 (0x123), region = 32  ;;  %1082 = vmatprep.subr.bf16.mxu0 (!%p158_p3), %v1187_v0  ;;  %1102 = vmatprep.subr.bf16.mxu1 (!%p158_p3), %v1188_v1  ;;  %v1190_v3 = vld [vmem:[%s1448_s1 + $0x8] sm:$0xff] (!%p158_p3)   ;;  %v1191_v4 = vld [vmem:[%s1448_s1 + $0x40] sm:$0xff] (!%p158_p3)   ;;  %v1192_v5 = vld [vmem:[%s1448_s1 + $0x10] sm:$0xff] (!%p158_p3)   ;;  %vm224_vm1 = vsmask.f32 (!%p158_p3), 3328 }
   0x8   : > { %1083 = vmatpush3.bf16.msra.mxu0 (!%p158_p3), %v1187_v0  ;;  %1103 = vmatpush3.bf16.msra.mxu1 (!%p158_p3), %v1188_v1  ;;  %v1193_v6 = vld [vmem:[%s1448_s1 + $0x48] sm:$0xff] (!%p158_p3)   ;;  %v1194_v7 = vld [vmem:[%s1448_s1 + $0x18] sm:$0xff] (!%p158_p3)   ;;  %v1195_v8 = vld [vmem:[%s1448_s1 + $0x50] sm:$0xff] (!%p158_p3)   ;;  %vm225_vm2 = vsmask.f32 (!%p158_p3), 7440 }
   0x9   : > { %1084 = vmatprep.subr.bf16.mxu0 (!%p158_p3), %v1189_v2  ;;  %1104 = vmatprep.subr.bf16.mxu1 (!%p158_p3), %v1190_v3  ;;  %v1196_v9 = vld [vmem:[%s1448_s1 + $0x20] sm:$0xff] (!%p158_p3)   ;;  %v1197_v15 = vld [vmem:[%s1448_s1 + $0x58] sm:$0xff] (!%p158_p3)   ;;  %v1198_v29 = vld [vmem:[%s1448_s1 + $0x28] sm:$0xff] (!%p158_p3)  }
   0xa   : > { %vm1331_vm3 = vmor (!%p158_p3), %vm224_vm1, %vm225_vm2  ;;  %v1201_v44 = vld [vmem:[%s1448_s1 + $0x60] sm:$0xff] (!%p158_p3)   ;;  %v1202_v45 = vld [vmem:[%s1448_s1 + $0x90] sm:$0xff] (!%p158_p3)  }
   0xb   : > { %v1204_v54 = vld [vmem:[%s1448_s1 + $0x98] sm:$0xff] (!%p158_p3)   ;;  %v1203_v63 = vld [vmem:[%s1448_s1 + $0x68] sm:$0xff] (!%p158_p3)  }
   0xc   : > { %1085 = vmatpush3.bf16.msra.mxu0 (!%p158_p3), %v1189_v2  ;;  %1105 = vmatpush3.bf16.msra.mxu1 (!%p158_p3), %v1190_v3 }
   0xd   : > { %1086 = vmatprep.subr.bf16.mxu0 (!%p158_p3), %v1191_v4  ;;  %1106 = vmatprep.subr.bf16.mxu1 (!%p158_p3), %v1192_v5 }
   0xe   : > { %s1458_s12 = smov (!%p189_p4, %s1230_s12), 1 }
   0xf   : > { %s1162_s28 = smul.u32 60, %s1458_s12  ;;  %s1041_s24 = sshll.u32 %s1458_s12, 3 }
  0x10   : > { %1087 = vmatpush3.bf16.msra.mxu0 %v1191_v4  ;;  %1107 = vmatpush3.bf16.msra.mxu1 %v1192_v5  ;;  %s206_s27 = scalar_lea.vmem %s1450_s3, %s1041_s24 }
  0x11   : > { %s1308_s8 = scalar_lea.vmem %s1447_s0, %s1162_s28  ;;  %1088 = vmatprep.subr.bf16.mxu0 %v1193_v6  ;;  %1108 = vmatprep.subr.bf16.mxu1 %v1194_v7 }
  0x12   : > { %v209_v10 = vld [vmem:[%s1308_s8] sm:$0xf]  ;;  %v210_v11 = vld [vmem:[%s1308_s8 + $0x4] sm:$0xf]  ;;  %v211_v12 = vld [vmem:[%s1308_s8 + $0x8] sm:$0x1] }
  0x13   : > { %v228_v13 = vshrl.u32 %v209_v10, 16  ;;  %v231_v14 = vshll.u32 %v209_v10, 16  ;;  %v237_v16 = vshll.u32 %v210_v11, 16  ;;  %v241_v17 = vshrl.u32 %v210_v11, 16  ;;  %v212_v20 = vld [vmem:[%s1308_s8 + $0xc] sm:$0xf] }
  0x14   : > { %v247_v18 = vshll.u32 %v211_v12, 16  ;;  %v1002_v19 = vcombine.low %v209_v10, %v210_v11  ;;  %1089 = vmatpush3.bf16.msra.mxu0 %v1193_v6  ;;  %v213_v23 = vld [vmem:[%s1308_s8 + $0x10] sm:$0xf]  ;;  %v214_v24 = vld [vmem:[%s1308_s8 + $0x14] sm:$0x1]  ;;  %1109 = vmatpush3.bf16.msra.mxu1 %v1194_v7  ;;  %v252_v28 = vshrl.u32 %v212_v20, 16 }
  0x15   : > { %v230_v21 = vrot.slane %v228_v13, 4  ;;  %v233_v22 = vrot.slane %v231_v14, 5  ;;  %1090 = vmatprep.subr.bf16.mxu0 %v1195_v8  ;;  %v239_v25 = vrot.slane %v237_v16, 5  ;;  %v243_v26 = vrot.slane %v241_v17, 4  ;;  %1110 = vmatprep.subr.bf16.mxu1 %v1196_v9  ;;  %v215_v55 = vld [vmem:[%s1308_s8 + $0x18] sm:$0xf] }
  0x16   : > { %v249_v27 = vrot.slane %v247_v18, 5  ;;  %1114 = vmatprep.mubr.msk.bf16.mxu1 %vm419_vm0, %v1002_v19  ;;  %v255_v31 = vshll.u32 %v212_v20, 16  ;;  %v261_v32 = vshll.u32 %v213_v23, 16  ;;  %v265_v33 = vshrl.u32 %v213_v23, 16  ;;  %v216_v56 = vld [vmem:[%s1308_s8 + $0x1c] sm:$0xf] }
  0x17   : > { %v234_v30 = vor.u32 %v233_v22, %v230_v21  ;;  %v244_v35 = vor.u32 %v243_v26, %v239_v25  ;;  %v254_v36 = vrot.slane %v252_v28, 4  ;;  %v271_v37 = vshll.u32 %v214_v24, 16  ;;  %v217_v57 = vld [vmem:[%s1308_s8 + $0x20] sm:$0x1]  ;;  %v218_v5 = vld [vmem:[%s1308_s8 + $0x24] sm:$0xf] }
  0x18   : > { %1091 = vmatpush3.bf16.msra.mxu0 %v1195_v8  ;;  %v257_v39 = vrot.slane %v255_v31, 5  ;;  %v263_v40 = vrot.slane %v261_v32, 5  ;;  %v267_v41 = vrot.slane %v265_v33, 4  ;;  %1111 = vmatpush3.bf16.msra.mxu1 %v1196_v9  ;;  %v1345_v53 = vcombine.low %v212_v20, %v213_v23  ;;  %v1205_v7 = vld [vmem:[%s1448_s1 + $0x70] sm:$0xff]   ;;  %v219_v11 = vld [vmem:[%s1308_s8 + $0x28] sm:$0xf] }
  0x19   : > { %v235_v38 = vrot.slane %v234_v30, 4  ;;  %1092 = vmatprep.subr.bf16.mxu0 %v1197_v15  ;;  %v245_v42 = vrot.slane %v244_v35, 4  ;;  %v273_v43 = vrot.slane %v271_v37, 5  ;;  %1112 = vmatprep.subr.bf16.mxu1 %v1198_v29  ;;  %v276_v60 = vshrl.u32 %v215_v55, 16  ;;  %v1206_v13 = vld [vmem:[%s1448_s1 + $0xa0] sm:$0xff]   ;;  %v1207_v28 = vld [vmem:[%s1448_s1 + $0x78] sm:$0xff]  }
  0x1a   : > { %v258_v47 = vor.u32 %v257_v39, %v254_v36  ;;  %v268_v48 = vor.u32 %v267_v41, %v263_v40  ;;  %v279_v61 = vshll.u32 %v215_v55, 16  ;;  %v285_v0 = vshll.u32 %v216_v56, 16  ;;  %v1208_v35 = vld [vmem:[%s1448_s1 + $0xa8] sm:$0xff]   ;;  %v221_v36 = vld [vmem:[%s1308_s8 + $0x30] sm:$0xf] }
  0x1b   : > { %v240_v46 = vsel %vm1331_vm3, %v235_v38, %v239_v25  ;;  %v250_v49 = vsel %vm1331_vm3, %v245_v42, %v249_v27  ;;  %v289_v1 = vshrl.u32 %v216_v56, 16  ;;  %v295_v2 = vshll.u32 %v217_v57, 16  ;;  %v1213_v57 = vld [vmem:[%s1448_s1 + $0x88] sm:$0xff]  }
  0x1c   : > { %1093 = vmatpush3.bf16.msra.mxu0 %v1197_v15  ;;  %v988_v50 = vcombine.low %v240_v46, %v250_v49  ;;  %v259_v51 = vrot.slane %v258_v47, 4  ;;  %v269_v52 = vrot.slane %v268_v48, 4  ;;  %1113 = vmatpush3.bf16.msra.mxu1 %v1198_v29  ;;  %v278_v3 = vrot.slane %v276_v60, 4  ;;  %v220_v15 = vld [vmem:[%s1308_s8 + $0x2c] sm:$0x1]  ;;  %v1212_v47 = vld [vmem:[%s1448_s1 + $0xb0] sm:$0xff]  }
  0x1d   : > { %1122 = vmatprep.subr.bf16.mxu0 %v1201_v44  ;;  %1142 = vmatprep.subr.bf16.mxu1 %v1202_v45  ;;  %v281_v4 = vrot.slane %v279_v61, 5  ;;  %v1364_v6 = vcombine.low %v215_v55, %v216_v56  ;;  %v287_v8 = vrot.slane %v285_v0, 5  ;;  %v291_v9 = vrot.slane %v289_v1, 4  ;;  %v1211_v49 = vld [vmem:[%s1448_s1 + $0x80] sm:$0xff]   ;;  %v1214_v55 = vld [vmem:[%s1448_s1 + $0xb8] sm:$0xff]  }
  0x1e   : > { %1094 = vmatprep.mubr.msk.bf16.mxu0 %vm419_vm0, %v988_v50  ;;  %v264_v58 = vsel %vm1331_vm3, %v259_v51, %v263_v40  ;;  %v274_v59 = vsel %vm1331_vm3, %v269_v52, %v273_v43  ;;  %v297_v10 = vrot.slane %v295_v2, 5  ;;  %v300_v12 = vshrl.u32 %v218_v5, 16  ;;  %v222_v40 = vld [vmem:[%s1308_s8 + $0x34] sm:$0xf]  ;;  %v223_v56 = vld [vmem:[%s1308_s8 + $0x38] sm:$0x1] }
  0x1f   : > { %v989_v62 = vcombine.low %v264_v58, %v274_v59  ;;  %1115 = vmatmul.mubr.msk.bf16.vlgmr.msra.gmra.mrb[0].mxu1 %vm419_vm0, %v1345_v53  ;;  %v282_v14 = vor.u32 %v281_v4, %v278_v3  ;;  %v303_v16 = vshll.u32 %v218_v5, 16  ;;  %v309_v17 = vshll.u32 %v219_v11, 16 }
  0x20   : > { %1143 = vmatpush3.bf16.msra.mxu1 %v1202_v45  ;;  %v313_v18 = vshrl.u32 %v219_v11, 16  ;;  %v292_v19 = vor.u32 %v291_v9, %v287_v8  ;;  %v302_v20 = vrot.slane %v300_v12, 4  ;;  %v319_v21 = vshll.u32 %v220_v15, 16  ;;  %1118 = vmatprep.mubr.msk.bf16.mxu1 %vm419_vm0, %v1364_v6 }
  0x21   : > { %1095 = vmatmul.mubr.msk.bf16.vlgmr.msra.gmra.mrb[0].mxu0 %vm419_vm0, %v989_v62  ;;  %1144 = vmatprep.subr.bf16.mxu1 %v1204_v54  ;;  %v1377_v22 = vcombine.low %v218_v5, %v219_v11  ;;  %v283_v23 = vrot.slane %v282_v14, 4  ;;  %v305_v24 = vrot.slane %v303_v16, 5  ;;  %v311_v25 = vrot.slane %v309_v17, 5 }
  0x22   : > { %1123 = vmatpush3.bf16.msra.mxu0 %v1201_v44  ;;  %v315_v26 = vrot.slane %v313_v18, 4  ;;  %v293_v27 = vrot.slane %v292_v19, 4  ;;  %v321_v29 = vrot.slane %v319_v21, 5  ;;  %v324_v41 = vshrl.u32 %v221_v36, 16 }
  0x23   : > { %1124 = vmatprep.subr.bf16.mxu0 %v1203_v63  ;;  %v288_v30 = vsel %vm1331_vm3, %v283_v23, %v287_v8  ;;  %v306_v31 = vor.u32 %v305_v24, %v302_v20  ;;  %v327_v42 = vshll.u32 %v221_v36, 16  ;;  %v333_v43 = vshll.u32 %v222_v40, 16 }
  0x24   : > { %1145 = vmatpush3.bf16.msra.mxu1 %v1204_v54  ;;  %v316_v32 = vor.u32 %v315_v26, %v311_v25  ;;  %v298_v33 = vsel %vm1331_vm3, %v293_v27, %v297_v10  ;;  %v337_v44 = vshrl.u32 %v222_v40, 16  ;;  %v326_v50 = vrot.slane %v324_v41, 4 }
  0x25   : > { %1146 = vmatprep.subr.bf16.mxu1 %v1206_v13  ;;  %v990_v37 = vcombine.low %v288_v30, %v298_v33  ;;  %v307_v38 = vrot.slane %v306_v31, 4  ;;  %v329_v51 = vrot.slane %v327_v42, 5  ;;  %v335_v52 = vrot.slane %v333_v43, 5 }
  0x26   : > { %1125 = vmatpush3.bf16.msra.mxu0 %v1203_v63  ;;  %v317_v39 = vrot.slane %v316_v32, 4  ;;  %v339_v54 = vrot.slane %v337_v44, 4  ;;  %v343_v60 = vshll.u32 %v223_v56, 16  ;;  %v1016_v2 = vcombine.low %v221_v36, %v222_v40 }
  0x27   : > { %1126 = vmatprep.subr.bf16.mxu0 %v1205_v7  ;;  %1119 = vmatmul.mubr.msk.bf16.gmra.mrb[4].mxu1 %vm419_vm0, %v1377_v22  ;;  %v312_v45 = vsel %vm1331_vm3, %v307_v38, %v311_v25  ;;  %v330_v58 = vor.u32 %v329_v51, %v326_v50 }
  0x28   : > { %1147 = vmatpush3.bf16.msra.mxu1 %v1206_v13  ;;  %1154 = vmatprep.mubr.msk.bf16.mxu1 %vm419_vm0, %v989_v62  ;;  %v322_v46 = vsel %vm1331_vm3, %v317_v39, %v321_v29  ;;  %v340_v59 = vor.u32 %v339_v54, %v335_v52  ;;  %v345_v63 = vrot.slane %v343_v60, 5 }
  0x29   : > { %1098 = vmatprep.mubr.msk.bf16.mxu0 %vm419_vm0, %v990_v37  ;;  %1148 = vmatprep.subr.bf16.mxu1 %v1208_v35  ;;  %v991_v48 = vcombine.low %v312_v45, %v322_v46  ;;  %v331_v61 = vrot.slane %v330_v58, 4 }
  0x2a   : > { %1127 = vmatpush3.bf16.msra.mxu0 %v1205_v7  ;;  %v341_v62 = vrot.slane %v340_v59, 4 }
  0x2b   : > { %1128 = vmatprep.subr.bf16.mxu0 %v1207_v28  ;;  %1099 = vmatmul.mubr.msk.bf16.gmra.mrb[4].mxu0 %vm419_vm0, %v991_v48 }
  0x2c   : > { %1149 = vmatpush3.bf16.msra.mxu1 %v1208_v35  ;;  %1134 = vmatprep.mubr.msk.bf16.mxu0 %vm419_vm0, %v1345_v53  ;;  %v336_v53 = vsel %vm1331_vm3, %v331_v61, %v335_v52  ;;  %v346_v0 = vsel %vm1331_vm3, %v341_v62, %v345_v63 }
  0x2d   : > { %1150 = vmatprep.subr.bf16.mxu1 %v1212_v47  ;;  %v1027_v1 = vcombine.low %v336_v53, %v346_v0 }
  0x2e   : > { %1129 = vmatpush3.bf16.msra.mxu0 %v1207_v28  ;;  %v1038_v28 = vld [vmem:[%s1449_s2] ss:$0 sm:$0xff] }
  0x2f   : > { %1130 = vmatprep.subr.bf16.mxu0 %v1211_v49 }
  0x30   : > { %1151 = vmatpush3.bf16.msra.mxu1 %v1212_v47 }
  0x31   : > { %1152 = vmatprep.subr.bf16.mxu1 %v1214_v55 }
  0x32   : > { %1131 = vmatpush3.bf16.msra.mxu0 %v1211_v49 }
  0x33   : > { %1132 = vmatprep.subr.bf16.mxu0 %v1213_v57 }
  0x34   : > { %1153 = vmatpush3.bf16.msra.mxu1 %v1214_v55 }
  0x36   : > { %1133 = vmatpush3.bf16.msra.mxu0 %v1213_v57 }
  0x37   : > { %1155 = vmatmul.mubr.msk.bf16.vlgmr.msra.gmra.mrb[8].mxu1 %vm419_vm0, %v990_v37 }
  0x38   : > { %1158 = vmatprep.mubr.msk.bf16.mxu1 %vm419_vm0, %v991_v48 }
  0x39   : > { %1135 = vmatmul.mubr.msk.bf16.vlgmr.msra.gmra.mrb[8].mxu0 %vm419_vm0, %v1364_v6 }
  0x3a   : > { %1138 = vmatprep.mubr.msk.bf16.mxu0 %vm419_vm0, %v1377_v22 }
  0x3f   : > { %1159 = vmatmul.mubr.msk.bf16.gmra.mrb[12].mxu1 %vm419_vm0, %v1027_v1 }
  0x41   : > { %1139 = vmatmul.mubr.msk.bf16.gmra.mrb[12].mxu0 %vm419_vm0, %v1016_v2 }
  0xf2   : > { %v1116_v3 = vpop.f32.mrb[0].mxu1 }
  0xf3   : > { %v595_v5 = vpop.f32.mrb[1].mxu1 }
  0xf4   : > { %v1096_v4 = vpop.f32.mrb[0].mxu0  ;;  %v1117_v8 = vpop.f32.mrb[2].mxu1 }
  0xf5   : > { %v603_v6 = vadd.f32 %v1116_v3, %v1096_v4  ;;  %v466_v7 = vpop.f32.mrb[1].mxu0  ;;  %v598_v11 = vpop.f32.mrb[3].mxu1 }
  0xf6   : > { %v596_v9 = vadd.f32 %v595_v5, %v466_v7  ;;  %v1097_v10 = vpop.f32.mrb[2].mxu0 }
  0xf7   : > { %v469_v34 = vpop.f32.mrb[3].mxu0 }
  0xfa   : > { %v1120_v12 = vpop.f32.mrb[4].mxu1 }
  0xfb   : > { %v609_v13 = vpop.f32.mrb[5].mxu1 }
  0xfc   : > { %v1121_v14 = vpop.f32.mrb[6].mxu1 }
  0xfd   : > { %v612_v15 = vpop.f32.mrb[7].mxu1 }
  0xfe   : > { %v1100_v16 = vpop.f32.mrb[4].mxu0 }
  0xff   : > { %v480_v17 = vpop.f32.mrb[5].mxu0  ;;  %v617_v18 = vadd.f32 %v1120_v12, %v1100_v16 }
 0x100   : > { %v1101_v19 = vpop.f32.mrb[6].mxu0  ;;  %v610_v20 = vadd.f32 %v609_v13, %v480_v17 }
 0x101   : > { %v483_v21 = vpop.f32.mrb[7].mxu0 }
 0x10a   : > { %v1156_v22 = vpop.f32.mrb[8].mxu1 }
 0x10b   : > { %v831_v24 = vpop.f32.mrb[9].mxu1 }
 0x10c   : > { %v1136_v23 = vpop.f32.mrb[8].mxu0  ;;  %v1157_v27 = vpop.f32.mrb[10].mxu1 }
 0x10d   : > { %v740_v25 = vadd.f32 %v1136_v23, %v603_v6  ;;  %v712_v26 = vpop.f32.mrb[9].mxu0  ;;  %v834_v31 = vpop.f32.mrb[11].mxu1 }
 0x10e   : > { %v739_v29 = vadd.f32 %v712_v26, %v596_v9  ;;  %v1137_v30 = vpop.f32.mrb[10].mxu0 }
 0x10f   : > { %v859_v32 = vadd.f32 %v1156_v22, %v740_v25  ;;  %v715_v33 = vpop.f32.mrb[11].mxu0 }
 0x110   : > { %v858_v35 = vadd.f32 %v831_v24, %v739_v29 }
 0x111   : > { %v870_v36 = vadd.f32 %v1038_v28, %v859_v32 }
 0x112   : > { %v869_v37 = vadd.f32 %v1038_v28, %v858_v35  ;;  %v1160_v39 = vpop.f32.mrb[12].mxu1 }
 0x113   : > { %v874_v38 = vmax.f32 %v870_v36, 0.0  ;;  %v845_v42 = vpop.f32.mrb[13].mxu1 }
 0x114   : > { %v873_v40 = vmax.f32 %v869_v37, 0.0  ;;  %v1140_v41 = vpop.f32.mrb[12].mxu0  ;;  %v1161_v46 = vpop.f32.mrb[14].mxu1 }
 0x115   : > { %v878_v43 = vmin.f32 %v874_v38, 6.0  ;;  %v742_v44 = vadd.f32 %v1140_v41, %v617_v18  ;;  %v726_v45 = vpop.f32.mrb[13].mxu0  ;;  %v848_v50 = vpop.f32.mrb[15].mxu1 }
 0x116   : > { %v877_v47 = vmin.f32 %v873_v40, 6.0  ;;  %v741_v48 = vadd.f32 %v726_v45, %v610_v20  ;;  %v1141_v49 = vpop.f32.mrb[14].mxu0 }
 0x117   : > { %v882_v51 = vpack.c.bf16 %v878_v43, %v878_v43  ;;  %v861_v52 = vadd.f32 %v1160_v39, %v742_v44  ;;  %v729_v54 = vpop.f32.mrb[15].mxu0 }
 0x118   : > { %v881_v55 = vpack.c.bf16 %v877_v47, %v877_v47  ;;  %v860_v56 = vadd.f32 %v845_v42, %v741_v48 }
 0x119   : > { %887 = vst.msk [vmem:[%s206_s27 + $0x2] sm:$0x3] %vm885_vm4, %v882_v51  ;;  %v872_v57 = vadd.f32 %v1038_v28, %v861_v52 }
 0x11a   : > { %886 = vst.msk [vmem:[%s206_s27] sm:$0x3] %vm885_vm4, %v881_v55  ;;  %v871_v58 = vadd.f32 %v1038_v28, %v860_v56 }
 0x11b   : > { %v876_v59 = vmax.f32 %v872_v57, 0.0 }
 0x11c   : > { %v875_v60 = vmax.f32 %v871_v58, 0.0 }
 0x11d   : > { %v880_v61 = vmin.f32 %v876_v59, 6.0 }
 0x11e   : > { %v879_v62 = vmin.f32 %v875_v60, 6.0 }
 0x11f   : > { %v884_v63 = vpack.c.bf16 %v880_v61, %v880_v61 }
 0x120   : > { %v883_v53 = vpack.c.bf16 %v879_v62, %v879_v62 }
 0x121   : > { %889 = vst.msk [vmem:[%s206_s27 + $0x6] sm:$0x3] %vm885_vm4, %v884_v63 }
 0x122   : > { %888 = vst.msk [vmem:[%s206_s27 + $0x4] sm:$0x3] %vm885_vm4, %v883_v53 }
 0x123 PF: > { %s13_s14 = sadd.s32 1, %s1238_s14   ;;  %s1453_s12 = smov %s1234_s13 }
 0x124   : > { %p10_p5 = scmp.ge.s32.totalorder %s13_s14, 4   ;;  %s1454_s13 = smov %s1456_s15 }
 0x126   :  { %12 = sbr.rel (!%p10_p5) target bundleno = 2 (0x2), region = 62 }

// kernel: net_forward.8
= control target key start
LH: loop header
LB: loop body
LE: loop exit
PB: predicated region body
PF: predicated region fallthrough
CT: control target
= control target key end

     0   :  { %s979_s12 = smov 0   ;;  %s981_s13 = smov 0   ;;  %s1148_s0 = inlined_call_operand.vmem [shape: bf16[2,1,3,17,128], index: 0, kind: input, shape index: {}]   ;;  %s1149_s1 = inlined_call_operand.vmem [shape: bf16[512,96], index: 1, kind: input, shape index: {}]   ;;  %s1150_s2 = inlined_call_operand.vmem [shape: f32[1,96], index: 2, kind: input, shape index: {}]   ;;  %s1151_s3 = inlined_call_operand.vmem [shape: bf16[2,2,2,96], index: 3, kind: output, shape index: {}]  }
   0x1   :  { %s983_s14 = smov 0  }
   0x2 LB: > { %s25_s15 = sadd.s32 1, %s953_s13  ;;  %p775_p0 = scmp.ge.s32.totalorder %s957_s14, 1  ;;  %s957_s14 = sphi %s983_s14, %s13_s14   ;;  %s953_s13 = sphi %s981_s13, %s1155_s13   ;;  %s949_s12 = sphi %s979_s12, %s1154_s12  }
   0x3   : > { %p27_p1 = scmp.ge.s32.totalorder %s25_s15, 2  ;;  %p157_p2 = scmp.lt.s32.totalorder %s957_s14, 3 }
   0x5   : > { %s1157_s15 = smov (%p27_p1, %s25_s15), 0  ;;  %p158_p3 = pnand %p775_p0, %p157_p2 }
   0x6   : > { %v900_v0 = vld [vmem:[%s1149_s1 + $0x40] sm:$0xff] (!%p158_p3)   ;;  %v904_v4 = vld [vmem:[%s1149_s1 + $0x48] sm:$0xff] (!%p158_p3)   ;;  %v908_v8 = vld [vmem:[%s1149_s1 + $0x50] sm:$0xff] (!%p158_p3)   ;;  %p188_p4 = scmp.lt.s32.totalorder (!%p158_p3), %s949_s12, 1  ;;  %vm216_vm0 = vsmask.f32 (!%p158_p3), 3328 }
   0x7   : > { %161 = sbr.rel (%p158_p3) target bundleno = 274 (0x112), region = 32  ;;  %v901_v1 = vld [vmem:[%s1149_s1 + $0xc0] sm:$0xff] (!%p158_p3)   ;;  %819 = vmatprep.subr.bf16.mxu0 (!%p158_p3), %v900_v0  ;;  %v905_v5 = vld [vmem:[%s1149_s1 + $0xc8] sm:$0xff] (!%p158_p3)   ;;  %v909_v9 = vld [vmem:[%s1149_s1 + $0xd0] sm:$0xff] (!%p158_p3)   ;;  %vm217_vm1 = vsmask.f32 (!%p158_p3), 7440 }
   0x8   : > { %v902_v2 = vld [vmem:[%s1149_s1] sm:$0xff] (!%p158_p3)   ;;  %847 = vmatprep.subr.bf16.mxu1 (!%p158_p3), %v901_v1  ;;  %v906_v6 = vld [vmem:[%s1149_s1 + $0x8] sm:$0xff] (!%p158_p3)   ;;  %v910_v10 = vld [vmem:[%s1149_s1 + $0x10] sm:$0xff] (!%p158_p3)   ;;  %vm684_vm3 = vcmask (!%p158_p3), 778240  }
   0x9   : > { %v903_v3 = vld [vmem:[%s1149_s1 + $0x80] sm:$0xff] (!%p158_p3)   ;;  %820 = vmatpush3.bf16.msra.mxu0 (!%p158_p3), %v902_v2  ;;  %v907_v7 = vld [vmem:[%s1149_s1 + $0x88] sm:$0xff] (!%p158_p3)   ;;  %v911_v11 = vld [vmem:[%s1149_s1 + $0x90] sm:$0xff] (!%p158_p3)  }
   0xa   : > { %848 = vmatpush3.bf16.msra.mxu1 (!%p158_p3), %v903_v3  ;;  %821 = vmatprep.subr.bf16.mxu0 (!%p158_p3), %v904_v4  ;;  %v912_v12 = vld [vmem:[%s1149_s1 + $0x58] sm:$0xff] (!%p158_p3)   ;;  %v916_v16 = vld [vmem:[%s1149_s1 + $0x60] sm:$0xff] (!%p158_p3)   ;;  %v920_v20 = vld [vmem:[%s1149_s1 + $0x68] sm:$0xff] (!%p158_p3)  }
   0xb   : > { %849 = vmatprep.subr.bf16.mxu1 (!%p158_p3), %v905_v5  ;;  %v913_v13 = vld [vmem:[%s1149_s1 + $0xd8] sm:$0xff] (!%p158_p3)   ;;  %v917_v17 = vld [vmem:[%s1149_s1 + $0xe0] sm:$0xff] (!%p158_p3)   ;;  %v921_v21 = vld [vmem:[%s1149_s1 + $0xe8] sm:$0xff] (!%p158_p3)  }
   0xc   : > { %v914_v14 = vld [vmem:[%s1149_s1 + $0x18] sm:$0xff] (!%p158_p3)   ;;  %v918_v18 = vld [vmem:[%s1149_s1 + $0x20] sm:$0xff] (!%p158_p3)   ;;  %v922_v22 = vld [vmem:[%s1149_s1 + $0x28] sm:$0xff] (!%p158_p3)  }
   0xd   : > { %822 = vmatpush3.bf16.msra.mxu0 (!%p158_p3), %v906_v6  ;;  %v915_v15 = vld [vmem:[%s1149_s1 + $0x98] sm:$0xff] (!%p158_p3)   ;;  %v919_v19 = vld [vmem:[%s1149_s1 + $0xa0] sm:$0xff] (!%p158_p3)   ;;  %v923_v23 = vld [vmem:[%s1149_s1 + $0xa8] sm:$0xff] (!%p158_p3)  }
   0xe   : > { %850 = vmatpush3.bf16.msra.mxu1 %v907_v7  ;;  %823 = vmatprep.subr.bf16.mxu0 %v908_v8  ;;  %s1159_s12 = smov (!%p188_p4, %s949_s12), 1  ;;  %v924_v24 = vld [vmem:[%s1149_s1 + $0x70] sm:$0xff]   ;;  %v928_v28 = vld [vmem:[%s1149_s1 + $0x78] sm:$0xff]   ;;  %vm1114_vm2 = vmor %vm216_vm0, %vm217_vm1 }
   0xf   : > { %851 = vmatprep.subr.bf16.mxu1 %v909_v9  ;;  %v925_v25 = vld [vmem:[%s1149_s1 + $0xf0] sm:$0xff]   ;;  %s875_s22 = smul.u32 36, %s1159_s12  ;;  %v929_v29 = vld [vmem:[%s1149_s1 + $0xf8] sm:$0xff]   ;;  %s777_s17 = sshll.u32 %s1159_s12, 1 }
  0x10   : > { %v926_v26 = vld [vmem:[%s1149_s1 + $0x30] sm:$0xff]   ;;  %v930_v30 = vld [vmem:[%s1149_s1 + $0x38] sm:$0xff]   ;;  %s204_s20 = scalar_lea.vmem %s1151_s3, %s777_s17 }
  0x11   : > { %824 = vmatpush3.bf16.msra.mxu0 %v910_v10  ;;  %v927_v27 = vld [vmem:[%s1149_s1 + $0xb0] sm:$0xff]   ;;  %s1097_s6 = scalar_lea.vmem %s1148_s0, %s875_s22  ;;  %v931_v31 = vld [vmem:[%s1149_s1 + $0xb8] sm:$0xff]  }
  0x12   : > { %852 = vmatpush3.bf16.msra.mxu1 %v911_v11  ;;  %825 = vmatprep.subr.bf16.mxu0 %v912_v12  ;;  %v207_v32 = vld [vmem:[%s1097_s6] sm:$0xf]  ;;  %v208_v33 = vld [vmem:[%s1097_s6 + $0x4] sm:$0xf]  ;;  %v209_v34 = vld [vmem:[%s1097_s6 + $0x8] sm:$0x1] }
  0x13   : > { %853 = vmatprep.subr.bf16.mxu1 %v913_v13  ;;  %v220_v35 = vshrl.u32 %v207_v32, 16  ;;  %v223_v36 = vshll.u32 %v207_v32, 16  ;;  %v229_v37 = vshll.u32 %v208_v33, 16  ;;  %v233_v38 = vshrl.u32 %v208_v33, 16  ;;  %v210_v40 = vld [vmem:[%s1097_s6 + $0xc] sm:$0xf] }
  0x14   : > { %v239_v39 = vshll.u32 %v209_v34, 16  ;;  %v211_v43 = vld [vmem:[%s1097_s6 + $0x10] sm:$0xf]  ;;  %v212_v44 = vld [vmem:[%s1097_s6 + $0x14] sm:$0x1]  ;;  %v244_v47 = vshrl.u32 %v210_v40, 16  ;;  %v778_v48 = vcombine.low %v207_v32, %v208_v33 }
  0x15   : > { %826 = vmatpush3.bf16.msra.mxu0 %v914_v14  ;;  %v222_v41 = vrot.slane %v220_v35, 4  ;;  %v225_v42 = vrot.slane %v223_v36, 5  ;;  %v231_v45 = vrot.slane %v229_v37, 5  ;;  %v235_v46 = vrot.slane %v233_v38, 4  ;;  %v213_v53 = vld [vmem:[%s1097_s6 + $0x18] sm:$0xf] }
  0x16   : > { %854 = vmatpush3.bf16.msra.mxu1 %v915_v15  ;;  %827 = vmatprep.subr.bf16.mxu0 %v916_v16  ;;  %v247_v50 = vshll.u32 %v210_v40, 16  ;;  %v253_v51 = vshll.u32 %v211_v43, 16  ;;  %v257_v52 = vshrl.u32 %v211_v43, 16  ;;  %v241_v56 = vrot.slane %v239_v39, 5  ;;  %v214_v59 = vld [vmem:[%s1097_s6 + $0x1c] sm:$0xf] }
  0x17   : > { %855 = vmatprep.subr.bf16.mxu1 %v917_v17  ;;  %v226_v49 = vor.u32 %v225_v42, %v222_v41  ;;  %v236_v55 = vor.u32 %v235_v46, %v231_v45  ;;  %v246_v57 = vrot.slane %v244_v47, 4  ;;  %v263_v58 = vshll.u32 %v212_v44, 16  ;;  %v215_v7 = vld [vmem:[%s1097_s6 + $0x20] sm:$0x1] }
  0x18   : > { %v249_v61 = vrot.slane %v247_v50, 5  ;;  %v255_v62 = vrot.slane %v253_v51, 5  ;;  %v259_v63 = vrot.slane %v257_v52, 4  ;;  %v268_v2 = vshrl.u32 %v213_v53, 16  ;;  %v784_v33 = vld [vmem:[%s1150_s2] ss:$0 sm:$0xff] }
  0x19   : > { %828 = vmatpush3.bf16.msra.mxu0 %v918_v18  ;;  %v227_v60 = vrot.slane %v226_v49, 4  ;;  %v237_v0 = vrot.slane %v236_v55, 4  ;;  %v265_v1 = vrot.slane %v263_v58, 5  ;;  %v271_v3 = vshll.u32 %v213_v53, 16 }
  0x1a   : > { %856 = vmatpush3.bf16.msra.mxu1 %v919_v19  ;;  %829 = vmatprep.subr.bf16.mxu0 %v920_v20  ;;  %v250_v5 = vor.u32 %v249_v61, %v246_v57  ;;  %v260_v6 = vor.u32 %v259_v63, %v255_v62  ;;  %v277_v8 = vshll.u32 %v214_v59, 16  ;;  %v270_v10 = vrot.slane %v268_v2, 4 }
  0x1b   : > { %857 = vmatprep.subr.bf16.mxu1 %v921_v21  ;;  %v232_v4 = vsel %vm1114_vm2, %v227_v60, %v231_v45  ;;  %v242_v9 = vsel %vm1114_vm2, %v237_v0, %v241_v56  ;;  %v273_v11 = vrot.slane %v271_v3, 5  ;;  %v281_v12 = vshrl.u32 %v214_v59, 16 }
  0x1c   : > { %v780_v13 = vcombine.low %v232_v4, %v242_v9  ;;  %v251_v14 = vrot.slane %v250_v5, 4  ;;  %v261_v15 = vrot.slane %v260_v6, 4  ;;  %v279_v16 = vrot.slane %v277_v8, 5 }
  0x1d   : > { %830 = vmatpush3.bf16.msra.mxu0 %v922_v22  ;;  %v274_v17 = vor.u32 %v273_v11, %v270_v10  ;;  %v283_v18 = vrot.slane %v281_v12, 4  ;;  %v287_v19 = vshll.u32 %v215_v7, 16  ;;  %v779_v22 = vcombine.low %v210_v40, %v211_v43 }
  0x1e   : > { %858 = vmatpush3.bf16.msra.mxu1 %v923_v23  ;;  %831 = vmatprep.subr.bf16.mxu0 %v924_v24  ;;  %v256_v20 = vsel %vm1114_vm2, %v251_v14, %v255_v62  ;;  %v266_v21 = vsel %vm1114_vm2, %v261_v15, %v265_v1 }
  0x1f   : > { %859 = vmatprep.subr.bf16.mxu1 %v925_v25  ;;  %616 = vmatprep.mubr.bf16.mxu0 %v780_v13  ;;  %v781_v23 = vcombine.low %v256_v20, %v266_v21  ;;  %v275_v24 = vrot.slane %v274_v17, 4  ;;  %v284_v25 = vor.u32 %v283_v18, %v279_v16 }
  0x21   : > { %832 = vmatpush3.bf16.msra.mxu0 %v926_v26  ;;  %v289_v26 = vrot.slane %v287_v19, 5  ;;  %663 = vmatprep.mubr.bf16.mxu1 %v781_v23 }
  0x22   : > { %860 = vmatpush3.bf16.msra.mxu1 %v927_v27  ;;  %833 = vmatprep.subr.bf16.mxu0 %v928_v28  ;;  %v280_v27 = vsel %vm1114_vm2, %v275_v24, %v279_v16  ;;  %v285_v28 = vrot.slane %v284_v25, 4 }
  0x23   : > { %861 = vmatprep.subr.bf16.mxu1 %v929_v29 }
  0x24   : > { %v290_v29 = vsel %vm1114_vm2, %v285_v28, %v289_v26 }
  0x25   : > { %834 = vmatpush3.bf16.msra.mxu0 %v930_v30  ;;  %v783_v30 = vcombine.low %v280_v27, %v290_v29 }
  0x26   : > { %862 = vmatpush3.bf16.msra.mxu1 %v931_v31  ;;  %v782_v31 = vcombine.low %v213_v53, %v214_v59 }
  0x28   : > { %617 = vmatmul.mubr.bf16.vlgmr.msra.gmra.mrb[0].mxu0 %v778_v48 }
  0x29   : > { %623 = vmatprep.mubr.bf16.mxu0 %v781_v23  ;;  %664 = vmatmul.mubr.bf16.vlgmr.msra.gmra.mrb[0].mxu1 %v779_v22 }
  0x2a   : > { %670 = vmatprep.mubr.bf16.mxu1 %v783_v30 }
  0x30   : > { %624 = vmatmul.mubr.bf16.gmra.mrb[4].mxu0 %v779_v22 }
  0x31   : > { %671 = vmatmul.mubr.bf16.gmra.mrb[4].mxu1 %v782_v31 }
  0xfb   : > { %v835_v32 = vpop.f32.mrb[0].mxu0 }
  0xfc   : > { %v836_v34 = vpop.f32.mrb[1].mxu0  ;;  %v863_v37 = vpop.f32.mrb[0].mxu1 }
  0xfd   : > { %v837_v35 = vadd.f32 %v836_v34, %v835_v32  ;;  %v838_v36 = vpop.f32.mrb[2].mxu0  ;;  %v864_v40 = vpop.f32.mrb[1].mxu1 }
  0xfe   : > { %v839_v38 = vpop.f32.mrb[3].mxu0  ;;  %v865_v41 = vadd.f32 %v864_v40, %v863_v37  ;;  %v866_v42 = vpop.f32.mrb[2].mxu1 }
  0xff   : > { %v619_v39 = vadd.f32 %v837_v35, %v784_v33  ;;  %v867_v43 = vpop.f32.mrb[3].mxu1 }
 0x101   : > { %v666_v44 = vadd.f32 %v865_v41, %v619_v39 }
 0x103   : > { %v841_v45 = vpop.f32.mrb[4].mxu0  ;;  %v678_v46 = vmax.f32 %v666_v44, 0.0 }
 0x104   : > { %v842_v47 = vpop.f32.mrb[5].mxu0  ;;  %v869_v51 = vpop.f32.mrb[4].mxu1 }
 0x105   : > { %v843_v48 = vadd.f32 %v842_v47, %v841_v45  ;;  %v844_v49 = vpop.f32.mrb[6].mxu0  ;;  %v680_v50 = vmin.f32 %v678_v46, 6.0  ;;  %v870_v54 = vpop.f32.mrb[5].mxu1 }
 0x106   : > { %v845_v52 = vpop.f32.mrb[7].mxu0  ;;  %v871_v56 = vadd.f32 %v870_v54, %v869_v51  ;;  %v872_v57 = vpop.f32.mrb[6].mxu1 }
 0x107   : > { %v626_v53 = vadd.f32 %v843_v48, %v784_v33  ;;  %v682_v55 = vpack.c.bf16 %v680_v50, %v680_v50  ;;  %v873_v58 = vpop.f32.mrb[7].mxu1 }
 0x109   : > { %685 = vst.msk [vmem:[%s204_s20] sm:$0x1] %vm684_vm3, %v682_v55  ;;  %v673_v59 = vadd.f32 %v871_v56, %v626_v53 }
 0x10b   : > { %v679_v60 = vmax.f32 %v673_v59, 0.0 }
 0x10d   : > { %v681_v61 = vmin.f32 %v679_v60, 6.0 }
 0x10f   : > { %v683_v62 = vpack.c.bf16 %v681_v61, %v681_v61 }
 0x111   : > { %686 = vst.msk [vmem:[%s204_s20 + $0x1] sm:$0x1] %vm684_vm3, %v683_v62 }
 0x112 PF: > { %s13_s14 = sadd.s32 1, %s957_s14   ;;  %s1154_s12 = smov %s953_s13 }
 0x113   : > { %p10_p5 = scmp.ge.s32.totalorder %s13_s14, 4   ;;  %s1155_s13 = smov %s1157_s15 }
 0x115   :  { %12 = sbr.rel (!%p10_p5) target bundleno = 2 (0x2), region = 62 }

// kernel: net_forward.9
= control target key start
LH: loop header
LB: loop body
LE: loop exit
PB: predicated region body
PF: predicated region fallthrough
CT: control target
= control target key end

     0   :  { %s3835_s12 = smov 0   ;;  %s3837_s13 = smov 0   ;;  %s4825_s0 = inlined_call_operand.vmem [shape: bf16[2,1,2,17,384], index: 0, kind: input, shape index: {}]   ;;  %s4826_s1 = inlined_call_operand.vmem [shape: bf16[1536,320], index: 1, kind: input, shape index: {}]   ;;  %s4827_s2 = inlined_call_operand.vmem [shape: f32[1,320], index: 2, kind: input, shape index: {}]   ;;  %s4828_s3 = inlined_call_operand.vmem [shape: bf16[2,1,1,320], index: 3, kind: output, shape index: {}]  }
   0x1   :  { %s3839_s14 = smov 0  }
   0x2 LB: > { %s25_s15 = sadd.s32 1, %s3808_s13  ;;  %p2908_p0 = scmp.ge.s32.totalorder %s3812_s14, 1  ;;  %s3812_s14 = sphi %s3839_s14, %s13_s14   ;;  %s3808_s13 = sphi %s3837_s13, %s4832_s13   ;;  %s3804_s12 = sphi %s3835_s12, %s4831_s12  }
   0x3   : > { %p27_p1 = scmp.ge.s32.totalorder %s25_s15, 2  ;;  %p157_p2 = scmp.lt.s32.totalorder %s3812_s14, 3 }
   0x5   : > { %s4834_s15 = smov (%p27_p1, %s25_s15), 0  ;;  %p158_p3 = pnand %p2908_p0, %p157_p2 }
   0x6   : > { %v3392_v0 = vld [vmem:[%s4826_s1 + $0x4] ss:$12 sps:$4 sm:$0xff] (!%p158_p3)   ;;  %v3396_v2 = vld [vmem:[%s4826_s1] ss:$12 sps:$4 sm:$0xff] (!%p158_p3)   ;;  %v3398_v4 = vld [vmem:[%s4826_s1 + $0x1c] ss:$12 sps:$4 sm:$0xff] (!%p158_p3)  }
   0x7   : > { %161 = sbr.rel (%p158_p3) target bundleno = 557 (0x22d), region = 32  ;;  %v3394_v1 = vld [vmem:[%s4826_s1 + $0x184] ss:$12 sps:$4 sm:$0xff] (!%p158_p3)   ;;  %2282 = vmatprep.subr.bf16.mxu1 (!%p158_p3), %v3392_v0  ;;  %v3397_v3 = vld [vmem:[%s4826_s1 + $0x180] ss:$12 sps:$4 sm:$0xff] (!%p158_p3)   ;;  %p188_p4 = scmp.lt.s32.totalorder (!%p158_p3), %s3804_s12, 1 }
   0x8   : > { %2323 = vmatprep.subr.bf16.mxu0 (!%p158_p3), %v3394_v1  ;;  %2283 = vmatpush1.bf16.msra.mxu1 (!%p158_p3), %v3396_v2  ;;  %v3400_v5 = vld [vmem:[%s4826_s1 + $0x19c] ss:$12 sps:$4 sm:$0xff] (!%p158_p3)   ;;  %v3402_v6 = vld [vmem:[%s4826_s1 + $0x18] ss:$12 sps:$4 sm:$0xff] (!%p158_p3)   ;;  %v3404_v8 = vld [vmem:[%s4826_s1 + $0x34] ss:$12 sps:$4 sm:$0xff] (!%p158_p3)  }
   0x9   : > { %2324 = vmatpush1.bf16.msra.mxu0 (!%p158_p3), %v3397_v3  ;;  %2284 = vmatprep.subr.bf16.mxu1 (!%p158_p3), %v3398_v4  ;;  %v3403_v7 = vld [vmem:[%s4826_s1 + $0x198] ss:$12 sps:$4 sm:$0xff] (!%p158_p3)   ;;  %v3406_v9 = vld [vmem:[%s4826_s1 + $0x1b4] ss:$12 sps:$4 sm:$0xff] (!%p158_p3)   ;;  %v3408_v10 = vld [vmem:[%s4826_s1 + $0x30] ss:$12 sps:$4 sm:$0xff] (!%p158_p3)  }
   0xa   : > { %2325 = vmatprep.subr.bf16.mxu0 (!%p158_p3), %v3400_v5  ;;  %v3409_v11 = vld [vmem:[%s4826_s1 + $0x1b0] ss:$12 sps:$4 sm:$0xff] (!%p158_p3)   ;;  %v3410_v12 = vld [vmem:[%s4826_s1 + $0x4c] ss:$12 sps:$4 sm:$0xff] (!%p158_p3)   ;;  %v3414_v14 = vld [vmem:[%s4826_s1 + $0x48] ss:$12 sps:$4 sm:$0xff] (!%p158_p3)  }
   0xb   : > { %v3412_v13 = vld [vmem:[%s4826_s1 + $0x1cc] ss:$12 sps:$4 sm:$0xff] (!%p158_p3)   ;;  %v3415_v15 = vld [vmem:[%s4826_s1 + $0x1c8] ss:$12 sps:$4 sm:$0xff] (!%p158_p3)   ;;  %v3416_v16 = vld [vmem:[%s4826_s1 + $0x64] ss:$12 sps:$4 sm:$0xff] (!%p158_p3)  }
   0xc   : > { %2285 = vmatpush1.bf16.msra.mxu1 (!%p158_p3), %v3402_v6  ;;  %v3418_v17 = vld [vmem:[%s4826_s1 + $0x1e4] ss:$12 sps:$4 sm:$0xff] (!%p158_p3)   ;;  %v3420_v18 = vld [vmem:[%s4826_s1 + $0x60] ss:$12 sps:$4 sm:$0xff] (!%p158_p3)   ;;  %v3422_v20 = vld [vmem:[%s4826_s1 + $0x7c] ss:$12 sps:$4 sm:$0xff] (!%p158_p3)  }
   0xd   : > { %2326 = vmatpush1.bf16.msra.mxu0 (!%p158_p3), %v3403_v7  ;;  %2286 = vmatprep.subr.bf16.mxu1 (!%p158_p3), %v3404_v8  ;;  %v3421_v19 = vld [vmem:[%s4826_s1 + $0x1e0] ss:$12 sps:$4 sm:$0xff] (!%p158_p3)   ;;  %v3424_v21 = vld [vmem:[%s4826_s1 + $0x1fc] ss:$12 sps:$4 sm:$0xff] (!%p158_p3)   ;;  %v3426_v22 = vld [vmem:[%s4826_s1 + $0x78] ss:$12 sps:$4 sm:$0xff] (!%p158_p3)  }
   0xe   : > { %2327 = vmatprep.subr.bf16.mxu0 %v3406_v9  ;;  %v3427_v23 = vld [vmem:[%s4826_s1 + $0x1f8] ss:$12 sps:$4 sm:$0xff]   ;;  %v3428_v24 = vld [vmem:[%s4826_s1 + $0x94] ss:$12 sps:$4 sm:$0xff]   ;;  %v3432_v26 = vld [vmem:[%s4826_s1 + $0x90] ss:$12 sps:$4 sm:$0xff]  }
   0xf   : > { %v3430_v25 = vld [vmem:[%s4826_s1 + $0x214] ss:$12 sps:$4 sm:$0xff]   ;;  %v3433_v27 = vld [vmem:[%s4826_s1 + $0x210] ss:$12 sps:$4 sm:$0xff]   ;;  %v3434_v28 = vld [vmem:[%s4826_s1 + $0xac] ss:$12 sps:$4 sm:$0xff]  }
  0x10   : > { %2287 = vmatpush1.bf16.msra.mxu1 %v3408_v10  ;;  %v3436_v29 = vld [vmem:[%s4826_s1 + $0x22c] ss:$12 sps:$4 sm:$0xff]   ;;  %v3438_v30 = vld [vmem:[%s4826_s1 + $0xa8] ss:$12 sps:$4 sm:$0xff]   ;;  %v3440_v32 = vld [vmem:[%s4826_s1 + $0xc4] ss:$12 sps:$4 sm:$0xff]  }
  0x11   : > { %2328 = vmatpush1.bf16.msra.mxu0 %v3409_v11  ;;  %2288 = vmatprep.subr.bf16.mxu1 %v3410_v12  ;;  %v3439_v31 = vld [vmem:[%s4826_s1 + $0x228] ss:$12 sps:$4 sm:$0xff]   ;;  %v3442_v33 = vld [vmem:[%s4826_s1 + $0x244] ss:$12 sps:$4 sm:$0xff]   ;;  %v3444_v34 = vld [vmem:[%s4826_s1 + $0xc0] ss:$12 sps:$4 sm:$0xff]  }
  0x12   : > { %2329 = vmatprep.subr.bf16.mxu0 %v3412_v13  ;;  %v3445_v35 = vld [vmem:[%s4826_s1 + $0x240] ss:$12 sps:$4 sm:$0xff]   ;;  %v3446_v36 = vld [vmem:[%s4826_s1 + $0xdc] ss:$12 sps:$4 sm:$0xff]   ;;  %s4836_s12 = smov (!%p188_p4, %s3804_s12), 1  ;;  %vm2804_vm1 = vcmask 1040384  }
  0x13   : > { %v3448_v37 = vld [vmem:[%s4826_s1 + $0x25c] ss:$12 sps:$4 sm:$0xff]   ;;  %v3450_v38 = vld [vmem:[%s4826_s1 + $0xd8] ss:$12 sps:$4 sm:$0xff]   ;;  %v3452_v40 = vld [vmem:[%s4826_s1 + $0xf4] ss:$12 sps:$4 sm:$0xff]  }
  0x14   : > { %2289 = vmatpush1.bf16.msra.mxu1 %v3414_v14  ;;  %v3451_v39 = vld [vmem:[%s4826_s1 + $0x258] ss:$12 sps:$4 sm:$0xff]   ;;  %s3365_s29 = smul.u32 72, %s4836_s12  ;;  %v3454_v41 = vld [vmem:[%s4826_s1 + $0x274] ss:$12 sps:$4 sm:$0xff]   ;;  %vm2807_vm3 = vcmask 1041409  }
  0x15   : > { %2330 = vmatpush1.bf16.msra.mxu0 %v3415_v15  ;;  %2290 = vmatprep.subr.bf16.mxu1 %v3416_v16  ;;  %v3456_v42 = vld [vmem:[%s4826_s1 + $0xf0] ss:$12 sps:$4 sm:$0xff]   ;;  %v3458_v44 = vld [vmem:[%s4826_s1 + $0x10c] ss:$12 sps:$4 sm:$0xff]   ;;  %v3462_v46 = vld [vmem:[%s4826_s1 + $0x108] ss:$12 sps:$4 sm:$0xff]  }
  0x16   : > { %2331 = vmatprep.subr.bf16.mxu0 %v3418_v17  ;;  %v3457_v43 = vld [vmem:[%s4826_s1 + $0x270] ss:$12 sps:$4 sm:$0xff]   ;;  %s3998_s17 = scalar_lea.vmem %s4825_s0, %s3365_s29  ;;  %v3460_v45 = vld [vmem:[%s4826_s1 + $0x28c] ss:$12 sps:$4 sm:$0xff]   ;;  %v3463_v47 = vld [vmem:[%s4826_s1 + $0x288] ss:$12 sps:$4 sm:$0xff]  }
  0x17   : > { %v4010_v48 = vld [vmem:[%s3998_s17] ss:$12 sps:$4 sm:$0xff]   ;;  %v4013_v49 = vld [vmem:[%s3998_s17 + $0x4] ss:$12 sps:$4 sm:$0xff]   ;;  %v210_v50 = vld [vmem:[%s3998_s17 + $0x18] sm:$0x11] }
  0x18   : > { %2291 = vmatpush1.bf16.msra.mxu1 %v3420_v18  ;;  %vm242_vm0 = vsmask.f32 7424  ;;  %v3464_v51 = vld [vmem:[%s4826_s1 + $0x124] ss:$12 sps:$4 sm:$0xff]   ;;  %v2913_v53 = vcombine.low %v210_v50, %v210_v50  ;;  %v244_v54 = vshrl.u32 %v4010_v48, 16  ;;  %v246_v55 = vshll.u32 %v4010_v48, 16  ;;  %2314 = vmatprep.mubr.bf16.mxu1 %v4013_v49 }
  0x19   : > { %2332 = vmatpush1.bf16.msra.mxu0 %v3421_v19  ;;  %2292 = vmatprep.subr.bf16.mxu1 %v3422_v20  ;;  %v3466_v52 = vld [vmem:[%s4826_s1 + $0x2a4] ss:$12 sps:$4 sm:$0xff]   ;;  %v3468_v56 = vld [vmem:[%s4826_s1 + $0x120] ss:$12 sps:$4 sm:$0xff]   ;;  %v3470_v60 = vld [vmem:[%s4826_s1 + $0x13c] ss:$12 sps:$4 sm:$0xff]   ;;  %v2914_v8 = vcombine.high %v210_v50, %v210_v50 }
  0x1a   : > { %2333 = vmatprep.subr.bf16.mxu0 %v3424_v21  ;;  %v3469_v57 = vld [vmem:[%s4826_s1 + $0x2a0] ss:$12 sps:$4 sm:$0xff]   ;;  %v248_v58 = vrot.slane %v246_v55, 1  ;;  %v251_v59 = vshll.u32 %v2913_v53, 16  ;;  %v3472_v61 = vld [vmem:[%s4826_s1 + $0x2bc] ss:$12 sps:$4 sm:$0xff]  }
  0x1b   : > { %v3474_v0 = vld [vmem:[%s4826_s1 + $0x138] ss:$12 sps:$4 sm:$0xff]   ;;  %v3476_v3 = vld [vmem:[%s4826_s1 + $0x154] ss:$12 sps:$4 sm:$0xff]   ;;  %v3480_v5 = vld [vmem:[%s4826_s1 + $0x150] ss:$12 sps:$4 sm:$0xff]  }
  0x1c   : > { %2293 = vmatpush1.bf16.msra.mxu1 %v3426_v22  ;;  %v249_v62 = vor.u32 %v248_v58, %v244_v54  ;;  %v253_v63 = vrot.slane %v251_v59, 1  ;;  %v3475_v2 = vld [vmem:[%s4826_s1 + $0x2b8] ss:$12 sps:$4 sm:$0xff]   ;;  %v3478_v4 = vld [vmem:[%s4826_s1 + $0x2d4] ss:$12 sps:$4 sm:$0xff]   ;;  %v258_v10 = vshll.u32 %v4013_v49, 16 }
  0x1d   : > { %2334 = vmatpush1.bf16.msra.mxu0 %v3427_v23  ;;  %2294 = vmatprep.subr.bf16.mxu1 %v3428_v24  ;;  %v3481_v6 = vld [vmem:[%s4826_s1 + $0x2d0] ss:$12 sps:$4 sm:$0xff]   ;;  %v3482_v7 = vld [vmem:[%s4826_s1 + $0x16c] ss:$12 sps:$4 sm:$0xff]   ;;  %v256_v11 = vshrl.u32 %v4013_v49, 16  ;;  %v263_v14 = vshll.u32 %v2914_v8, 16 }
  0x1e   : > { %2335 = vmatprep.subr.bf16.mxu0 %v3430_v25  ;;  %v4041_v1 = vsel %vm242_vm0, %v249_v62, %v253_v63  ;;  %v3484_v9 = vld [vmem:[%s4826_s1 + $0x2ec] ss:$12 sps:$4 sm:$0xff]   ;;  %v3486_v12 = vld [vmem:[%s4826_s1 + $0x168] ss:$12 sps:$4 sm:$0xff]   ;;  %v260_v13 = vrot.slane %v258_v10, 1  ;;  %s3366_s11 = smul.u32 3, %s4836_s12 }
  0x1f   : > { %2355 = vmatprep.mubr.bf16.mxu0 %v4041_v1  ;;  %v3487_v15 = vld [vmem:[%s4826_s1 + $0x2e8] ss:$12 sps:$4 sm:$0xff]   ;;  %v3495_v16 = vld [vmem:[%s4826_s1 + $0x304] ss:$12 sps:$4 sm:$0xff]   ;;  %v3493_v19 = vld [vmem:[%s4826_s1 + $0x300] ss:$12 sps:$4 sm:$0xff]  }
  0x20   : > { %2295 = vmatpush1.bf16.msra.mxu1 %v3432_v26  ;;  %v3496_v17 = vld [vmem:[%s4826_s1 + $0xc8] ss:$12 sps:$4 sm:$0xff]   ;;  %v261_v18 = vor.u32 %v260_v13, %v256_v11  ;;  %v265_v20 = vrot.slane %v263_v14, 1  ;;  %v3502_v25 = vld [vmem:[%s4826_s1 + $0xe0] ss:$12 sps:$4 sm:$0xff]   ;;  %vm2811_vm7 = vcmask 518146  }
  0x21   : > { %2336 = vmatpush1.bf16.msra.mxu0 %v3433_v27  ;;  %2296 = vmatprep.subr.bf16.mxu1 %v3434_v28  ;;  %v4083_v21 = vld [vmem:[%s3998_s17 + $0x8] ss:$12 sps:$4 sm:$0xff]   ;;  %v3499_v26 = vld [vmem:[%s4826_s1 + $0x318] ss:$12 sps:$4 sm:$0xff]   ;;  %v3503_v27 = vld [vmem:[%s4826_s1 + $0x20] ss:$12 sps:$4 sm:$0xff]  }
  0x22   : > { %2337 = vmatprep.subr.bf16.mxu0 %v3436_v29  ;;  %v3498_v22 = vld [vmem:[%s4826_s1 + $0x8] ss:$12 sps:$4 sm:$0xff]   ;;  %v4092_v24 = vsel %vm242_vm0, %v261_v18, %v265_v20  ;;  %v3507_v29 = vld [vmem:[%s4826_s1 + $0xf8] ss:$12 sps:$4 sm:$0xff]   ;;  %v3532_v50 = vld [vmem:[%s4826_s1 + $0x170] ss:$12 sps:$4 sm:$0xff]  }
  0x23   : > { %v3501_v23 = vld [vmem:[%s4826_s1 + $0x31c] ss:$12 sps:$4 sm:$0xff]   ;;  %v3506_v28 = vld [vmem:[%s4826_s1 + $0x334] ss:$12 sps:$4 sm:$0xff]   ;;  %v270_v53 = vshll.u32 %v4083_v21, 16  ;;  %v268_v59 = vshrl.u32 %v4083_v21, 16 }
  0x24   : > { %2297 = vmatpush1.bf16.msra.mxu1 %v3438_v30  ;;  %v3504_v30 = vld [vmem:[%s4826_s1 + $0x330] ss:$12 sps:$4 sm:$0xff]   ;;  %v3537_v55 = vld [vmem:[%s4826_s1 + $0x248] ss:$12 sps:$4 sm:$0xff]   ;;  %v3539_v62 = vld [vmem:[%s4826_s1 + $0x3d8] ss:$12 sps:$4 sm:$0xff]  }
  0x25   : > { %2338 = vmatpush1.bf16.msra.mxu0 %v3439_v31  ;;  %2298 = vmatprep.subr.bf16.mxu1 %v3440_v32  ;;  %v3508_v31 = vld [vmem:[%s4826_s1 + $0x38] ss:$12 sps:$4 sm:$0xff]   ;;  %v3541_v58 = vld [vmem:[%s4826_s1 + $0x3dc] ss:$12 sps:$4 sm:$0xff]   ;;  %v3543_v63 = vld [vmem:[%s4826_s1 + $0x1a0] ss:$12 sps:$4 sm:$0xff]  }
  0x26   : > { %2339 = vmatprep.subr.bf16.mxu0 %v3442_v33  ;;  %v3511_v32 = vld [vmem:[%s4826_s1 + $0x34c] ss:$12 sps:$4 sm:$0xff]   ;;  %v3512_v33 = vld [vmem:[%s4826_s1 + $0x110] ss:$12 sps:$4 sm:$0xff]   ;;  %v3549_v10 = vld [vmem:[%s4826_s1 + $0x408] ss:$12 sps:$4 sm:$0xff]  }
  0x27   : > { %v3536_v54 = vld [vmem:[%s4826_s1 + $0x3c4] ss:$12 sps:$4 sm:$0xff]   ;;  %v3557_v13 = vld [vmem:[%s4826_s1 + $0x2a8] ss:$12 sps:$4 sm:$0xff]   ;;  %v3554_v14 = vld [vmem:[%s4826_s1 + $0x420] ss:$12 sps:$4 sm:$0xff]  }
  0x28   : > { %2299 = vmatpush1.bf16.msra.mxu1 %v3444_v34  ;;  %v3509_v34 = vld [vmem:[%s4826_s1 + $0x348] ss:$12 sps:$4 sm:$0xff]   ;;  %v3553_v11 = vld [vmem:[%s4826_s1 + $0x1d0] ss:$12 sps:$4 sm:$0xff]   ;;  %v3559_v18 = vld [vmem:[%s4826_s1 + $0x438] ss:$12 sps:$4 sm:$0xff]  }
  0x29   : > { %2340 = vmatpush1.bf16.msra.mxu0 %v3445_v35  ;;  %2300 = vmatprep.subr.bf16.mxu1 %v3446_v36  ;;  %v3513_v35 = vld [vmem:[%s4826_s1 + $0x50] ss:$12 sps:$4 sm:$0xff]   ;;  %v3566_v20 = vld [vmem:[%s4826_s1 + $0x454] ss:$12 sps:$4 sm:$0xff]   ;;  %vm2805_vm2 = vsmask.f32 256 }
  0x2a   : > { %2341 = vmatprep.subr.bf16.mxu0 %v3448_v37  ;;  %v3516_v36 = vld [vmem:[%s4826_s1 + $0x364] ss:$12 sps:$4 sm:$0xff]   ;;  %v3517_v37 = vld [vmem:[%s4826_s1 + $0x128] ss:$12 sps:$4 sm:$0xff]   ;;  %vm2808_vm4 = vsmask.f32 1280  ;;  %vm4806_vm5 = vmand %vm2804_vm1, %vm2805_vm2 }
  0x2b   : > { %vm2809_vm6 = vmand %vm2807_vm3, %vm2808_vm4  ;;  %vm2812_vm8 = vsmask.f32 2304 }
  0x2c   : > { %2301 = vmatpush1.bf16.msra.mxu1 %v3450_v38  ;;  %v3514_v38 = vld [vmem:[%s4826_s1 + $0x360] ss:$12 sps:$4 sm:$0xff]   ;;  %vm2810_vm9 = vmor %vm2809_vm6, %vm4806_vm5 }
  0x2d   : > { %2342 = vmatpush1.bf16.msra.mxu0 %v3451_v39  ;;  %2302 = vmatprep.subr.bf16.mxu1 %v3452_v40  ;;  %v3518_v39 = vld [vmem:[%s4826_s1 + $0x68] ss:$12 sps:$4 sm:$0xff]   ;;  %vm2813_vm10 = vmand %vm2811_vm7, %vm2812_vm8 }
  0x2e   : > { %2343 = vmatprep.subr.bf16.mxu0 %v3454_v41  ;;  %v3521_v40 = vld [vmem:[%s4826_s1 + $0x37c] ss:$12 sps:$4 sm:$0xff]   ;;  %v3522_v41 = vld [vmem:[%s4826_s1 + $0x140] ss:$12 sps:$4 sm:$0xff]   ;;  %vm2814_vm11 = vmor %vm2813_vm10, %vm2810_vm9 }
  0x30   : > { %2303 = vmatpush1.bf16.msra.mxu1 %v3456_v42  ;;  %v3519_v42 = vld [vmem:[%s4826_s1 + $0x378] ss:$12 sps:$4 sm:$0xff]  }
  0x31   : > { %2344 = vmatpush1.bf16.msra.mxu0 %v3457_v43  ;;  %2304 = vmatprep.subr.bf16.mxu1 %v3458_v44  ;;  %v3523_v43 = vld [vmem:[%s4826_s1 + $0x80] ss:$12 sps:$4 sm:$0xff]  }
  0x32   : > { %2345 = vmatprep.subr.bf16.mxu0 %v3460_v45  ;;  %v3526_v44 = vld [vmem:[%s4826_s1 + $0x394] ss:$12 sps:$4 sm:$0xff]   ;;  %v3527_v45 = vld [vmem:[%s4826_s1 + $0x158] ss:$12 sps:$4 sm:$0xff]  }
  0x34   : > { %2305 = vmatpush1.bf16.msra.mxu1 %v3462_v46  ;;  %v3524_v46 = vld [vmem:[%s4826_s1 + $0x390] ss:$12 sps:$4 sm:$0xff]  }
  0x35   : > { %2346 = vmatpush1.bf16.msra.mxu0 %v3463_v47  ;;  %2306 = vmatprep.subr.bf16.mxu1 %v3464_v51  ;;  %v3528_v47 = vld [vmem:[%s4826_s1 + $0x98] ss:$12 sps:$4 sm:$0xff]   ;;  %v3529_v51 = vld [vmem:[%s4826_s1 + $0x3a8] ss:$12 sps:$4 sm:$0xff]  }
  0x36   : > { %2347 = vmatprep.subr.bf16.mxu0 %v3466_v52  ;;  %v3533_v52 = vld [vmem:[%s4826_s1 + $0xb0] ss:$12 sps:$4 sm:$0xff]  }
  0x38   : > { %2307 = vmatpush1.bf16.msra.mxu1 %v3468_v56  ;;  %v3534_v56 = vld [vmem:[%s4826_s1 + $0x3c0] ss:$12 sps:$4 sm:$0xff]  }
  0x39   : > { %2348 = vmatpush1.bf16.msra.mxu0 %v3469_v57  ;;  %2308 = vmatprep.subr.bf16.mxu1 %v3470_v60  ;;  %v3538_v57 = vld [vmem:[%s4826_s1 + $0x188] ss:$12 sps:$4 sm:$0xff]   ;;  %v272_v60 = vrot.slane %v270_v53, 1  ;;  %v3604_v53 = vld [vmem:[%s4826_s1 + $0x380] ss:$12 sps:$4 sm:$0xff]  }
  0x3a   : > { %2349 = vmatprep.subr.bf16.mxu0 %v3472_v61  ;;  %v3542_v61 = vld [vmem:[%s4826_s1 + $0x260] ss:$12 sps:$4 sm:$0xff]  }
  0x3c   : > { %2309 = vmatpush1.bf16.msra.mxu1 %v3474_v0  ;;  %v3546_v0 = vld [vmem:[%s4826_s1 + $0x3f4] ss:$12 sps:$4 sm:$0xff]  }
  0x3d   : > { %2350 = vmatpush1.bf16.msra.mxu0 %v3475_v2  ;;  %2310 = vmatprep.subr.bf16.mxu1 %v3476_v3  ;;  %v3574_v2 = vld [vmem:[%s3998_s17 + $0x20] ss:$0 sps:$4 sm:$0x11]   ;;  %v3547_v3 = vld [vmem:[%s4826_s1 + $0x278] ss:$12 sps:$4 sm:$0xff]  }
  0x3e   : > { %2351 = vmatprep.subr.bf16.mxu0 %v3478_v4  ;;  %v273_v4 = vor.u32 %v272_v60, %v268_v59  ;;  %v3613_v59 = vld [vmem:[%s4826_s1 + $0x470] ss:$12 sps:$4 sm:$0xff]   ;;  %v4373_v60 = vld [vmem:[%s3998_s17 + $0x28] ss:$12 sps:$4 sm:$0xff]  }
  0x40   : > { %2311 = vmatpush1.bf16.msra.mxu1 %v3480_v5  ;;  %v275_v5 = vshll.u32 %v3574_v2, 16  ;;  %v3615_v2 = vld [vmem:[%s4826_s1 + $0x540] ss:$12 sps:$4 sm:$0xff]  }
  0x41   : > { %2352 = vmatpush1.bf16.msra.mxu0 %v3481_v6  ;;  %2312 = vmatprep.subr.bf16.mxu1 %v3482_v7  ;;  %v3548_v6 = vld [vmem:[%s4826_s1 + $0x1b8] ss:$12 sps:$4 sm:$0xff]  }
  0x42   : > { %2353 = vmatprep.subr.bf16.mxu0 %v3484_v9  ;;  %v3551_v7 = vld [vmem:[%s4826_s1 + $0x40c] ss:$12 sps:$4 sm:$0xff]   ;;  %v277_v8 = vrot.slane %v275_v5, 1 }
  0x43   : > { %v3623_v5 = vld [vmem:[%s4826_s1 + $0x560] ss:$12 sps:$4 sm:$0xff]  }
  0x44   : > { %2313 = vmatpush1.bf16.msra.mxu1 %v3486_v12  ;;  %v278_v9 = vsel %vm242_vm0, %v273_v4, %v277_v8  ;;  %v3556_v12 = vld [vmem:[%s4826_s1 + $0x424] ss:$12 sps:$4 sm:$0xff]   ;;  %v3622_v4 = vld [vmem:[%s4826_s1 + $0x55c] ss:$12 sps:$4 sm:$0xff]  }
  0x45   : > { %2354 = vmatpush1.bf16.msra.mxu0 %v3487_v15  ;;  %3213 = vmatprep.subr.bf16.mxu1 %v3496_v17  ;;  %v3558_v15 = vld [vmem:[%s4826_s1 + $0x1e8] ss:$12 sps:$4 sm:$0xff]   ;;  %v3562_v17 = vld [vmem:[%s4826_s1 + $0x2c0] ss:$12 sps:$4 sm:$0xff]   ;;  %v3625_v8 = vld [vmem:[%s4826_s1 + $0x570] ss:$12 sps:$4 sm:$0xff]  }
  0x46   : > { %2364 = vmatprep.subr.bf16.mxu0 %v3495_v16  ;;  %v3561_v16 = vld [vmem:[%s4826_s1 + $0x43c] ss:$12 sps:$4 sm:$0xff]  }
  0x47   : > { %2315 = vmatmul.mubr.bf16.vlgmr.msra.gmra.mrb[0].mxu1 %v4010_v48 }
  0x48   : > { %2356 = vmatmul.mubr.bf16.vlgmr.msra.gmra.mrb[0].mxu0 %v4083_v21  ;;  %3214 = vmatpush3.bf16.msra.mxu1 %v3498_v22  ;;  %v3567_v22 = vld [vmem:[%s4826_s1 + $0x2d8] ss:$12 sps:$4 sm:$0xff]  }
  0x49   : > { %2365 = vmatpush1.bf16.msra.mxu0 %v3493_v19  ;;  %3215 = vmatprep.subr.bf16.mxu1 %v3502_v25  ;;  %v3563_v19 = vld [vmem:[%s4826_s1 + $0x200] ss:$12 sps:$4 sm:$0xff]   ;;  %v3568_v25 = vld [vmem:[%s4826_s1 + $0x218] ss:$12 sps:$4 sm:$0xff]  }
  0x4a   : > { %2366 = vmatprep.subr.bf16.mxu0 %v3501_v23  ;;  %2560 = vmatprep.mubr.bf16.mxu1 %v4013_v49  ;;  %v3531_v49 = vld [vmem:[%s4826_s1 + $0x3ac] ss:$12 sps:$4 sm:$0xff]   ;;  %v3564_v23 = vld [vmem:[%s4826_s1 + $0x450] ss:$12 sps:$4 sm:$0xff]  }
  0x4b   : > { %2396 = vmatprep.mubr.bf16.mxu0 %v278_v9 }
  0x4c   : > { %3216 = vmatpush3.bf16.msra.mxu1 %v3503_v27  ;;  %v3572_v27 = vld [vmem:[%s4826_s1 + $0x2f0] ss:$12 sps:$4 sm:$0xff]  }
  0x4d   : > { %2367 = vmatpush1.bf16.msra.mxu0 %v3499_v26  ;;  %3217 = vmatprep.subr.bf16.mxu1 %v3507_v29  ;;  %v3571_v26 = vld [vmem:[%s4826_s1 + $0x46c] ss:$12 sps:$4 sm:$0xff]   ;;  %v3573_v29 = vld [vmem:[%s4826_s1 + $0x230] ss:$12 sps:$4 sm:$0xff]  }
  0x4e   : > { %2368 = vmatprep.subr.bf16.mxu0 %v3506_v28  ;;  %v3569_v28 = vld [vmem:[%s4826_s1 + $0x468] ss:$12 sps:$4 sm:$0xff]  }
  0x50   : > { %3218 = vmatpush3.bf16.msra.mxu1 %v3508_v31  ;;  %v3578_v31 = vld [vmem:[%s4826_s1 + $0x3c8] ss:$12 sps:$4 sm:$0xff]  }
  0x51   : > { %2369 = vmatpush1.bf16.msra.mxu0 %v3504_v30  ;;  %3219 = vmatprep.subr.bf16.mxu1 %v3512_v33  ;;  %v3577_v30 = vld [vmem:[%s4826_s1 + $0x484] ss:$12 sps:$4 sm:$0xff]   ;;  %v3579_v33 = vld [vmem:[%s4826_s1 + $0x308] ss:$12 sps:$4 sm:$0xff]  }
  0x52   : > { %2370 = vmatprep.subr.bf16.mxu0 %v3511_v32  ;;  %v3575_v32 = vld [vmem:[%s4826_s1 + $0x480] ss:$12 sps:$4 sm:$0xff]  }
  0x54   : > { %3220 = vmatpush3.bf16.msra.mxu1 %v3513_v35  ;;  %v3583_v35 = vld [vmem:[%s4826_s1 + $0x3e0] ss:$12 sps:$4 sm:$0xff]  }
  0x55   : > { %2371 = vmatpush1.bf16.msra.mxu0 %v3509_v34  ;;  %3221 = vmatprep.subr.bf16.mxu1 %v3517_v37  ;;  %v3582_v34 = vld [vmem:[%s4826_s1 + $0x49c] ss:$12 sps:$4 sm:$0xff]   ;;  %v3584_v37 = vld [vmem:[%s4826_s1 + $0x320] ss:$12 sps:$4 sm:$0xff]  }
  0x56   : > { %2372 = vmatprep.subr.bf16.mxu0 %v3516_v36  ;;  %v3580_v36 = vld [vmem:[%s4826_s1 + $0x498] ss:$12 sps:$4 sm:$0xff]  }
  0x58   : > { %3222 = vmatpush3.bf16.msra.mxu1 %v3518_v39  ;;  %v3588_v39 = vld [vmem:[%s4826_s1 + $0x3f8] ss:$12 sps:$4 sm:$0xff]  }
  0x59   : > { %2373 = vmatpush1.bf16.msra.mxu0 %v3514_v38  ;;  %3223 = vmatprep.subr.bf16.mxu1 %v3522_v41  ;;  %v3587_v38 = vld [vmem:[%s4826_s1 + $0x4b4] ss:$12 sps:$4 sm:$0xff]   ;;  %v3592_v41 = vld [vmem:[%s4826_s1 + $0x4cc] ss:$12 sps:$4 sm:$0xff]  }
  0x5a   : > { %2374 = vmatprep.subr.bf16.mxu0 %v3521_v40  ;;  %v3589_v40 = vld [vmem:[%s4826_s1 + $0x338] ss:$12 sps:$4 sm:$0xff]  }
  0x5c   : > { %3224 = vmatpush3.bf16.msra.mxu1 %v3523_v43  ;;  %v3590_v43 = vld [vmem:[%s4826_s1 + $0x4c8] ss:$12 sps:$4 sm:$0xff]  }
  0x5d   : > { %2375 = vmatpush1.bf16.msra.mxu0 %v3519_v42  ;;  %3225 = vmatprep.subr.bf16.mxu1 %v3527_v45  ;;  %v3593_v42 = vld [vmem:[%s4826_s1 + $0x410] ss:$12 sps:$4 sm:$0xff]  }
  0x5e   : > { %2376 = vmatprep.subr.bf16.mxu0 %v3526_v44  ;;  %v3594_v44 = vld [vmem:[%s4826_s1 + $0x350] ss:$12 sps:$4 sm:$0xff]  }
  0x5f   : > { %v3597_v45 = vld [vmem:[%s4826_s1 + $0x4e4] ss:$12 sps:$4 sm:$0xff]  }
  0x60   : > { %3226 = vmatpush3.bf16.msra.mxu1 %v3528_v47  ;;  %v3595_v47 = vld [vmem:[%s4826_s1 + $0x4e0] ss:$12 sps:$4 sm:$0xff]  }
  0x61   : > { %2377 = vmatpush1.bf16.msra.mxu0 %v3524_v46  ;;  %3227 = vmatprep.subr.bf16.mxu1 %v3532_v50  ;;  %v3598_v46 = vld [vmem:[%s4826_s1 + $0x428] ss:$12 sps:$4 sm:$0xff]  }
  0x62   : > { %2378 = vmatprep.subr.bf16.mxu0 %v3531_v49  ;;  %v3599_v49 = vld [vmem:[%s4826_s1 + $0x368] ss:$12 sps:$4 sm:$0xff]  }
  0x63   : > { %v3602_v50 = vld [vmem:[%s4826_s1 + $0x4fc] ss:$12 sps:$4 sm:$0xff]  }
  0x64   : > { %3228 = vmatpush3.bf16.msra.mxu1 %v3533_v52  ;;  %v3600_v52 = vld [vmem:[%s4826_s1 + $0x4f8] ss:$12 sps:$4 sm:$0xff]  }
  0x65   : > { %2379 = vmatpush1.bf16.msra.mxu0 %v3529_v51  ;;  %3235 = vmatprep.subr.bf16.mxu1 %v3537_v55  ;;  %v3603_v51 = vld [vmem:[%s4826_s1 + $0x440] ss:$12 sps:$4 sm:$0xff]   ;;  %v3608_v55 = vld [vmem:[%s4826_s1 + $0x458] ss:$12 sps:$4 sm:$0xff]  }
  0x66   : > { %2380 = vmatprep.subr.bf16.mxu0 %v3536_v54  ;;  %v3607_v54 = vld [vmem:[%s4826_s1 + $0x514] ss:$12 sps:$4 sm:$0xff]  }
  0x67   : > { %2561 = vmatmul.mubr.bf16.vlgmr.msra.gmra.mrb[4].mxu1 %v4010_v48  ;;  %v3544_v48 = vld [vmem:[%s4826_s1 + $0x3f0] ss:$12 sps:$4 sm:$0xff]  }
  0x68   : > { %3236 = vmatpush3.bf16.msra.mxu1 %v3538_v57  ;;  %2600 = vmatprep.mubr.bf16.mxu1 %v4041_v1  ;;  %v3552_v1 = vld [vmem:[%s4826_s1 + $0x290] ss:$12 sps:$4 sm:$0xff]   ;;  %v3609_v57 = vld [vmem:[%s4826_s1 + $0x398] ss:$12 sps:$4 sm:$0xff]  }
  0x69   : > { %2381 = vmatpush1.bf16.msra.mxu0 %v3534_v56  ;;  %3237 = vmatprep.subr.bf16.mxu1 %v3542_v61  ;;  %v3605_v56 = vld [vmem:[%s4826_s1 + $0x510] ss:$12 sps:$4 sm:$0xff]   ;;  %v3610_v61 = vld [vmem:[%s4826_s1 + $0x528] ss:$12 sps:$4 sm:$0xff]  }
  0x6a   : > { %2382 = vmatprep.subr.bf16.mxu0 %v3541_v58  ;;  %v3612_v58 = vld [vmem:[%s4826_s1 + $0x52c] ss:$12 sps:$4 sm:$0xff]  }
  0x6c   : > { %3238 = vmatpush3.bf16.msra.mxu1 %v3543_v63  ;;  %v3617_v63 = vld [vmem:[%s4826_s1 + $0x544] ss:$12 sps:$4 sm:$0xff]  }
  0x6d   : > { %2383 = vmatpush1.bf16.msra.mxu0 %v3539_v62  ;;  %3239 = vmatprep.subr.bf16.mxu1 %v3547_v3  ;;  %v3614_v62 = vld [vmem:[%s4826_s1 + $0x3b0] ss:$12 sps:$4 sm:$0xff]   ;;  %v3619_v3 = vld [vmem:[%s4826_s1 + $0x488] ss:$12 sps:$4 sm:$0xff]  }
  0x6e   : > { %2384 = vmatprep.subr.bf16.mxu0 %v3546_v0  ;;  %v3618_v0 = vld [vmem:[%s4826_s1 + $0x548] ss:$12 sps:$4 sm:$0xff]  }
  0x70   : > { %3240 = vmatpush3.bf16.msra.mxu1 %v3548_v6  ;;  %v3624_v6 = vld [vmem:[%s4826_s1 + $0x4a0] ss:$12 sps:$4 sm:$0xff]  }
  0x71   : > { %2385 = vmatpush1.bf16.msra.mxu0 %v3544_v48  ;;  %3241 = vmatprep.subr.bf16.mxu1 %v3552_v1  ;;  %v3620_v48 = vld [vmem:[%s4826_s1 + $0x558] ss:$12 sps:$4 sm:$0xff]  }
  0x72   : > { %2386 = vmatprep.subr.bf16.mxu0 %v3551_v7  ;;  %v3627_v7 = vld [vmem:[%s4826_s1 + $0x574] ss:$12 sps:$4 sm:$0xff]   ;;  %v3629_v1 = vld [vmem:[%s4826_s1 + $0x4b8] ss:$12 sps:$4 sm:$0xff]  }
  0x74   : > { %3242 = vmatpush3.bf16.msra.mxu1 %v3553_v11  ;;  %v3630_v11 = vld [vmem:[%s4826_s1 + $0x588] ss:$12 sps:$4 sm:$0xff]  }
  0x75   : > { %2387 = vmatpush1.bf16.msra.mxu0 %v3549_v10  ;;  %3243 = vmatprep.subr.bf16.mxu1 %v3557_v13  ;;  %v3633_v10 = vld [vmem:[%s4826_s1 + $0x590] ss:$12 sps:$4 sm:$0xff]  }
  0x76   : > { %2388 = vmatprep.subr.bf16.mxu0 %v3556_v12  ;;  %v3634_v12 = vld [vmem:[%s4826_s1 + $0x4d0] ss:$12 sps:$4 sm:$0xff]  }
  0x77   : > { %v3637_v13 = vld [vmem:[%s4826_s1 + $0x5a4] ss:$12 sps:$4 sm:$0xff]  }
  0x78   : > { %3244 = vmatpush3.bf16.msra.mxu1 %v3558_v15  ;;  %v3635_v15 = vld [vmem:[%s4826_s1 + $0x5a0] ss:$12 sps:$4 sm:$0xff]  }
  0x79   : > { %2389 = vmatpush1.bf16.msra.mxu0 %v3554_v14  ;;  %3245 = vmatprep.subr.bf16.mxu1 %v3562_v17  ;;  %v3638_v14 = vld [vmem:[%s4826_s1 + $0x5a8] ss:$12 sps:$4 sm:$0xff]  }
  0x7a   : > { %2390 = vmatprep.subr.bf16.mxu0 %v3561_v16  ;;  %v3639_v16 = vld [vmem:[%s4826_s1 + $0x4e8] ss:$12 sps:$4 sm:$0xff]  }
  0x7b   : > { %v3642_v17 = vld [vmem:[%s4826_s1 + $0x5bc] ss:$12 sps:$4 sm:$0xff]  }
  0x7c   : > { %3246 = vmatpush3.bf16.msra.mxu1 %v3563_v19  ;;  %v3640_v19 = vld [vmem:[%s4826_s1 + $0x5b8] ss:$12 sps:$4 sm:$0xff]  }
  0x7d   : > { %2391 = vmatpush1.bf16.msra.mxu0 %v3559_v18  ;;  %3247 = vmatprep.subr.bf16.mxu1 %v3567_v22  ;;  %v3643_v18 = vld [vmem:[%s4826_s1 + $0x5c0] ss:$12 sps:$4 sm:$0xff]  }
  0x7e   : > { %2392 = vmatprep.subr.bf16.mxu0 %v3566_v20  ;;  %v3644_v20 = vld [vmem:[%s4826_s1 + $0x500] ss:$12 sps:$4 sm:$0xff]  }
  0x7f   : > { %v3647_v22 = vld [vmem:[%s4826_s1 + $0x5d4] ss:$12 sps:$4 sm:$0xff]  }
  0x80   : > { %3248 = vmatpush3.bf16.msra.mxu1 %v3568_v25  ;;  %v3660_v25 = vld [vmem:[%s3998_s17 + $0x24] ss:$12 sps:$4 sm:$0xff]  }
  0x81   : > { %2393 = vmatpush1.bf16.msra.mxu0 %v3564_v23  ;;  %3249 = vmatprep.subr.bf16.mxu1 %v3572_v27  ;;  %v3648_v23 = vld [vmem:[%s4826_s1 + $0x5d8] ss:$12 sps:$4 sm:$0xff]   ;;  %v3645_v27 = vld [vmem:[%s4826_s1 + $0x5d0] ss:$12 sps:$4 sm:$0xff]  }
  0x82   : > { %2394 = vmatprep.subr.bf16.mxu0 %v3571_v26  ;;  %v4464_v26 = vld [vmem:[%s3998_s17 + $0x3c] sm:$0x11] }
  0x84   : > { %3250 = vmatpush3.bf16.msra.mxu1 %v3573_v29  ;;  %v3652_v29 = vld [vmem:[%s4826_s1 + $0x5ec] ss:$12 sps:$4 sm:$0xff]  }
  0x85   : > { %2395 = vmatpush1.bf16.msra.mxu0 %v3569_v28  ;;  %3257 = vmatprep.subr.bf16.mxu1 %v3578_v31  ;;  %v3649_v28 = vld [vmem:[%s4826_s1 + $0x518] ss:$12 sps:$4 sm:$0xff]   ;;  %v309_v31 = vshll.u32 %v3660_v25, 16 }
  0x86   : > { %2405 = vmatprep.subr.bf16.mxu0 %v3577_v30  ;;  %v2919_v30 = vcombine.low %v4464_v26, %v4464_v26 }
  0x87   : > { %2601 = vmatmul.mubr.bf16.vlgmr.msra.gmra.mrb[8].mxu1 %v4083_v21  ;;  %v3585_v21 = vld [vmem:[%s4826_s1 + $0x4b0] ss:$12 sps:$4 sm:$0xff]  }
  0x88   : > { %2397 = vmatmul.mubr.bf16.vlgmr.msra.gmra.mrb[0].mxu0 %v4092_v24  ;;  %3258 = vmatpush3.bf16.msra.mxu1 %v3579_v33  ;;  %v3650_v33 = vld [vmem:[%s4826_s1 + $0x5e8] ss:$12 sps:$4 sm:$0xff]  }
  0x89   : > { %2406 = vmatpush1.bf16.msra.mxu0 %v3575_v32  ;;  %3259 = vmatprep.subr.bf16.mxu1 %v3583_v35  ;;  %v3653_v32 = vld [vmem:[%s4826_s1 + $0x5f0] ss:$12 sps:$4 sm:$0xff]   ;;  %v307_v35 = vshrl.u32 %v3660_v25, 16 }
  0x8a   : > { %2407 = vmatprep.subr.bf16.mxu0 %v3582_v34  ;;  %2640 = vmatprep.mubr.bf16.mxu1 %v278_v9  ;;  %v3632_v9 = vld [vmem:[%s4826_s1 + $0x58c] ss:$12 sps:$4 sm:$0xff]   ;;  %v3654_v34 = vld [vmem:[%s4826_s1 + $0x530] ss:$12 sps:$4 sm:$0xff]  }
  0x8b   : > { %2437 = vmatprep.mubr.bf16.mxu0 %v4373_v60 }
  0x8c   : > { %3260 = vmatpush3.bf16.msra.mxu1 %v3584_v37  ;;  %v314_v37 = vshll.u32 %v2919_v30, 16  ;;  %v3710_v30 = vld [vmem:[%s4826_s1 + $0x6f0] ss:$12 sps:$4 sm:$0xff]  }
  0x8d   : > { %2408 = vmatpush1.bf16.msra.mxu0 %v3580_v36  ;;  %3261 = vmatprep.subr.bf16.mxu1 %v3588_v39  ;;  %v311_v36 = vrot.slane %v309_v31, 1  ;;  %v3661_v39 = vld [vmem:[%s4826_s1 + $0x6c8] ss:$12 sps:$4 sm:$0xff]   ;;  %v3714_v31 = vld [vmem:[%s4826_s1 + $0x7b8] ss:$12 sps:$4 sm:$0xff]  }
  0x8e   : > { %2409 = vmatprep.subr.bf16.mxu0 %v3587_v38  ;;  %v3659_v38 = vld [vmem:[%s4826_s1 + $0x604] ss:$12 sps:$4 sm:$0xff]  }
  0x90   : > { %3262 = vmatpush3.bf16.msra.mxu1 %v3589_v40  ;;  %v312_v40 = vor.u32 %v311_v36, %v307_v35  ;;  %v3719_v35 = vld [vmem:[%s4826_s1 + $0x7d0] ss:$12 sps:$4 sm:$0xff]  }
  0x91   : > { %2410 = vmatpush1.bf16.msra.mxu0 %v3585_v21  ;;  %3263 = vmatprep.subr.bf16.mxu1 %v3593_v42  ;;  %v3657_v21 = vld [vmem:[%s4826_s1 + $0x600] ss:$12 sps:$4 sm:$0xff]   ;;  %v3662_v42 = vld [vmem:[%s4826_s1 + $0x608] ss:$12 sps:$4 sm:$0xff]   ;;  %v3722_v36 = vld [vmem:[%s4826_s1 + $0x724] ss:$12 sps:$4 sm:$0xff]  }
  0x92   : > { %2411 = vmatprep.subr.bf16.mxu0 %v3592_v41  ;;  %v316_v41 = vrot.slane %v314_v37, 1  ;;  %v3723_v37 = vld [vmem:[%s4826_s1 + $0x8a8] ss:$12 sps:$4 sm:$0xff]  }
  0x94   : > { %3264 = vmatpush3.bf16.msra.mxu1 %v3594_v44  ;;  %v3666_v44 = vld [vmem:[%s4826_s1 + $0x6e0] ss:$12 sps:$4 sm:$0xff]  }
  0x95   : > { %2412 = vmatpush1.bf16.msra.mxu0 %v3590_v43  ;;  %3265 = vmatprep.subr.bf16.mxu1 %v3598_v46  ;;  %v3665_v43 = vld [vmem:[%s4826_s1 + $0x61c] ss:$12 sps:$4 sm:$0xff]   ;;  %v3667_v46 = vld [vmem:[%s4826_s1 + $0x620] ss:$12 sps:$4 sm:$0xff]  }
  0x96   : > { %2413 = vmatprep.subr.bf16.mxu0 %v3597_v45  ;;  %v3663_v45 = vld [vmem:[%s4826_s1 + $0x618] ss:$12 sps:$4 sm:$0xff]  }
  0x98   : > { %3266 = vmatpush3.bf16.msra.mxu1 %v3599_v49  ;;  %v3670_v49 = vld [vmem:[%s4826_s1 + $0x634] ss:$12 sps:$4 sm:$0xff]  }
  0x99   : > { %2414 = vmatpush1.bf16.msra.mxu0 %v3595_v47  ;;  %3267 = vmatprep.subr.bf16.mxu1 %v3603_v51  ;;  %v317_v47 = vsel %vm242_vm0, %v312_v40, %v316_v41  ;;  %v3668_v51 = vld [vmem:[%s4826_s1 + $0x630] ss:$12 sps:$4 sm:$0xff]   ;;  %v3728_v40 = vld [vmem:[%s4826_s1 + $0x8c0] ss:$12 sps:$4 sm:$0xff]   ;;  %v3725_v41 = vld [vmem:[%s4826_s1 + $0x738] ss:$12 sps:$4 sm:$0xff]  }
  0x9a   : > { %2415 = vmatprep.subr.bf16.mxu0 %v3602_v50  ;;  %v3671_v50 = vld [vmem:[%s4826_s1 + $0x6f8] ss:$12 sps:$4 sm:$0xff]  }
  0x9c   : > { %3268 = vmatpush3.bf16.msra.mxu1 %v3604_v53  ;;  %v3675_v53 = vld [vmem:[%s4826_s1 + $0x64c] ss:$12 sps:$4 sm:$0xff]  }
  0x9d   : > { %2416 = vmatpush1.bf16.msra.mxu0 %v3600_v52  ;;  %3269 = vmatprep.subr.bf16.mxu1 %v3608_v55  ;;  %v3672_v52 = vld [vmem:[%s4826_s1 + $0x638] ss:$12 sps:$4 sm:$0xff]   ;;  %v3673_v55 = vld [vmem:[%s4826_s1 + $0x648] ss:$12 sps:$4 sm:$0xff]  }
  0x9e   : > { %2417 = vmatprep.subr.bf16.mxu0 %v3607_v54  ;;  %v3676_v54 = vld [vmem:[%s4826_s1 + $0x710] ss:$12 sps:$4 sm:$0xff]  }
  0xa0   : > { %3270 = vmatpush3.bf16.msra.mxu1 %v3609_v57  ;;  %v3680_v57 = vld [vmem:[%s4826_s1 + $0x664] ss:$12 sps:$4 sm:$0xff]  }
  0xa1   : > { %2418 = vmatpush1.bf16.msra.mxu0 %v3605_v56  ;;  %3271 = vmatprep.subr.bf16.mxu1 %v3613_v59  ;;  %v3677_v56 = vld [vmem:[%s4826_s1 + $0x650] ss:$12 sps:$4 sm:$0xff]   ;;  %v3678_v59 = vld [vmem:[%s4826_s1 + $0x660] ss:$12 sps:$4 sm:$0xff]  }
  0xa2   : > { %2419 = vmatprep.subr.bf16.mxu0 %v3612_v58  ;;  %v3681_v58 = vld [vmem:[%s4826_s1 + $0x728] ss:$12 sps:$4 sm:$0xff]  }
  0xa4   : > { %3272 = vmatpush3.bf16.msra.mxu1 %v3614_v62  ;;  %v3685_v62 = vld [vmem:[%s4826_s1 + $0x67c] ss:$12 sps:$4 sm:$0xff]  }
  0xa5   : > { %2420 = vmatpush1.bf16.msra.mxu0 %v3610_v61  ;;  %3279 = vmatprep.subr.bf16.mxu1 %v3618_v0  ;;  %v3682_v61 = vld [vmem:[%s4826_s1 + $0x668] ss:$12 sps:$4 sm:$0xff]   ;;  %v3683_v0 = vld [vmem:[%s4826_s1 + $0x678] ss:$12 sps:$4 sm:$0xff]  }
  0xa6   : > { %2421 = vmatprep.subr.bf16.mxu0 %v3617_v63  ;;  %v3686_v63 = vld [vmem:[%s4826_s1 + $0x740] ss:$12 sps:$4 sm:$0xff]  }
  0xa7   : > { %2641 = vmatmul.mubr.bf16.vlgmr.msra.gmra.mrb[12].mxu1 %v4092_v24  ;;  %v3628_v24 = vld [vmem:[%s4826_s1 + $0x578] ss:$12 sps:$4 sm:$0xff]  }
  0xa8   : > { %3280 = vmatpush3.bf16.msra.mxu1 %v3619_v3  ;;  %2680 = vmatprep.mubr.bf16.mxu1 %v4373_v60  ;;  %v3690_v3 = vld [vmem:[%s4826_s1 + $0x694] ss:$12 sps:$4 sm:$0xff]  }
  0xa9   : > { %2422 = vmatpush1.bf16.msra.mxu0 %v3615_v2  ;;  %3281 = vmatprep.subr.bf16.mxu1 %v3623_v5  ;;  %v3687_v2 = vld [vmem:[%s4826_s1 + $0x680] ss:$12 sps:$4 sm:$0xff]  }
  0xaa   : > { %2423 = vmatprep.subr.bf16.mxu0 %v3622_v4  ;;  %v3691_v4 = vld [vmem:[%s4826_s1 + $0x758] ss:$12 sps:$4 sm:$0xff]  }
  0xab   : > { %v4566_v5 = vld [vmem:[%s3998_s17 + $0x2c] ss:$12 sps:$4 sm:$0xff]  }
  0xac   : > { %3282 = vmatpush3.bf16.msra.mxu1 %v3624_v6  ;;  %v333_v6 = vshll.u32 %v4566_v5, 16 }
  0xad   : > { %2424 = vmatpush1.bf16.msra.mxu0 %v3620_v48  ;;  %3283 = vmatprep.subr.bf16.mxu1 %v3628_v24  ;;  %v3740_v48 = vld [vmem:[%s3998_s17 + $0x44] ss:$0 sps:$4 sm:$0x11]   ;;  %s204_s17 = scalar_lea.vmem %s4828_s3, %s3366_s11 }
  0xae   : > { %2425 = vmatprep.subr.bf16.mxu0 %v3627_v7  ;;  %v3688_v7 = vld [vmem:[%s4826_s1 + $0x690] ss:$12 sps:$4 sm:$0xff]   ;;  %v3692_v24 = vld [vmem:[%s4826_s1 + $0x698] ss:$12 sps:$4 sm:$0xff]  }
  0xb0   : > { %3284 = vmatpush3.bf16.msra.mxu1 %v3629_v1  ;;  %v3696_v1 = vld [vmem:[%s4826_s1 + $0x770] ss:$12 sps:$4 sm:$0xff]  }
  0xb1   : > { %2426 = vmatpush1.bf16.msra.mxu0 %v3625_v8  ;;  %3285 = vmatprep.subr.bf16.mxu1 %v3633_v10  ;;  %v3695_v8 = vld [vmem:[%s4826_s1 + $0x6ac] ss:$12 sps:$4 sm:$0xff]   ;;  %v335_v10 = vrot.slane %v333_v6, 1 }
  0xb2   : > { %2427 = vmatprep.subr.bf16.mxu0 %v3632_v9  ;;  %v331_v9 = vshrl.u32 %v4566_v5, 16  ;;  %v3757_v6 = vld [vmem:[%s4826_s1 + $0x7f8] ss:$12 sps:$4 sm:$0xff]  }
  0xb4   : > { %3286 = vmatpush3.bf16.msra.mxu1 %v3634_v12  ;;  %v3693_v12 = vld [vmem:[%s4826_s1 + $0x6a8] ss:$12 sps:$4 sm:$0xff]  }
  0xb5   : > { %2428 = vmatpush1.bf16.msra.mxu0 %v3630_v11  ;;  %3287 = vmatprep.subr.bf16.mxu1 %v3638_v14  ;;  %v338_v11 = vshll.u32 %v3740_v48, 16  ;;  %v3701_v14 = vld [vmem:[%s4826_s1 + $0x6c4] ss:$12 sps:$4 sm:$0xff]   ;;  %v3759_v48 = vld [vmem:[%s4826_s1 + $0x7fc] ss:$12 sps:$4 sm:$0xff]  }
  0xb6   : > { %2429 = vmatprep.subr.bf16.mxu0 %v3637_v13  ;;  %v3697_v13 = vld [vmem:[%s4826_s1 + $0x6b0] ss:$12 sps:$4 sm:$0xff]  }
  0xb8   : > { %3288 = vmatpush3.bf16.msra.mxu1 %v3639_v16  ;;  %v336_v16 = vor.u32 %v335_v10, %v331_v9  ;;  %v3765_v10 = vld [vmem:[%s4826_s1 + $0x82c] ss:$12 sps:$4 sm:$0xff]  }
  0xb9   : > { %2430 = vmatpush1.bf16.msra.mxu0 %v3635_v15  ;;  %3289 = vmatprep.subr.bf16.mxu1 %v3643_v18  ;;  %v3703_v15 = vld [vmem:[%s4826_s1 + $0x848] ss:$12 sps:$4 sm:$0xff]   ;;  %v3699_v18 = vld [vmem:[%s4826_s1 + $0x6c0] ss:$12 sps:$4 sm:$0xff]  }
  0xba   : > { %2431 = vmatprep.subr.bf16.mxu0 %v3642_v17  ;;  %v340_v17 = vrot.slane %v338_v11, 1 }
  0xbc   : > { %3290 = vmatpush3.bf16.msra.mxu1 %v3644_v20  ;;  %v3707_v20 = vld [vmem:[%s4826_s1 + $0x6dc] ss:$12 sps:$4 sm:$0xff]  }
  0xbd   : > { %2432 = vmatpush1.bf16.msra.mxu0 %v3640_v19  ;;  %3291 = vmatprep.subr.bf16.mxu1 %v3648_v23  ;;  %v3704_v19 = vld [vmem:[%s4826_s1 + $0x788] ss:$12 sps:$4 sm:$0xff]   ;;  %v4609_v23 = vsel %vm242_vm0, %v336_v16, %v340_v17  ;;  %v3769_v16 = vld [vmem:[%s4826_s1 + $0x858] ss:$12 sps:$4 sm:$0xff]  }
  0xbe   : > { %2433 = vmatprep.subr.bf16.mxu0 %v3647_v22  ;;  %v3708_v22 = vld [vmem:[%s4826_s1 + $0x860] ss:$12 sps:$4 sm:$0xff]  }
  0xbf   : > { %v3774_v17 = vld [vmem:[%s4826_s1 + $0x874] ss:$12 sps:$4 sm:$0xff]  }
  0xc0   : > { %3292 = vmatpush3.bf16.msra.mxu1 %v3649_v28  ;;  %v3712_v28 = vld [vmem:[%s4826_s1 + $0x6f4] ss:$12 sps:$4 sm:$0xff]  }
  0xc1   : > { %2434 = vmatpush1.bf16.msra.mxu0 %v3645_v27  ;;  %3293 = vmatprep.subr.bf16.mxu1 %v3653_v32  ;;  %v3709_v27 = vld [vmem:[%s4826_s1 + $0x7a0] ss:$12 sps:$4 sm:$0xff]  }
  0xc2   : > { %2435 = vmatprep.subr.bf16.mxu0 %v3652_v29  ;;  %v3713_v29 = vld [vmem:[%s4826_s1 + $0x878] ss:$12 sps:$4 sm:$0xff]  }
  0xc3   : > { %v3717_v32 = vld [vmem:[%s4826_s1 + $0x70c] ss:$12 sps:$4 sm:$0xff]  }
  0xc4   : > { %3294 = vmatpush3.bf16.msra.mxu1 %v3654_v34  ;;  %v3715_v34 = vld [vmem:[%s4826_s1 + $0x708] ss:$12 sps:$4 sm:$0xff]  }
  0xc5   : > { %2436 = vmatpush1.bf16.msra.mxu0 %v3650_v33  ;;  %3301 = vmatprep.subr.bf16.mxu1 %v3661_v39  ;;  %v3718_v33 = vld [vmem:[%s4826_s1 + $0x890] ss:$12 sps:$4 sm:$0xff]   ;;  %v3724_v39 = vld [vmem:[%s4826_s1 + $0x7e8] ss:$12 sps:$4 sm:$0xff]  }
  0xc6   : > { %2446 = vmatprep.subr.bf16.mxu0 %v3659_v38  ;;  %v3720_v38 = vld [vmem:[%s4826_s1 + $0x720] ss:$12 sps:$4 sm:$0xff]  }
  0xc7   : > { %2681 = vmatmul.mubr.bf16.vlgmr.msra.gmra.mrb[16].mxu1 %v3660_v25 }
  0xc8   : > { %2438 = vmatmul.mubr.bf16.vlgmr.msra.gmra.mrb[0].mxu0 %v3660_v25  ;;  %3302 = vmatpush3.bf16.msra.mxu1 %v3662_v42  ;;  %v3705_v25 = vld [vmem:[%s4826_s1 + $0x6d8] ss:$12 sps:$4 sm:$0xff]   ;;  %v3729_v42 = vld [vmem:[%s4826_s1 + $0x800] ss:$12 sps:$4 sm:$0xff]  }
  0xc9   : > { %2447 = vmatpush1.bf16.msra.mxu0 %v3657_v21  ;;  %3303 = vmatprep.subr.bf16.mxu1 %v3666_v44  ;;  %v3727_v21 = vld [vmem:[%s4826_s1 + $0x73c] ss:$12 sps:$4 sm:$0xff]   ;;  %v321_v44 = vshll.u32 %v4373_v60, 16 }
  0xca   : > { %2448 = vmatprep.subr.bf16.mxu0 %v3665_v43  ;;  %2720 = vmatprep.mubr.bf16.mxu1 %v317_v47  ;;  %v2920_v43 = vcombine.high %v4464_v26, %v4464_v26  ;;  %v3730_v26 = vld [vmem:[%s4826_s1 + $0x750] ss:$12 sps:$4 sm:$0xff]  }
  0xcb   : > { %2478 = vmatprep.mubr.bf16.mxu0 %v317_v47  ;;  %v319_v47 = vshrl.u32 %v4373_v60, 16  ;;  %v3738_v60 = vld [vmem:[%s4826_s1 + $0x8f0] ss:$12 sps:$4 sm:$0xff]  }
  0xcc   : > { %3304 = vmatpush3.bf16.msra.mxu1 %v3667_v46  ;;  %v3733_v46 = vld [vmem:[%s4826_s1 + $0x8d8] ss:$12 sps:$4 sm:$0xff]  }
  0xcd   : > { %2449 = vmatpush1.bf16.msra.mxu0 %v3663_v45  ;;  %3305 = vmatprep.subr.bf16.mxu1 %v3671_v50  ;;  %v3732_v45 = vld [vmem:[%s4826_s1 + $0x754] ss:$12 sps:$4 sm:$0xff]   ;;  %v323_v50 = vrot.slane %v321_v44, 1 }
  0xce   : > { %2450 = vmatprep.subr.bf16.mxu0 %v3670_v49  ;;  %v3734_v49 = vld [vmem:[%s4826_s1 + $0x818] ss:$12 sps:$4 sm:$0xff]  }
  0xd0   : > { %3306 = vmatpush3.bf16.msra.mxu1 %v3672_v52  ;;  %v3737_v52 = vld [vmem:[%s4826_s1 + $0x76c] ss:$12 sps:$4 sm:$0xff]  }
  0xd1   : > { %2451 = vmatpush1.bf16.msra.mxu0 %v3668_v51  ;;  %3307 = vmatprep.subr.bf16.mxu1 %v3676_v54  ;;  %v326_v51 = vshll.u32 %v2920_v43, 16  ;;  %v3739_v54 = vld [vmem:[%s4826_s1 + $0x830] ss:$12 sps:$4 sm:$0xff]  }
  0xd2   : > { %2452 = vmatprep.subr.bf16.mxu0 %v3675_v53  ;;  %v3735_v53 = vld [vmem:[%s4826_s1 + $0x768] ss:$12 sps:$4 sm:$0xff]  }
  0xd4   : > { %3308 = vmatpush3.bf16.msra.mxu1 %v3677_v56  ;;  %v328_v56 = vrot.slane %v326_v51, 1 }
  0xd5   : > { %2453 = vmatpush1.bf16.msra.mxu0 %v3673_v55  ;;  %3309 = vmatprep.subr.bf16.mxu1 %v3681_v58  ;;  %v324_v55 = vor.u32 %v323_v50, %v319_v47  ;;  %v3741_v58 = vld [vmem:[%s4826_s1 + $0x780] ss:$12 sps:$4 sm:$0xff]  }
  0xd6   : > { %2454 = vmatprep.subr.bf16.mxu0 %v3680_v57  ;;  %v3743_v57 = vld [vmem:[%s4826_s1 + $0x784] ss:$12 sps:$4 sm:$0xff]  }
  0xd8   : > { %3310 = vmatpush3.bf16.msra.mxu1 %v3682_v61  ;;  %v3747_v61 = vld [vmem:[%s4826_s1 + $0x79c] ss:$12 sps:$4 sm:$0xff]  }
  0xd9   : > { %2455 = vmatpush1.bf16.msra.mxu0 %v3678_v59  ;;  %3311 = vmatprep.subr.bf16.mxu1 %v3686_v63  ;;  %v4701_v59 = vsel %vm242_vm0, %v324_v55, %v328_v56  ;;  %v3750_v63 = vld [vmem:[%s4826_s1 + $0x7b4] ss:$12 sps:$4 sm:$0xff]  }
  0xda   : > { %2456 = vmatprep.subr.bf16.mxu0 %v3685_v62  ;;  %v3745_v62 = vld [vmem:[%s4826_s1 + $0x798] ss:$12 sps:$4 sm:$0xff]  }
  0xdc   : > { %3312 = vmatpush3.bf16.msra.mxu1 %v3687_v2  ;;  %v3753_v2 = vld [vmem:[%s4826_s1 + $0x7cc] ss:$12 sps:$4 sm:$0xff]  }
  0xdd   : > { %2457 = vmatpush1.bf16.msra.mxu0 %v3683_v0  ;;  %3313 = vmatprep.subr.bf16.mxu1 %v3691_v4  ;;  %v3748_v0 = vld [vmem:[%s4826_s1 + $0x7b0] ss:$12 sps:$4 sm:$0xff]  }
  0xde   : > { %2458 = vmatprep.subr.bf16.mxu0 %v3690_v3  ;;  %v3751_v3 = vld [vmem:[%s4826_s1 + $0x7c8] ss:$12 sps:$4 sm:$0xff]   ;;  %v3756_v4 = vld [vmem:[%s4826_s1 + $0x7e4] ss:$12 sps:$4 sm:$0xff]  }
  0xe0   : > { %3314 = vmatpush3.bf16.msra.mxu1 %v3692_v24 }
  0xe1   : > { %2459 = vmatpush1.bf16.msra.mxu0 %v3688_v7  ;;  %3315 = vmatprep.subr.bf16.mxu1 %v3696_v1  ;;  %v3762_v7 = vld [vmem:[%s4826_s1 + $0x814] ss:$12 sps:$4 sm:$0xff]   ;;  %v3760_v1 = vld [vmem:[%s4826_s1 + $0x810] ss:$12 sps:$4 sm:$0xff]  }
  0xe2   : > { %2460 = vmatprep.subr.bf16.mxu0 %v3695_v8 }
  0xe4   : > { %3316 = vmatpush3.bf16.msra.mxu1 %v3697_v13  ;;  %v3768_v13 = vld [vmem:[%s4826_s1 + $0x844] ss:$12 sps:$4 sm:$0xff]  }
  0xe5   : > { %2461 = vmatpush1.bf16.msra.mxu0 %v3693_v12  ;;  %3323 = vmatprep.subr.bf16.mxu1 %v3703_v15  ;;  %v3763_v12 = vld [vmem:[%s4826_s1 + $0x828] ss:$12 sps:$4 sm:$0xff]  }
  0xe6   : > { %2462 = vmatprep.subr.bf16.mxu0 %v3701_v14  ;;  %v3766_v14 = vld [vmem:[%s4826_s1 + $0x840] ss:$12 sps:$4 sm:$0xff]   ;;  %v3771_v15 = vld [vmem:[%s4826_s1 + $0x85c] ss:$12 sps:$4 sm:$0xff]  }
  0xe7   : > { %2721 = vmatmul.mubr.bf16.vlgmr.msra.gmra.mrb[20].mxu1 %v4566_v5 }
  0xe8   : > { %3324 = vmatpush3.bf16.msra.mxu1 %v3704_v19  ;;  %2760 = vmatprep.mubr.bf16.mxu1 %v4609_v23  ;;  %v3777_v19 = vld [vmem:[%s4826_s1 + $0x88c] ss:$12 sps:$4 sm:$0xff]  }
  0xe9   : > { %2463 = vmatpush1.bf16.msra.mxu0 %v3699_v18  ;;  %3325 = vmatprep.subr.bf16.mxu1 %v3708_v22  ;;  %v3772_v18 = vld [vmem:[%s4826_s1 + $0x870] ss:$12 sps:$4 sm:$0xff]  }
  0xea   : > { %2464 = vmatprep.subr.bf16.mxu0 %v3707_v20  ;;  %v3775_v20 = vld [vmem:[%s4826_s1 + $0x888] ss:$12 sps:$4 sm:$0xff]   ;;  %v3780_v22 = vld [vmem:[%s4826_s1 + $0x8a4] ss:$12 sps:$4 sm:$0xff]  }
  0xec   : > { %3326 = vmatpush3.bf16.msra.mxu1 %v3709_v27  ;;  %v3781_v27 = vld [vmem:[%s4826_s1 + $0x8b8] ss:$12 sps:$4 sm:$0xff]  }
  0xed   : > { %2465 = vmatpush1.bf16.msra.mxu0 %v3705_v25  ;;  %3327 = vmatprep.subr.bf16.mxu1 %v3713_v29  ;;  %v3783_v25 = vld [vmem:[%s4826_s1 + $0x8bc] ss:$12 sps:$4 sm:$0xff]  }
  0xee   : > { %2466 = vmatprep.subr.bf16.mxu0 %v3712_v28  ;;  %v3786_v28 = vld [vmem:[%s4826_s1 + $0x8d4] ss:$12 sps:$4 sm:$0xff]  }
  0xf0   : > { %3328 = vmatpush3.bf16.msra.mxu1 %v3714_v31  ;;  %v3784_v31 = vld [vmem:[%s4826_s1 + $0x8d0] ss:$12 sps:$4 sm:$0xff]  }
  0xf1   : > { %2467 = vmatpush1.bf16.msra.mxu0 %v3710_v30  ;;  %3329 = vmatprep.subr.bf16.mxu1 %v3718_v33 }
  0xf2   : > { %2468 = vmatprep.subr.bf16.mxu0 %v3717_v32 }
  0xf4   : > { %3330 = vmatpush3.bf16.msra.mxu1 %v3719_v35 }
  0xf5   : > { %2469 = vmatpush1.bf16.msra.mxu0 %v3715_v34  ;;  %3331 = vmatprep.subr.bf16.mxu1 %v3723_v37  ;;  %v3789_v34 = vld [vmem:[%s4826_s1 + $0x8ec] ss:$12 sps:$4 sm:$0xff]   ;;  %v731_v37 = vlaneseq }
  0xf6   : > { %2470 = vmatprep.subr.bf16.mxu0 %v3722_v36  ;;  %v3787_v36 = vld [vmem:[%s4826_s1 + $0x8e8] ss:$12 sps:$4 sm:$0xff]  }
  0xf8   : > { %3332 = vmatpush3.bf16.msra.mxu1 %v3724_v39 }
  0xf9   : > { %2471 = vmatpush1.bf16.msra.mxu0 %v3720_v38  ;;  %3333 = vmatprep.subr.bf16.mxu1 %v3728_v40  ;;  %v732_v38 = vshrl.u32 %v731_v37, 7  ;;  %v2815_v37 = vld [vmem:[%s204_s17] sm:$0x7] }
  0xfa   : > { %2472 = vmatprep.subr.bf16.mxu0 %v3727_v21  ;;  %v729_v21 = vld [vmem:[%s4827_s2] sm:$0x7] }
  0xfb   : > { %v741_v39 = vsub.s32 2, %v732_v38 }
  0xfc   : > { %3334 = vmatpush3.bf16.msra.mxu1 %v3729_v42 }
  0xfd   : > { %2473 = vmatpush1.bf16.msra.mxu0 %v3725_v41  ;;  %3335 = vmatprep.subr.bf16.mxu1 %v3733_v46  ;;  %v742_v40 = vrot.slane %v729_v21, %v741_v39 }
  0xfe   : > { %2474 = vmatprep.subr.bf16.mxu0 %v3732_v45 }
 0x100   : > { %3336 = vmatpush3.bf16.msra.mxu1 %v3734_v49 }
 0x101   : > { %2475 = vmatpush1.bf16.msra.mxu0 %v3730_v26  ;;  %3337 = vmatprep.subr.bf16.mxu1 %v3738_v60 }
 0x102   : > { %2476 = vmatprep.subr.bf16.mxu0 %v3737_v52 }
 0x104   : > { %3338 = vmatpush3.bf16.msra.mxu1 %v3739_v54 }
 0x105   : > { %2477 = vmatpush1.bf16.msra.mxu0 %v3735_v53 }
 0x106   : > { %2487 = vmatprep.subr.bf16.mxu0 %v3743_v57 }
 0x107   : > { %2761 = vmatmul.mubr.bf16.vlgmr.msra.gmra.mrb[24].mxu1 %v4701_v59 }
 0x108   : > { %2479 = vmatmul.mubr.bf16.vlgmr.msra.gmra.mrb[0].mxu0 %v4566_v5  ;;  %v3754_v5 = vld [vmem:[%s4826_s1 + $0x7e0] ss:$12 sps:$4 sm:$0xff]  }
 0x109   : > { %2488 = vmatpush1.bf16.msra.mxu0 %v3741_v58  ;;  %2519 = vmatprep.mubr.bf16.mxu0 %v4609_v23  ;;  %v3778_v23 = vld [vmem:[%s4826_s1 + $0x8a0] ss:$12 sps:$4 sm:$0xff]  }
 0x10a   : > { %2489 = vmatprep.subr.bf16.mxu0 %v3747_v61 }
 0x10d   : > { %2490 = vmatpush1.bf16.msra.mxu0 %v3745_v62 }
 0x10e   : > { %2491 = vmatprep.subr.bf16.mxu0 %v3750_v63 }
 0x111   : > { %2492 = vmatpush1.bf16.msra.mxu0 %v3748_v0 }
 0x112   : > { %2493 = vmatprep.subr.bf16.mxu0 %v3753_v2 }
 0x115   : > { %2494 = vmatpush1.bf16.msra.mxu0 %v3751_v3 }
 0x116   : > { %2495 = vmatprep.subr.bf16.mxu0 %v3756_v4 }
 0x119   : > { %2496 = vmatpush1.bf16.msra.mxu0 %v3754_v5 }
 0x11a   : > { %2497 = vmatprep.subr.bf16.mxu0 %v3759_v48  ;;  %v4739_v24 = vpop.f32.mrb[0].mxu1 }
 0x11b   : > { %v4741_v8 = vpop.f32.mrb[1].mxu1 }
 0x11c   : > { %v2320_v9 = vpop.f32.mrb[2].mxu1 }
 0x11d   : > { %2498 = vmatpush1.bf16.msra.mxu0 %v3757_v6  ;;  %v2321_v11 = vpop.f32.mrb[3].mxu1  ;;  %v737_v9 = vsub.s32 1, %v732_v38 }
 0x11e   : > { %2499 = vmatprep.subr.bf16.mxu0 %v3762_v7 }
 0x11f   : > { %v738_v11 = vrot.slane %v729_v21, %v737_v9 }
 0x121   : > { %2500 = vmatpush1.bf16.msra.mxu0 %v3760_v1  ;;  %v733_v1 = vsub.s32 0, %v732_v38 }
 0x122   : > { %2501 = vmatprep.subr.bf16.mxu0 %v3765_v10 }
 0x123   : > { %v734_v10 = vrot.slane %v729_v21, %v733_v1 }
 0x125   : > { %2502 = vmatpush1.bf16.msra.mxu0 %v3763_v12  ;;  %v3814_v12 = vmov 1966171168  }
 0x126   : > { %2503 = vmatprep.subr.bf16.mxu0 %v3768_v13  ;;  %v2782_v13 = vunpack.c.l.s4 %v3814_v12 }
 0x129   : > { %2504 = vmatpush1.bf16.msra.mxu0 %v3766_v14 }
 0x12a   : > { %2505 = vmatprep.subr.bf16.mxu0 %v3771_v15  ;;  %v2317_v15 = vadd.f32 %v4739_v24, %v734_v10 }
 0x12d   : > { %2506 = vmatpush1.bf16.msra.mxu0 %v3769_v16  ;;  %v2319_v16 = vadd.f32 %v4741_v8, %v738_v11 }
 0x12e   : > { %2507 = vmatprep.subr.bf16.mxu0 %v3774_v17 }
 0x131   : > { %2508 = vmatpush1.bf16.msra.mxu0 %v3772_v18  ;;  %v2783_v18 = vunpack.c.0.s8 %v2782_v13 }
 0x132   : > { %2509 = vmatprep.subr.bf16.mxu0 %v3777_v19 }
 0x135   : > { %2510 = vmatpush1.bf16.msra.mxu0 %v3775_v20 }
 0x136   : > { %2511 = vmatprep.subr.bf16.mxu0 %v3780_v22 }
 0x139   : > { %2512 = vmatpush1.bf16.msra.mxu0 %v3778_v23 }
 0x13a   : > { %2513 = vmatprep.subr.bf16.mxu0 %v3783_v25  ;;  %v3229_v29 = vpop.f32.mrb[4].mxu1 }
 0x13b   : > { %v3230_v30 = vpop.f32.mrb[5].mxu1 }
 0x13c   : > { %v3231_v32 = vadd.f32 %v3230_v30, %v3229_v29  ;;  %v3232_v33 = vpop.f32.mrb[6].mxu1 }
 0x13d   : > { %2514 = vmatpush1.bf16.msra.mxu0 %v3781_v27  ;;  %v3233_v35 = vpop.f32.mrb[7].mxu1 }
 0x13e   : > { %2515 = vmatprep.subr.bf16.mxu0 %v3786_v28  ;;  %v2563_v41 = vadd.f32 %v3231_v32, %v742_v40 }
 0x141   : > { %2516 = vmatpush1.bf16.msra.mxu0 %v3784_v31  ;;  %v2786_v31 = vsub.s32 %v2783_v18, %v732_v38 }
 0x142   : > { %2517 = vmatprep.subr.bf16.mxu0 %v3789_v34 }
 0x145   : > { %2518 = vmatpush1.bf16.msra.mxu0 %v3787_v36 }
 0x148   : > { %2520 = vmatmul.mubr.bf16.vlgmr.msra.gmra.mrb[0].mxu0 %v4701_v59 }
 0x15a   : > { %v3251_v42 = vpop.f32.mrb[8].mxu1 }
 0x15b   : > { %v3252_v43 = vpop.f32.mrb[9].mxu1 }
 0x15c   : > { %v3253_v44 = vadd.f32 %v3252_v43, %v3251_v42  ;;  %v3254_v45 = vpop.f32.mrb[10].mxu1 }
 0x15d   : > { %v3255_v46 = vpop.f32.mrb[11].mxu1 }
 0x15e   : > { %v2603_v47 = vadd.f32 %v3253_v44, %v2563_v41 }
 0x17a   : > { %v3273_v26 = vpop.f32.mrb[12].mxu1 }
 0x17b   : > { %v3274_v49 = vpop.f32.mrb[13].mxu1 }
 0x17c   : > { %v3275_v50 = vadd.f32 %v3274_v49, %v3273_v26  ;;  %v3276_v51 = vpop.f32.mrb[14].mxu1 }
 0x17d   : > { %v3277_v52 = vpop.f32.mrb[15].mxu1 }
 0x17e   : > { %v2643_v60 = vadd.f32 %v3275_v50, %v2603_v47 }
 0x19a   : > { %v3295_v53 = vpop.f32.mrb[16].mxu1 }
 0x19b   : > { %v3296_v54 = vpop.f32.mrb[17].mxu1 }
 0x19c   : > { %v3297_v55 = vadd.f32 %v3296_v54, %v3295_v53  ;;  %v3298_v56 = vpop.f32.mrb[18].mxu1 }
 0x19d   : > { %v3299_v57 = vpop.f32.mrb[19].mxu1 }
 0x19e   : > { %v2683_v58 = vadd.f32 %v3297_v55, %v2643_v60 }
 0x1ba   : > { %v3317_v59 = vpop.f32.mrb[20].mxu1 }
 0x1bb   : > { %v3318_v61 = vpop.f32.mrb[21].mxu1 }
 0x1bc   : > { %v3319_v62 = vadd.f32 %v3318_v61, %v3317_v59  ;;  %v3320_v63 = vpop.f32.mrb[22].mxu1 }
 0x1bd   : > { %v3321_v0 = vpop.f32.mrb[23].mxu1 }
 0x1be   : > { %v2723_v2 = vadd.f32 %v3319_v62, %v2683_v58 }
 0x1da   : > { %v3339_v3 = vpop.f32.mrb[24].mxu1 }
 0x1db   : > { %v3340_v4 = vpop.f32.mrb[25].mxu1 }
 0x1dc   : > { %v3341_v5 = vadd.f32 %v3340_v4, %v3339_v3  ;;  %v3342_v48 = vpop.f32.mrb[26].mxu1 }
 0x1dd   : > { %v3343_v6 = vpop.f32.mrb[27].mxu1 }
 0x1de   : > { %v2763_v7 = vadd.f32 %v3341_v5, %v2723_v2 }
 0x1e0   : > { %v2770_v14 = vmax.f32 %v2763_v7, 0.0 }
 0x1e2   : > { %v2773_v22 = vmin.f32 %v2770_v14, 6.0 }
 0x1e4   : > { %v2776_v8 = vpack.c.bf16 %v2773_v22, %v2773_v22 }
 0x1e6   : > { %v2794_v34 = vrot.slane %v2776_v8, %v2786_v31 }
 0x21b   : > { %v2521_v17 = vpop.f32.mrb[0].mxu0 }
 0x21c   : > { %v3346_v19 = vadd.f32 %v2521_v17, %v2317_v15  ;;  %v2523_v20 = vpop.f32.mrb[1].mxu0 }
 0x21d   : > { %v3348_v23 = vadd.f32 %v2523_v20, %v2319_v16  ;;  %v2525_v25 = vpop.f32.mrb[2].mxu0 }
 0x21e   : > { %v2768_v27 = vmax.f32 %v3346_v19, 0.0  ;;  %v2526_v28 = vpop.f32.mrb[3].mxu0 }
 0x21f   : > { %v2769_v29 = vmax.f32 %v3348_v23, 0.0 }
 0x220   : > { %v2771_v30 = vmin.f32 %v2768_v27, 6.0 }
 0x221   : > { %v2772_v32 = vmin.f32 %v2769_v29, 6.0 }
 0x223   : > { %v3210_v33 = vpack.c.bf16 %v2772_v32, %v2771_v30 }
 0x225   : > { %v2787_v35 = vrot.slane %v3210_v33, %v2786_v31 }
 0x227   : > { %v2795_v36 = vcombine.low %v2787_v35, %v2794_v34 }
 0x229   : > { %v2802_v38 = vrot.slane %v2795_v36, %v2786_v31 }
 0x22b   : > { %v2816_v39 = vsel %vm2814_vm11, %v2802_v38, %v2815_v37 }
 0x22c   : > { %2817 = vst [vmem:[%s204_s17] sm:$0x7] %v2816_v39 }
 0x22d PF: > { %s13_s14 = sadd.s32 1, %s3812_s14   ;;  %s4831_s12 = smov %s3808_s13 }
 0x22e   : > { %p10_p5 = scmp.ge.s32.totalorder %s13_s14, 4   ;;  %s4832_s13 = smov %s4834_s15 }
 0x230   :  { %12 = sbr.rel (!%p10_p5) target bundleno = 2 (0x2), region = 62 }

</bundles_post_ra>
